<compile_context>
chip_gen: v5e
topology: v5e:2x2
jax: 0.10.0
libtpu: 0.0.40
codegen_flags: <defaults>
</compile_context>

<pallas_src>
from functools import partial

import jax
import jax.numpy as jnp
from jax import lax
from jax.experimental import pallas as pl
from jax.experimental.pallas import tpu as pltpu

_EPS = 1e-5  # PyTorch BatchNorm2d default eps


# ---------------------------------------------------------------------------
# In-kernel helpers
# ---------------------------------------------------------------------------
def _conv1x1_row(ch, w_ref, b_ref, j):
    """Output channel j of a 1x1 conv as unrolled VPU broadcast-FMAs.

    ch    : list of (N, St, 128) channel slabs (tile-aligned views)
    w_ref : (C_in, C_out) SMEM scalars
    b_ref : (C_out,)      SMEM scalars
    """
    acc = w_ref[0, j] * ch[0] + b_ref[j]           # init from first FMA + bias
    for i in range(1, len(ch)):
        acc = acc + w_ref[i, j] * ch[i]
    return acc                                     # (N, St, 128)


def _make_stats_kernel(N, C_in, F_int):
    """Pass 1: per-channel sum / sumsq of yg = Wg*g+bg and yx = Wx*x+bx.

    Accumulates into a (4, F_int, St, 128) VMEM output that stays resident
    across the pixel-tile axis (index_map constant); only VPU adds per tile,
    the final cross-lane/sublane reduction is done in XLA afterwards.
    """
    def kernel(g_ref, x_ref, wg_ref, bg_ref, wx_ref, bx_ref, acc_ref):
        t = pl.program_id(0)

        @pl.when(t == 0)
        def _init():
            acc_ref[...] = jnp.zeros_like(acc_ref)

        g_ch = [g_ref[:, i, :, :] for i in range(C_in)]
        x_ch = [x_ref[:, i, :, :] for i in range(C_in)]

        for j in range(F_int):
            yg = _conv1x1_row(g_ch, wg_ref, bg_ref, j)       # (N, St, 128)
            yx = _conv1x1_row(x_ch, wx_ref, bx_ref, j)
            # Reduce only over N (a couple of vreg adds) and keep lane slabs.
            acc_ref[0, j] = acc_ref[0, j] + jnp.sum(yg, axis=0)
            acc_ref[1, j] = acc_ref[1, j] + jnp.sum(yg * yg, axis=0)
            acc_ref[2, j] = acc_ref[2, j] + jnp.sum(yx, axis=0)
            acc_ref[3, j] = acc_ref[3, j] + jnp.sum(yx * yx, axis=0)

    return kernel


def _make_yp_kernel(N, C_in, F_int):
    """Pass 2: yp = Conv1x1_{F_int->1}(ReLU(BNg(yg) + BNx(yx))) + bp.

    The g/x BatchNorms are pre-folded into the conv weights/biases, so this is
    pure unrolled FMAs + a max; yp is written to HBM so pass 3 never touches g.
    """
    def kernel(g_ref, x_ref, wgf_ref, bgf_ref, wxf_ref, bxf_ref,
               wp_ref, bp_ref, yp_ref):
        g_ch = [g_ref[:, i, :, :] for i in range(C_in)]
        x_ch = [x_ref[:, i, :, :] for i in range(C_in)]

        yp = None
        for j in range(F_int):
            g1 = _conv1x1_row(g_ch, wgf_ref, bgf_ref, j)     # BN folded in
            x1 = _conv1x1_row(x_ch, wxf_ref, bxf_ref, j)
            s = jnp.maximum(g1 + x1, 0.0)
            if j == 0:
                yp = wp_ref[0] * s + bp_ref[0]
            else:
                yp = yp + wp_ref[j] * s
        yp_ref[...] = yp                                     # lane-dense store

    return kernel


def _out_kernel(x_ref, yp_ref, ap_ref, cp_ref, out_ref):
    """Pass 3 (pure streaming): out = x * sigmoid(ap*yp + cp)."""
    z = ap_ref[0] * yp_ref[...] + cp_ref[0]                  # folded psi-BN
    psi = 1.0 / (1.0 + jnp.exp(-z))                          # exact sigmoid
    out_ref[...] = x_ref[...] * psi[:, None, :, :]           # broadcast over C


# ---------------------------------------------------------------------------
# Host-side wrapper
# ---------------------------------------------------------------------------
def _pick_sublane_tile(S, N, C, target_block_bytes=8 << 20):
    """Largest St (multiple of 8, dividing S) whose double-buffered g/x/out
    blocks stay within a conservative VMEM budget (safe on v5e/v6e/v7x).
    Falls back to the full extent when S is not a multiple of 8."""
    if S % 8 != 0:
        return S

    def block_bytes(st):
        # g + x + out blocks, each (N, C, st, 128) f32, double-buffered.
        return 3 * 2 * N * C * st * 128 * 4

    st = 8
    while (st * 2 <= S and S % (st * 2) == 0
           and block_bytes(st * 2) <= target_block_bytes):
        st *= 2
    return st


@partial(jax.jit, static_argnames=("sublane_tile",))
def attention_block(g, x, params, sublane_tile=None):
    """g, x: NCHW float32 arrays of shape (N, F_g, H, W)."""
    N, C, H, W = g.shape
    HW = H * W
    assert HW % 128 == 0, "H*W must be a multiple of 128 for the lane-dense layout"
    S = HW // 128
    F_int = params["wg"].shape[1]

    St = _pick_sublane_tile(S, N, C) if sublane_tile is None else sublane_tile
    assert S % St == 0 and (St % 8 == 0 or St == S)
    n_tiles = S // St
    count = float(N * HW)

    f32 = jnp.float32
    # NCHW -> (N, C, HW//128, 128): pure reshape, pixels dense on sublane+lane.
    g4 = g.reshape(N, C, S, 128).astype(f32)
    x4 = x.reshape(N, C, S, 128).astype(f32)

    smem = pl.BlockSpec(memory_space=pltpu.MemorySpace.SMEM)
    data_spec = pl.BlockSpec((N, C, St, 128), lambda t: (0, 0, t, 0))
    yp_spec = pl.BlockSpec((N, St, 128), lambda t: (0, t, 0))
    acc_spec = pl.BlockSpec((4, F_int, St, 128), lambda t: (0, 0, 0, 0))

    wg, bg = params["wg"].astype(f32), params["bg"].astype(f32)
    wx, bx = params["wx"].astype(f32), params["bx"].astype(f32)
    wp, bp = params["wp"].astype(f32), params["bp"].astype(f32).reshape(1)

    # ----- pass 1: global per-channel statistics of yg, yx -------------------
    acc = pl.pallas_call(
        _make_stats_kernel(N, C, F_int),
        out_shape=jax.ShapeDtypeStruct((4, F_int, St, 128), f32),
        grid=(n_tiles,),
        in_specs=[data_spec, data_spec, smem, smem, smem, smem],
        out_specs=acc_spec,
        compiler_params=pltpu.CompilerParams(
            # Accumulator lives in per-core VMEM -> pixel axis must be sequential.
            dimension_semantics=("arbitrary",)),
    )(g4, x4, wg, bg, wx, bx)

    sums = jnp.sum(acc, axis=(2, 3))                       # (4, F_int), tiny
    mg = sums[0] / count
    vg = sums[1] / count - mg * mg
    mx = sums[2] / count
    vx = sums[3] / count - mx * mx

    # Fold the g/x BatchNorms into the conv scalars (done once, in plain JAX).
    ag = params["gam_g"].astype(f32) * lax.rsqrt(vg + _EPS)
    cg = params["bet_g"].astype(f32) - mg * ag
    ax_ = params["gam_x"].astype(f32) * lax.rsqrt(vx + _EPS)
    cx = params["bet_x"].astype(f32) - mx * ax_
    wg_f, bg_f = wg * ag[None, :], bg * ag + cg
    wx_f, bx_f = wx * ax_[None, :], bx * ax_ + cx

    # ----- pass 2: psi pre-activation yp, stashed to HBM ---------------------
    yp = pl.pallas_call(
        _make_yp_kernel(N, C, F_int),
        out_shape=jax.ShapeDtypeStruct((N, S, 128), f32),
        grid=(n_tiles,),
        in_specs=[data_spec, data_spec, smem, smem, smem, smem, smem, smem],
        out_specs=yp_spec,
        compiler_params=pltpu.CompilerParams(
            dimension_semantics=("parallel",)),            # independent tiles
    )(g4, x4, wg_f, bg_f, wx_f, bx_f, wp, bp)

    # Fold the psi BatchNorm (centered two-pass variance: no cancellation).
    mp = jnp.mean(yp)
    vp = jnp.mean(jnp.square(yp - mp))
    ap_s = params["gam_p"].astype(f32) * lax.rsqrt(vp + _EPS)
    cp_s = params["bet_p"].astype(f32) - mp * ap_s
    ap = ap_s.reshape(1)
    cp = cp_s.reshape(1)

    # ----- pass 3: out = x * sigmoid(ap*yp + cp)  (pure streaming pass) ------
    out4 = pl.pallas_call(
        _out_kernel,
        out_shape=jax.ShapeDtypeStruct((N, C, S, 128), f32),
        grid=(n_tiles,),
        in_specs=[data_spec, yp_spec, smem, smem],
        out_specs=data_spec,
        compiler_params=pltpu.CompilerParams(
            dimension_semantics=("parallel",)),
    )(x4, yp, ap, cp)

    return out4.reshape(N, C, H, W)


# ---------------------------------------------------------------------------
# Pure-JAX reference matching the PyTorch forward (training-mode BN)
# ---------------------------------------------------------------------------
def attention_block_reference(g, x, params):
    N, C, H, W = g.shape
    gp = jnp.transpose(g, (0, 2, 3, 1)).reshape(-1, C)
    xp = jnp.transpose(x, (0, 2, 3, 1)).reshape(-1, C)

    def bn(y, gamma, beta):
        m = jnp.mean(y, axis=0, keepdims=True)
        v = jnp.mean((y - m) ** 2, axis=0, keepdims=True)
        return (y - m) * lax.rsqrt(v + _EPS) * gamma + beta

    g1 = bn(gp @ params["wg"] + params["bg"], params["gam_g"], params["bet_g"])
    x1 = bn(xp @ params["wx"] + params["bx"], params["gam_x"], params["bet_x"])
    s = jnp.maximum(g1 + x1, 0.0)
    yp = s @ params["wp"][:, None] + params["bp"]
    psi = jax.nn.sigmoid(bn(yp, params["gam_p"], params["bet_p"]))
    out = xp * psi
    return jnp.transpose(out.reshape(N, H, W, C), (0, 3, 1, 2))


def init_params(key, F_g, F_int):
    ks = jax.random.split(key, 6)
    # Conv weights stored as (C_in, C_out); biases / BN params as flat vectors.
    return {
        "wg": jax.random.normal(ks[0], (F_g, F_int), jnp.float32) * 0.1,
        "bg": jax.random.normal(ks[1], (F_int,), jnp.float32) * 0.1,
        "gam_g": jnp.full((F_int,), 1.1, jnp.float32),
        "bet_g": jnp.full((F_int,), 0.05, jnp.float32),
        "wx": jax.random.normal(ks[2], (F_g, F_int), jnp.float32) * 0.1,
        "bx": jax.random.normal(ks[3], (F_int,), jnp.float32) * 0.1,
        "gam_x": jnp.full((F_int,), 0.9, jnp.float32),
        "bet_x": jnp.full((F_int,), -0.05, jnp.float32),
        "wp": jax.random.normal(ks[4], (F_int,), jnp.float32) * 0.1,
        "bp": jax.random.normal(ks[5], (), jnp.float32) * 0.1,
        "gam_p": jnp.asarray(1.0, jnp.float32),
        "bet_p": jnp.asarray(0.0, jnp.float32),
    }


if __name__ == "__main__":
    key = jax.random.PRNGKey(0)
    k_g, k_x, k_p = jax.random.split(key, 3)

    # Small shapes consistent with the module spec.
    N, F_g, F_int, H, W = 2, 4, 8, 16, 16
    g = jax.random.normal(k_g, (N, F_g, H, W), jnp.float32)
    x = jax.random.normal(k_x, (N, F_g, H, W), jnp.float32)
    params = init_params(k_p, F_g, F_int)

    out = attention_block(g, x, params)
    jax.block_until_ready(out)
    assert out.shape == (N, F_g, H, W)
    ref = attention_block_reference(g, x, params)
    err = float(jnp.max(jnp.abs(out - ref)))
    assert err < 5e-4, f"max abs error vs reference: {err}"

    # Larger spatial size exercises the multi-tile sublane-dense path
    # (H*W = 4096 -> 32 sublane rows, St=8 -> 4 pixel tiles, multi-step stats).
    H2 = W2 = 64
    g2 = jax.random.normal(jax.random.PRNGKey(1), (N, F_g, H2, W2), jnp.float32)
    x2 = jax.random.normal(jax.random.PRNGKey(2), (N, F_g, H2, W2), jnp.float32)
    out2 = attention_block(g2, x2, params, sublane_tile=8)
    jax.block_until_ready(out2)
    ref2 = attention_block_reference(g2, x2, params)
    err2 = float(jnp.max(jnp.abs(out2 - ref2)))
    assert err2 < 5e-4, f"max abs error vs reference (multi-tile): {err2}"

    print("KERNEL_OK")
</pallas_src>

<mosaic_0001>
module attributes {stable_mosaic.version = 11 : i64} {
  func.func @kernel(%arg0: i32, %arg1: memref<2x4x2x128xf32, #tpu.memory_space<vmem>>, %arg2: memref<2x4x2x128xf32, #tpu.memory_space<vmem>>, %arg3: memref<4x8xf32, #tpu.memory_space<smem>>, %arg4: memref<8xf32, #tpu.memory_space<smem>>, %arg5: memref<4x8xf32, #tpu.memory_space<smem>>, %arg6: memref<8xf32, #tpu.memory_space<smem>>, %arg7: memref<4x8x2x128xf32, #tpu.memory_space<vmem>>) attributes {dimension_semantics = [#tpu.dimension_semantics<arbitrary>], iteration_bounds = array<i64: 1>, scalar_prefetch = 0 : i64, scratch_operands = 0 : i64, tpu.core_type = #tpu.core_type<tc>, window_params = [{transform_indices = @transform_0, window_bounds = array<i64: 2, 4, 2, 128>}, {transform_indices = @transform_1, window_bounds = array<i64: 2, 4, 2, 128>}, {transform_indices = @transform_2, window_bounds = array<i64: 4, 8>}, {transform_indices = @transform_3, window_bounds = array<i64: 8>}, {transform_indices = @transform_4, window_bounds = array<i64: 4, 8>}, {transform_indices = @transform_5, window_bounds = array<i64: 8>}, {pipeline_mode = #tpu.pipeline_mode<synchronous>, transform_indices = @transform_6, window_bounds = array<i64: 4, 8, 2, 128>}]} {
    %c0_i32 = arith.constant 0 : i32
    %0 = arith.cmpi eq, %arg0, %c0_i32 : i32
    %1 = arith.extui %0 : i1 to i32
    %c0_i32_0 = arith.constant 0 : i32
    %2 = arith.cmpi ne, %1, %c0_i32_0 : i32
    scf.if %2 {
      %cst_456 = arith.constant 0.000000e+00 : f32
      %547 = vector.broadcast %cst_456 : f32 to vector<4x8x2x128xf32>
      %c0_457 = arith.constant 0 : index
      %c0_458 = arith.constant 0 : index
      %c0_459 = arith.constant 0 : index
      %c0_460 = arith.constant 0 : index
      %548 = vector.load %arg7[%c0_457, %c0_458, %c0_459, %c0_460] : memref<4x8x2x128xf32, #tpu.memory_space<vmem>>, vector<4x8x2x128xf32>
      tpu.vector_store %arg7[%c0_457, %c0_458, %c0_459, %c0_460], %547 {strides = array<i32>} : memref<4x8x2x128xf32, #tpu.memory_space<vmem>>, vector<4x8x2x128xf32>,
    } else {
    }
    %c0 = arith.constant 0 : index
    %c0_1 = arith.constant 0 : index
    %c0_2 = arith.constant 0 : index
    %c0_3 = arith.constant 0 : index
    %3 = vector.load %arg1[%c0, %c0_1, %c0_2, %c0_3] : memref<2x4x2x128xf32, #tpu.memory_space<vmem>>, vector<2x1x2x128xf32>
    %4 = vector.shape_cast %3 : vector<2x1x2x128xf32> to vector<2x2x128xf32>
    %c0_4 = arith.constant 0 : index
    %c1 = arith.constant 1 : index
    %c0_5 = arith.constant 0 : index
    %c0_6 = arith.constant 0 : index
    %5 = vector.load %arg1[%c0_4, %c1, %c0_5, %c0_6] : memref<2x4x2x128xf32, #tpu.memory_space<vmem>>, vector<2x1x2x128xf32>
    %6 = vector.shape_cast %5 : vector<2x1x2x128xf32> to vector<2x2x128xf32>
    %c0_7 = arith.constant 0 : index
    %c2 = arith.constant 2 : index
    %c0_8 = arith.constant 0 : index
    %c0_9 = arith.constant 0 : index
    %7 = vector.load %arg1[%c0_7, %c2, %c0_8, %c0_9] : memref<2x4x2x128xf32, #tpu.memory_space<vmem>>, vector<2x1x2x128xf32>
    %8 = vector.shape_cast %7 : vector<2x1x2x128xf32> to vector<2x2x128xf32>
    %c0_10 = arith.constant 0 : index
    %c3 = arith.constant 3 : index
    %c0_11 = arith.constant 0 : index
    %c0_12 = arith.constant 0 : index
    %9 = vector.load %arg1[%c0_10, %c3, %c0_11, %c0_12] : memref<2x4x2x128xf32, #tpu.memory_space<vmem>>, vector<2x1x2x128xf32>
    %10 = vector.shape_cast %9 : vector<2x1x2x128xf32> to vector<2x2x128xf32>
    %c0_13 = arith.constant 0 : index
    %c0_14 = arith.constant 0 : index
    %c0_15 = arith.constant 0 : index
    %c0_16 = arith.constant 0 : index
    %11 = vector.load %arg2[%c0_13, %c0_14, %c0_15, %c0_16] : memref<2x4x2x128xf32, #tpu.memory_space<vmem>>, vector<2x1x2x128xf32>
    %12 = vector.shape_cast %11 : vector<2x1x2x128xf32> to vector<2x2x128xf32>
    %c0_17 = arith.constant 0 : index
    %c1_18 = arith.constant 1 : index
    %c0_19 = arith.constant 0 : index
    %c0_20 = arith.constant 0 : index
    %13 = vector.load %arg2[%c0_17, %c1_18, %c0_19, %c0_20] : memref<2x4x2x128xf32, #tpu.memory_space<vmem>>, vector<2x1x2x128xf32>
    %14 = vector.shape_cast %13 : vector<2x1x2x128xf32> to vector<2x2x128xf32>
    %c0_21 = arith.constant 0 : index
    %c2_22 = arith.constant 2 : index
    %c0_23 = arith.constant 0 : index
    %c0_24 = arith.constant 0 : index
    %15 = vector.load %arg2[%c0_21, %c2_22, %c0_23, %c0_24] : memref<2x4x2x128xf32, #tpu.memory_space<vmem>>, vector<2x1x2x128xf32>
    %16 = vector.shape_cast %15 : vector<2x1x2x128xf32> to vector<2x2x128xf32>
    %c0_25 = arith.constant 0 : index
    %c3_26 = arith.constant 3 : index
    %c0_27 = arith.constant 0 : index
    %c0_28 = arith.constant 0 : index
    %17 = vector.load %arg2[%c0_25, %c3_26, %c0_27, %c0_28] : memref<2x4x2x128xf32, #tpu.memory_space<vmem>>, vector<2x1x2x128xf32>
    %18 = vector.shape_cast %17 : vector<2x1x2x128xf32> to vector<2x2x128xf32>
    %c0_29 = arith.constant 0 : index
    %c0_30 = arith.constant 0 : index
    %19 = memref.load %arg3[%c0_29, %c0_30] : memref<4x8xf32, #tpu.memory_space<smem>>
    %20 = vector.broadcast %19 : f32 to vector<2x2x128xf32>
    %21 = arith.mulf %20, %4 : vector<2x2x128xf32>
    %c0_31 = arith.constant 0 : index
    %22 = memref.load %arg4[%c0_31] : memref<8xf32, #tpu.memory_space<smem>>
    %23 = vector.broadcast %22 : f32 to vector<2x2x128xf32>
    %24 = arith.addf %21, %23 : vector<2x2x128xf32>
    %c1_32 = arith.constant 1 : index
    %c0_33 = arith.constant 0 : index
    %25 = memref.load %arg3[%c1_32, %c0_33] : memref<4x8xf32, #tpu.memory_space<smem>>
    %26 = vector.broadcast %25 : f32 to vector<2x2x128xf32>
    %27 = arith.mulf %26, %6 : vector<2x2x128xf32>
    %28 = arith.addf %24, %27 : vector<2x2x128xf32>
    %c2_34 = arith.constant 2 : index
    %c0_35 = arith.constant 0 : index
    %29 = memref.load %arg3[%c2_34, %c0_35] : memref<4x8xf32, #tpu.memory_space<smem>>
    %30 = vector.broadcast %29 : f32 to vector<2x2x128xf32>
    %31 = arith.mulf %30, %8 : vector<2x2x128xf32>
    %32 = arith.addf %28, %31 : vector<2x2x128xf32>
    %c3_36 = arith.constant 3 : index
    %c0_37 = arith.constant 0 : index
    %33 = memref.load %arg3[%c3_36, %c0_37] : memref<4x8xf32, #tpu.memory_space<smem>>
    %34 = vector.broadcast %33 : f32 to vector<2x2x128xf32>
    %35 = arith.mulf %34, %10 : vector<2x2x128xf32>
    %36 = arith.addf %32, %35 : vector<2x2x128xf32>
    %c0_38 = arith.constant 0 : index
    %c0_39 = arith.constant 0 : index
    %37 = memref.load %arg5[%c0_38, %c0_39] : memref<4x8xf32, #tpu.memory_space<smem>>
    %38 = vector.broadcast %37 : f32 to vector<2x2x128xf32>
    %39 = arith.mulf %38, %12 : vector<2x2x128xf32>
    %c0_40 = arith.constant 0 : index
    %40 = memref.load %arg6[%c0_40] : memref<8xf32, #tpu.memory_space<smem>>
    %41 = vector.broadcast %40 : f32 to vector<2x2x128xf32>
    %42 = arith.addf %39, %41 : vector<2x2x128xf32>
    %c1_41 = arith.constant 1 : index
    %c0_42 = arith.constant 0 : index
    %43 = memref.load %arg5[%c1_41, %c0_42] : memref<4x8xf32, #tpu.memory_space<smem>>
    %44 = vector.broadcast %43 : f32 to vector<2x2x128xf32>
    %45 = arith.mulf %44, %14 : vector<2x2x128xf32>
    %46 = arith.addf %42, %45 : vector<2x2x128xf32>
    %c2_43 = arith.constant 2 : index
    %c0_44 = arith.constant 0 : index
    %47 = memref.load %arg5[%c2_43, %c0_44] : memref<4x8xf32, #tpu.memory_space<smem>>
    %48 = vector.broadcast %47 : f32 to vector<2x2x128xf32>
    %49 = arith.mulf %48, %16 : vector<2x2x128xf32>
    %50 = arith.addf %46, %49 : vector<2x2x128xf32>
    %c3_45 = arith.constant 3 : index
    %c0_46 = arith.constant 0 : index
    %51 = memref.load %arg5[%c3_45, %c0_46] : memref<4x8xf32, #tpu.memory_space<smem>>
    %52 = vector.broadcast %51 : f32 to vector<2x2x128xf32>
    %53 = arith.mulf %52, %18 : vector<2x2x128xf32>
    %54 = arith.addf %50, %53 : vector<2x2x128xf32>
    %c0_47 = arith.constant 0 : index
    %c0_48 = arith.constant 0 : index
    %c0_49 = arith.constant 0 : index
    %c0_50 = arith.constant 0 : index
    %55 = vector.load %arg7[%c0_47, %c0_48, %c0_49, %c0_50] : memref<4x8x2x128xf32, #tpu.memory_space<vmem>>, vector<1x1x2x128xf32>
    %56 = vector.shape_cast %55 : vector<1x1x2x128xf32> to vector<2x128xf32>
    %cst = arith.constant dense<0.000000e+00> : vector<2x128xf32>
    %57 = vector.multi_reduction <add>, %36, %cst [0] : vector<2x2x128xf32> to vector<2x128xf32>
    %58 = arith.addf %56, %57 : vector<2x128xf32>
    %c0_51 = arith.constant 0 : index
    %c0_52 = arith.constant 0 : index
    %c0_53 = arith.constant 0 : index
    %c0_54 = arith.constant 0 : index
    %59 = vector.load %arg7[%c0_51, %c0_52, %c0_53, %c0_54] : memref<4x8x2x128xf32, #tpu.memory_space<vmem>>, vector<1x1x2x128xf32>
    %60 = vector.shape_cast %59 : vector<1x1x2x128xf32> to vector<2x128xf32>
    %61 = vector.shape_cast %58 : vector<2x128xf32> to vector<1x1x2x128xf32>
    tpu.vector_store %arg7[%c0_51, %c0_52, %c0_53, %c0_54], %61 {strides = array<i32>} : memref<4x8x2x128xf32, #tpu.memory_space<vmem>>, vector<1x1x2x128xf32>,
    %c1_55 = arith.constant 1 : index
    %c0_56 = arith.constant 0 : index
    %c0_57 = arith.constant 0 : index
    %c0_58 = arith.constant 0 : index
    %62 = vector.load %arg7[%c1_55, %c0_56, %c0_57, %c0_58] : memref<4x8x2x128xf32, #tpu.memory_space<vmem>>, vector<1x1x2x128xf32>
    %63 = vector.shape_cast %62 : vector<1x1x2x128xf32> to vector<2x128xf32>
    %64 = arith.mulf %36, %36 : vector<2x2x128xf32>
    %cst_59 = arith.constant dense<0.000000e+00> : vector<2x128xf32>
    %65 = vector.multi_reduction <add>, %64, %cst_59 [0] : vector<2x2x128xf32> to vector<2x128xf32>
    %66 = arith.addf %63, %65 : vector<2x128xf32>
    %c1_60 = arith.constant 1 : index
    %c0_61 = arith.constant 0 : index
    %c0_62 = arith.constant 0 : index
    %c0_63 = arith.constant 0 : index
    %67 = vector.load %arg7[%c1_60, %c0_61, %c0_62, %c0_63] : memref<4x8x2x128xf32, #tpu.memory_space<vmem>>, vector<1x1x2x128xf32>
    %68 = vector.shape_cast %67 : vector<1x1x2x128xf32> to vector<2x128xf32>
    %69 = vector.shape_cast %66 : vector<2x128xf32> to vector<1x1x2x128xf32>
    tpu.vector_store %arg7[%c1_60, %c0_61, %c0_62, %c0_63], %69 {strides = array<i32>} : memref<4x8x2x128xf32, #tpu.memory_space<vmem>>, vector<1x1x2x128xf32>,
    %c2_64 = arith.constant 2 : index
    %c0_65 = arith.constant 0 : index
    %c0_66 = arith.constant 0 : index
    %c0_67 = arith.constant 0 : index
    %70 = vector.load %arg7[%c2_64, %c0_65, %c0_66, %c0_67] : memref<4x8x2x128xf32, #tpu.memory_space<vmem>>, vector<1x1x2x128xf32>
    %71 = vector.shape_cast %70 : vector<1x1x2x128xf32> to vector<2x128xf32>
    %cst_68 = arith.constant dense<0.000000e+00> : vector<2x128xf32>
    %72 = vector.multi_reduction <add>, %54, %cst_68 [0] : vector<2x2x128xf32> to vector<2x128xf32>
    %73 = arith.addf %71, %72 : vector<2x128xf32>
    %c2_69 = arith.constant 2 : index
    %c0_70 = arith.constant 0 : index
    %c0_71 = arith.constant 0 : index
    %c0_72 = arith.constant 0 : index
    %74 = vector.load %arg7[%c2_69, %c0_70, %c0_71, %c0_72] : memref<4x8x2x128xf32, #tpu.memory_space<vmem>>, vector<1x1x2x128xf32>
    %75 = vector.shape_cast %74 : vector<1x1x2x128xf32> to vector<2x128xf32>
    %76 = vector.shape_cast %73 : vector<2x128xf32> to vector<1x1x2x128xf32>
    tpu.vector_store %arg7[%c2_69, %c0_70, %c0_71, %c0_72], %76 {strides = array<i32>} : memref<4x8x2x128xf32, #tpu.memory_space<vmem>>, vector<1x1x2x128xf32>,
    %c3_73 = arith.constant 3 : index
    %c0_74 = arith.constant 0 : index
    %c0_75 = arith.constant 0 : index
    %c0_76 = arith.constant 0 : index
    %77 = vector.load %arg7[%c3_73, %c0_74, %c0_75, %c0_76] : memref<4x8x2x128xf32, #tpu.memory_space<vmem>>, vector<1x1x2x128xf32>
    %78 = vector.shape_cast %77 : vector<1x1x2x128xf32> to vector<2x128xf32>
    %79 = arith.mulf %54, %54 : vector<2x2x128xf32>
    %cst_77 = arith.constant dense<0.000000e+00> : vector<2x128xf32>
    %80 = vector.multi_reduction <add>, %79, %cst_77 [0] : vector<2x2x128xf32> to vector<2x128xf32>
    %81 = arith.addf %78, %80 : vector<2x128xf32>
    %c3_78 = arith.constant 3 : index
    %c0_79 = arith.constant 0 : index
    %c0_80 = arith.constant 0 : index
    %c0_81 = arith.constant 0 : index
    %82 = vector.load %arg7[%c3_78, %c0_79, %c0_80, %c0_81] : memref<4x8x2x128xf32, #tpu.memory_space<vmem>>, vector<1x1x2x128xf32>
    %83 = vector.shape_cast %82 : vector<1x1x2x128xf32> to vector<2x128xf32>
    %84 = vector.shape_cast %81 : vector<2x128xf32> to vector<1x1x2x128xf32>
    tpu.vector_store %arg7[%c3_78, %c0_79, %c0_80, %c0_81], %84 {strides = array<i32>} : memref<4x8x2x128xf32, #tpu.memory_space<vmem>>, vector<1x1x2x128xf32>,
    %c0_82 = arith.constant 0 : index
    %c1_83 = arith.constant 1 : index
    %85 = memref.load %arg3[%c0_82, %c1_83] : memref<4x8xf32, #tpu.memory_space<smem>>
    %86 = vector.broadcast %85 : f32 to vector<2x2x128xf32>
    %87 = arith.mulf %86, %4 : vector<2x2x128xf32>
    %c1_84 = arith.constant 1 : index
    %88 = memref.load %arg4[%c1_84] : memref<8xf32, #tpu.memory_space<smem>>
    %89 = vector.broadcast %88 : f32 to vector<2x2x128xf32>
    %90 = arith.addf %87, %89 : vector<2x2x128xf32>
    %c1_85 = arith.constant 1 : index
    %c1_86 = arith.constant 1 : index
    %91 = memref.load %arg3[%c1_85, %c1_86] : memref<4x8xf32, #tpu.memory_space<smem>>
    %92 = vector.broadcast %91 : f32 to vector<2x2x128xf32>
    %93 = arith.mulf %92, %6 : vector<2x2x128xf32>
    %94 = arith.addf %90, %93 : vector<2x2x128xf32>
    %c2_87 = arith.constant 2 : index
    %c1_88 = arith.constant 1 : index
    %95 = memref.load %arg3[%c2_87, %c1_88] : memref<4x8xf32, #tpu.memory_space<smem>>
    %96 = vector.broadcast %95 : f32 to vector<2x2x128xf32>
    %97 = arith.mulf %96, %8 : vector<2x2x128xf32>
    %98 = arith.addf %94, %97 : vector<2x2x128xf32>
    %c3_89 = arith.constant 3 : index
    %c1_90 = arith.constant 1 : index
    %99 = memref.load %arg3[%c3_89, %c1_90] : memref<4x8xf32, #tpu.memory_space<smem>>
    %100 = vector.broadcast %99 : f32 to vector<2x2x128xf32>
    %101 = arith.mulf %100, %10 : vector<2x2x128xf32>
    %102 = arith.addf %98, %101 : vector<2x2x128xf32>
    %c0_91 = arith.constant 0 : index
    %c1_92 = arith.constant 1 : index
    %103 = memref.load %arg5[%c0_91, %c1_92] : memref<4x8xf32, #tpu.memory_space<smem>>
    %104 = vector.broadcast %103 : f32 to vector<2x2x128xf32>
    %105 = arith.mulf %104, %12 : vector<2x2x128xf32>
    %c1_93 = arith.constant 1 : index
    %106 = memref.load %arg6[%c1_93] : memref<8xf32, #tpu.memory_space<smem>>
    %107 = vector.broadcast %106 : f32 to vector<2x2x128xf32>
    %108 = arith.addf %105, %107 : vector<2x2x128xf32>
    %c1_94 = arith.constant 1 : index
    %c1_95 = arith.constant 1 : index
    %109 = memref.load %arg5[%c1_94, %c1_95] : memref<4x8xf32, #tpu.memory_space<smem>>
    %110 = vector.broadcast %109 : f32 to vector<2x2x128xf32>
    %111 = arith.mulf %110, %14 : vector<2x2x128xf32>
    %112 = arith.addf %108, %111 : vector<2x2x128xf32>
    %c2_96 = arith.constant 2 : index
    %c1_97 = arith.constant 1 : index
    %113 = memref.load %arg5[%c2_96, %c1_97] : memref<4x8xf32, #tpu.memory_space<smem>>
    %114 = vector.broadcast %113 : f32 to vector<2x2x128xf32>
    %115 = arith.mulf %114, %16 : vector<2x2x128xf32>
    %116 = arith.addf %112, %115 : vector<2x2x128xf32>
    %c3_98 = arith.constant 3 : index
    %c1_99 = arith.constant 1 : index
    %117 = memref.load %arg5[%c3_98, %c1_99] : memref<4x8xf32, #tpu.memory_space<smem>>
    %118 = vector.broadcast %117 : f32 to vector<2x2x128xf32>
    %119 = arith.mulf %118, %18 : vector<2x2x128xf32>
    %120 = arith.addf %116, %119 : vector<2x2x128xf32>
    %c0_100 = arith.constant 0 : index
    %c1_101 = arith.constant 1 : index
    %c0_102 = arith.constant 0 : index
    %c0_103 = arith.constant 0 : index
    %121 = vector.load %arg7[%c0_100, %c1_101, %c0_102, %c0_103] : memref<4x8x2x128xf32, #tpu.memory_space<vmem>>, vector<1x1x2x128xf32>
    %122 = vector.shape_cast %121 : vector<1x1x2x128xf32> to vector<2x128xf32>
    %cst_104 = arith.constant dense<0.000000e+00> : vector<2x128xf32>
    %123 = vector.multi_reduction <add>, %102, %cst_104 [0] : vector<2x2x128xf32> to vector<2x128xf32>
    %124 = arith.addf %122, %123 : vector<2x128xf32>
    %c0_105 = arith.constant 0 : index
    %c1_106 = arith.constant 1 : index
    %c0_107 = arith.constant 0 : index
    %c0_108 = arith.constant 0 : index
    %125 = vector.load %arg7[%c0_105, %c1_106, %c0_107, %c0_108] : memref<4x8x2x128xf32, #tpu.memory_space<vmem>>, vector<1x1x2x128xf32>
    %126 = vector.shape_cast %125 : vector<1x1x2x128xf32> to vector<2x128xf32>
    %127 = vector.shape_cast %124 : vector<2x128xf32> to vector<1x1x2x128xf32>
    tpu.vector_store %arg7[%c0_105, %c1_106, %c0_107, %c0_108], %127 {strides = array<i32>} : memref<4x8x2x128xf32, #tpu.memory_space<vmem>>, vector<1x1x2x128xf32>,
    %c1_109 = arith.constant 1 : index
    %c1_110 = arith.constant 1 : index
    %c0_111 = arith.constant 0 : index
    %c0_112 = arith.constant 0 : index
    %128 = vector.load %arg7[%c1_109, %c1_110, %c0_111, %c0_112] : memref<4x8x2x128xf32, #tpu.memory_space<vmem>>, vector<1x1x2x128xf32>
    %129 = vector.shape_cast %128 : vector<1x1x2x128xf32> to vector<2x128xf32>
    %130 = arith.mulf %102, %102 : vector<2x2x128xf32>
    %cst_113 = arith.constant dense<0.000000e+00> : vector<2x128xf32>
    %131 = vector.multi_reduction <add>, %130, %cst_113 [0] : vector<2x2x128xf32> to vector<2x128xf32>
    %132 = arith.addf %129, %131 : vector<2x128xf32>
    %c1_114 = arith.constant 1 : index
    %c1_115 = arith.constant 1 : index
    %c0_116 = arith.constant 0 : index
    %c0_117 = arith.constant 0 : index
    %133 = vector.load %arg7[%c1_114, %c1_115, %c0_116, %c0_117] : memref<4x8x2x128xf32, #tpu.memory_space<vmem>>, vector<1x1x2x128xf32>
    %134 = vector.shape_cast %133 : vector<1x1x2x128xf32> to vector<2x128xf32>
    %135 = vector.shape_cast %132 : vector<2x128xf32> to vector<1x1x2x128xf32>
    tpu.vector_store %arg7[%c1_114, %c1_115, %c0_116, %c0_117], %135 {strides = array<i32>} : memref<4x8x2x128xf32, #tpu.memory_space<vmem>>, vector<1x1x2x128xf32>,
    %c2_118 = arith.constant 2 : index
    %c1_119 = arith.constant 1 : index
    %c0_120 = arith.constant 0 : index
    %c0_121 = arith.constant 0 : index
    %136 = vector.load %arg7[%c2_118, %c1_119, %c0_120, %c0_121] : memref<4x8x2x128xf32, #tpu.memory_space<vmem>>, vector<1x1x2x128xf32>
    %137 = vector.shape_cast %136 : vector<1x1x2x128xf32> to vector<2x128xf32>
    %cst_122 = arith.constant dense<0.000000e+00> : vector<2x128xf32>
    %138 = vector.multi_reduction <add>, %120, %cst_122 [0] : vector<2x2x128xf32> to vector<2x128xf32>
    %139 = arith.addf %137, %138 : vector<2x128xf32>
    %c2_123 = arith.constant 2 : index
    %c1_124 = arith.constant 1 : index
    %c0_125 = arith.constant 0 : index
    %c0_126 = arith.constant 0 : index
    %140 = vector.load %arg7[%c2_123, %c1_124, %c0_125, %c0_126] : memref<4x8x2x128xf32, #tpu.memory_space<vmem>>, vector<1x1x2x128xf32>
    %141 = vector.shape_cast %140 : vector<1x1x2x128xf32> to vector<2x128xf32>
    %142 = vector.shape_cast %139 : vector<2x128xf32> to vector<1x1x2x128xf32>
    tpu.vector_store %arg7[%c2_123, %c1_124, %c0_125, %c0_126], %142 {strides = array<i32>} : memref<4x8x2x128xf32, #tpu.memory_space<vmem>>, vector<1x1x2x128xf32>,
    %c3_127 = arith.constant 3 : index
    %c1_128 = arith.constant 1 : index
    %c0_129 = arith.constant 0 : index
    %c0_130 = arith.constant 0 : index
    %143 = vector.load %arg7[%c3_127, %c1_128, %c0_129, %c0_130] : memref<4x8x2x128xf32, #tpu.memory_space<vmem>>, vector<1x1x2x128xf32>
    %144 = vector.shape_cast %143 : vector<1x1x2x128xf32> to vector<2x128xf32>
    %145 = arith.mulf %120, %120 : vector<2x2x128xf32>
    %cst_131 = arith.constant dense<0.000000e+00> : vector<2x128xf32>
    %146 = vector.multi_reduction <add>, %145, %cst_131 [0] : vector<2x2x128xf32> to vector<2x128xf32>
    %147 = arith.addf %144, %146 : vector<2x128xf32>
    %c3_132 = arith.constant 3 : index
    %c1_133 = arith.constant 1 : index
    %c0_134 = arith.constant 0 : index
    %c0_135 = arith.constant 0 : index
    %148 = vector.load %arg7[%c3_132, %c1_133, %c0_134, %c0_135] : memref<4x8x2x128xf32, #tpu.memory_space<vmem>>, vector<1x1x2x128xf32>
    %149 = vector.shape_cast %148 : vector<1x1x2x128xf32> to vector<2x128xf32>
    %150 = vector.shape_cast %147 : vector<2x128xf32> to vector<1x1x2x128xf32>
    tpu.vector_store %arg7[%c3_132, %c1_133, %c0_134, %c0_135], %150 {strides = array<i32>} : memref<4x8x2x128xf32, #tpu.memory_space<vmem>>, vector<1x1x2x128xf32>,
    %c0_136 = arith.constant 0 : index
    %c2_137 = arith.constant 2 : index
    %151 = memref.load %arg3[%c0_136, %c2_137] : memref<4x8xf32, #tpu.memory_space<smem>>
    %152 = vector.broadcast %151 : f32 to vector<2x2x128xf32>
    %153 = arith.mulf %152, %4 : vector<2x2x128xf32>
    %c2_138 = arith.constant 2 : index
    %154 = memref.load %arg4[%c2_138] : memref<8xf32, #tpu.memory_space<smem>>
    %155 = vector.broadcast %154 : f32 to vector<2x2x128xf32>
    %156 = arith.addf %153, %155 : vector<2x2x128xf32>
    %c1_139 = arith.constant 1 : index
    %c2_140 = arith.constant 2 : index
    %157 = memref.load %arg3[%c1_139, %c2_140] : memref<4x8xf32, #tpu.memory_space<smem>>
    %158 = vector.broadcast %157 : f32 to vector<2x2x128xf32>
    %159 = arith.mulf %158, %6 : vector<2x2x128xf32>
    %160 = arith.addf %156, %159 : vector<2x2x128xf32>
    %c2_141 = arith.constant 2 : index
    %c2_142 = arith.constant 2 : index
    %161 = memref.load %arg3[%c2_141, %c2_142] : memref<4x8xf32, #tpu.memory_space<smem>>
    %162 = vector.broadcast %161 : f32 to vector<2x2x128xf32>
    %163 = arith.mulf %162, %8 : vector<2x2x128xf32>
    %164 = arith.addf %160, %163 : vector<2x2x128xf32>
    %c3_143 = arith.constant 3 : index
    %c2_144 = arith.constant 2 : index
    %165 = memref.load %arg3[%c3_143, %c2_144] : memref<4x8xf32, #tpu.memory_space<smem>>
    %166 = vector.broadcast %165 : f32 to vector<2x2x128xf32>
    %167 = arith.mulf %166, %10 : vector<2x2x128xf32>
    %168 = arith.addf %164, %167 : vector<2x2x128xf32>
    %c0_145 = arith.constant 0 : index
    %c2_146 = arith.constant 2 : index
    %169 = memref.load %arg5[%c0_145, %c2_146] : memref<4x8xf32, #tpu.memory_space<smem>>
    %170 = vector.broadcast %169 : f32 to vector<2x2x128xf32>
    %171 = arith.mulf %170, %12 : vector<2x2x128xf32>
    %c2_147 = arith.constant 2 : index
    %172 = memref.load %arg6[%c2_147] : memref<8xf32, #tpu.memory_space<smem>>
    %173 = vector.broadcast %172 : f32 to vector<2x2x128xf32>
    %174 = arith.addf %171, %173 : vector<2x2x128xf32>
    %c1_148 = arith.constant 1 : index
    %c2_149 = arith.constant 2 : index
    %175 = memref.load %arg5[%c1_148, %c2_149] : memref<4x8xf32, #tpu.memory_space<smem>>
    %176 = vector.broadcast %175 : f32 to vector<2x2x128xf32>
    %177 = arith.mulf %176, %14 : vector<2x2x128xf32>
    %178 = arith.addf %174, %177 : vector<2x2x128xf32>
    %c2_150 = arith.constant 2 : index
    %c2_151 = arith.constant 2 : index
    %179 = memref.load %arg5[%c2_150, %c2_151] : memref<4x8xf32, #tpu.memory_space<smem>>
    %180 = vector.broadcast %179 : f32 to vector<2x2x128xf32>
    %181 = arith.mulf %180, %16 : vector<2x2x128xf32>
    %182 = arith.addf %178, %181 : vector<2x2x128xf32>
    %c3_152 = arith.constant 3 : index
    %c2_153 = arith.constant 2 : index
    %183 = memref.load %arg5[%c3_152, %c2_153] : memref<4x8xf32, #tpu.memory_space<smem>>
    %184 = vector.broadcast %183 : f32 to vector<2x2x128xf32>
    %185 = arith.mulf %184, %18 : vector<2x2x128xf32>
    %186 = arith.addf %182, %185 : vector<2x2x128xf32>
    %c0_154 = arith.constant 0 : index
    %c2_155 = arith.constant 2 : index
    %c0_156 = arith.constant 0 : index
    %c0_157 = arith.constant 0 : index
    %187 = vector.load %arg7[%c0_154, %c2_155, %c0_156, %c0_157] : memref<4x8x2x128xf32, #tpu.memory_space<vmem>>, vector<1x1x2x128xf32>
    %188 = vector.shape_cast %187 : vector<1x1x2x128xf32> to vector<2x128xf32>
    %cst_158 = arith.constant dense<0.000000e+00> : vector<2x128xf32>
    %189 = vector.multi_reduction <add>, %168, %cst_158 [0] : vector<2x2x128xf32> to vector<2x128xf32>
    %190 = arith.addf %188, %189 : vector<2x128xf32>
    %c0_159 = arith.constant 0 : index
    %c2_160 = arith.constant 2 : index
    %c0_161 = arith.constant 0 : index
    %c0_162 = arith.constant 0 : index
    %191 = vector.load %arg7[%c0_159, %c2_160, %c0_161, %c0_162] : memref<4x8x2x128xf32, #tpu.memory_space<vmem>>, vector<1x1x2x128xf32>
    %192 = vector.shape_cast %191 : vector<1x1x2x128xf32> to vector<2x128xf32>
    %193 = vector.shape_cast %190 : vector<2x128xf32> to vector<1x1x2x128xf32>
    tpu.vector_store %arg7[%c0_159, %c2_160, %c0_161, %c0_162], %193 {strides = array<i32>} : memref<4x8x2x128xf32, #tpu.memory_space<vmem>>, vector<1x1x2x128xf32>,
    %c1_163 = arith.constant 1 : index
    %c2_164 = arith.constant 2 : index
    %c0_165 = arith.constant 0 : index
    %c0_166 = arith.constant 0 : index
    %194 = vector.load %arg7[%c1_163, %c2_164, %c0_165, %c0_166] : memref<4x8x2x128xf32, #tpu.memory_space<vmem>>, vector<1x1x2x128xf32>
    %195 = vector.shape_cast %194 : vector<1x1x2x128xf32> to vector<2x128xf32>
    %196 = arith.mulf %168, %168 : vector<2x2x128xf32>
    %cst_167 = arith.constant dense<0.000000e+00> : vector<2x128xf32>
    %197 = vector.multi_reduction <add>, %196, %cst_167 [0] : vector<2x2x128xf32> to vector<2x128xf32>
    %198 = arith.addf %195, %197 : vector<2x128xf32>
    %c1_168 = arith.constant 1 : index
    %c2_169 = arith.constant 2 : index
    %c0_170 = arith.constant 0 : index
    %c0_171 = arith.constant 0 : index
    %199 = vector.load %arg7[%c1_168, %c2_169, %c0_170, %c0_171] : memref<4x8x2x128xf32, #tpu.memory_space<vmem>>, vector<1x1x2x128xf32>
    %200 = vector.shape_cast %199 : vector<1x1x2x128xf32> to vector<2x128xf32>
    %201 = vector.shape_cast %198 : vector<2x128xf32> to vector<1x1x2x128xf32>
    tpu.vector_store %arg7[%c1_168, %c2_169, %c0_170, %c0_171], %201 {strides = array<i32>} : memref<4x8x2x128xf32, #tpu.memory_space<vmem>>, vector<1x1x2x128xf32>,
    %c2_172 = arith.constant 2 : index
    %c2_173 = arith.constant 2 : index
    %c0_174 = arith.constant 0 : index
    %c0_175 = arith.constant 0 : index
    %202 = vector.load %arg7[%c2_172, %c2_173, %c0_174, %c0_175] : memref<4x8x2x128xf32, #tpu.memory_space<vmem>>, vector<1x1x2x128xf32>
    %203 = vector.shape_cast %202 : vector<1x1x2x128xf32> to vector<2x128xf32>
    %cst_176 = arith.constant dense<0.000000e+00> : vector<2x128xf32>
    %204 = vector.multi_reduction <add>, %186, %cst_176 [0] : vector<2x2x128xf32> to vector<2x128xf32>
    %205 = arith.addf %203, %204 : vector<2x128xf32>
    %c2_177 = arith.constant 2 : index
    %c2_178 = arith.constant 2 : index
    %c0_179 = arith.constant 0 : index
    %c0_180 = arith.constant 0 : index
    %206 = vector.load %arg7[%c2_177, %c2_178, %c0_179, %c0_180] : memref<4x8x2x128xf32, #tpu.memory_space<vmem>>, vector<1x1x2x128xf32>
    %207 = vector.shape_cast %206 : vector<1x1x2x128xf32> to vector<2x128xf32>
    %208 = vector.shape_cast %205 : vector<2x128xf32> to vector<1x1x2x128xf32>
    tpu.vector_store %arg7[%c2_177, %c2_178, %c0_179, %c0_180], %208 {strides = array<i32>} : memref<4x8x2x128xf32, #tpu.memory_space<vmem>>, vector<1x1x2x128xf32>,
    %c3_181 = arith.constant 3 : index
    %c2_182 = arith.constant 2 : index
    %c0_183 = arith.constant 0 : index
    %c0_184 = arith.constant 0 : index
    %209 = vector.load %arg7[%c3_181, %c2_182, %c0_183, %c0_184] : memref<4x8x2x128xf32, #tpu.memory_space<vmem>>, vector<1x1x2x128xf32>
    %210 = vector.shape_cast %209 : vector<1x1x2x128xf32> to vector<2x128xf32>
    %211 = arith.mulf %186, %186 : vector<2x2x128xf32>
    %cst_185 = arith.constant dense<0.000000e+00> : vector<2x128xf32>
    %212 = vector.multi_reduction <add>, %211, %cst_185 [0] : vector<2x2x128xf32> to vector<2x128xf32>
    %213 = arith.addf %210, %212 : vector<2x128xf32>
    %c3_186 = arith.constant 3 : index
    %c2_187 = arith.constant 2 : index
    %c0_188 = arith.constant 0 : index
    %c0_189 = arith.constant 0 : index
    %214 = vector.load %arg7[%c3_186, %c2_187, %c0_188, %c0_189] : memref<4x8x2x128xf32, #tpu.memory_space<vmem>>, vector<1x1x2x128xf32>
    %215 = vector.shape_cast %214 : vector<1x1x2x128xf32> to vector<2x128xf32>
    %216 = vector.shape_cast %213 : vector<2x128xf32> to vector<1x1x2x128xf32>
    tpu.vector_store %arg7[%c3_186, %c2_187, %c0_188, %c0_189], %216 {strides = array<i32>} : memref<4x8x2x128xf32, #tpu.memory_space<vmem>>, vector<1x1x2x128xf32>,
    %c0_190 = arith.constant 0 : index
    %c3_191 = arith.constant 3 : index
    %217 = memref.load %arg3[%c0_190, %c3_191] : memref<4x8xf32, #tpu.memory_space<smem>>
    %218 = vector.broadcast %217 : f32 to vector<2x2x128xf32>
    %219 = arith.mulf %218, %4 : vector<2x2x128xf32>
    %c3_192 = arith.constant 3 : index
    %220 = memref.load %arg4[%c3_192] : memref<8xf32, #tpu.memory_space<smem>>
    %221 = vector.broadcast %220 : f32 to vector<2x2x128xf32>
    %222 = arith.addf %219, %221 : vector<2x2x128xf32>
    %c1_193 = arith.constant 1 : index
    %c3_194 = arith.constant 3 : index
    %223 = memref.load %arg3[%c1_193, %c3_194] : memref<4x8xf32, #tpu.memory_space<smem>>
    %224 = vector.broadcast %223 : f32 to vector<2x2x128xf32>
    %225 = arith.mulf %224, %6 : vector<2x2x128xf32>
    %226 = arith.addf %222, %225 : vector<2x2x128xf32>
    %c2_195 = arith.constant 2 : index
    %c3_196 = arith.constant 3 : index
    %227 = memref.load %arg3[%c2_195, %c3_196] : memref<4x8xf32, #tpu.memory_space<smem>>
    %228 = vector.broadcast %227 : f32 to vector<2x2x128xf32>
    %229 = arith.mulf %228, %8 : vector<2x2x128xf32>
    %230 = arith.addf %226, %229 : vector<2x2x128xf32>
    %c3_197 = arith.constant 3 : index
    %c3_198 = arith.constant 3 : index
    %231 = memref.load %arg3[%c3_197, %c3_198] : memref<4x8xf32, #tpu.memory_space<smem>>
    %232 = vector.broadcast %231 : f32 to vector<2x2x128xf32>
    %233 = arith.mulf %232, %10 : vector<2x2x128xf32>
    %234 = arith.addf %230, %233 : vector<2x2x128xf32>
    %c0_199 = arith.constant 0 : index
    %c3_200 = arith.constant 3 : index
    %235 = memref.load %arg5[%c0_199, %c3_200] : memref<4x8xf32, #tpu.memory_space<smem>>
    %236 = vector.broadcast %235 : f32 to vector<2x2x128xf32>
    %237 = arith.mulf %236, %12 : vector<2x2x128xf32>
    %c3_201 = arith.constant 3 : index
    %238 = memref.load %arg6[%c3_201] : memref<8xf32, #tpu.memory_space<smem>>
    %239 = vector.broadcast %238 : f32 to vector<2x2x128xf32>
    %240 = arith.addf %237, %239 : vector<2x2x128xf32>
    %c1_202 = arith.constant 1 : index
    %c3_203 = arith.constant 3 : index
    %241 = memref.load %arg5[%c1_202, %c3_203] : memref<4x8xf32, #tpu.memory_space<smem>>
    %242 = vector.broadcast %241 : f32 to vector<2x2x128xf32>
    %243 = arith.mulf %242, %14 : vector<2x2x128xf32>
    %244 = arith.addf %240, %243 : vector<2x2x128xf32>
    %c2_204 = arith.constant 2 : index
    %c3_205 = arith.constant 3 : index
    %245 = memref.load %arg5[%c2_204, %c3_205] : memref<4x8xf32, #tpu.memory_space<smem>>
    %246 = vector.broadcast %245 : f32 to vector<2x2x128xf32>
    %247 = arith.mulf %246, %16 : vector<2x2x128xf32>
    %248 = arith.addf %244, %247 : vector<2x2x128xf32>
    %c3_206 = arith.constant 3 : index
    %c3_207 = arith.constant 3 : index
    %249 = memref.load %arg5[%c3_206, %c3_207] : memref<4x8xf32, #tpu.memory_space<smem>>
    %250 = vector.broadcast %249 : f32 to vector<2x2x128xf32>
    %251 = arith.mulf %250, %18 : vector<2x2x128xf32>
    %252 = arith.addf %248, %251 : vector<2x2x128xf32>
    %c0_208 = arith.constant 0 : index
    %c3_209 = arith.constant 3 : index
    %c0_210 = arith.constant 0 : index
    %c0_211 = arith.constant 0 : index
    %253 = vector.load %arg7[%c0_208, %c3_209, %c0_210, %c0_211] : memref<4x8x2x128xf32, #tpu.memory_space<vmem>>, vector<1x1x2x128xf32>
    %254 = vector.shape_cast %253 : vector<1x1x2x128xf32> to vector<2x128xf32>
    %cst_212 = arith.constant dense<0.000000e+00> : vector<2x128xf32>
    %255 = vector.multi_reduction <add>, %234, %cst_212 [0] : vector<2x2x128xf32> to vector<2x128xf32>
    %256 = arith.addf %254, %255 : vector<2x128xf32>
    %c0_213 = arith.constant 0 : index
    %c3_214 = arith.constant 3 : index
    %c0_215 = arith.constant 0 : index
    %c0_216 = arith.constant 0 : index
    %257 = vector.load %arg7[%c0_213, %c3_214, %c0_215, %c0_216] : memref<4x8x2x128xf32, #tpu.memory_space<vmem>>, vector<1x1x2x128xf32>
    %258 = vector.shape_cast %257 : vector<1x1x2x128xf32> to vector<2x128xf32>
    %259 = vector.shape_cast %256 : vector<2x128xf32> to vector<1x1x2x128xf32>
    tpu.vector_store %arg7[%c0_213, %c3_214, %c0_215, %c0_216], %259 {strides = array<i32>} : memref<4x8x2x128xf32, #tpu.memory_space<vmem>>, vector<1x1x2x128xf32>,
    %c1_217 = arith.constant 1 : index
    %c3_218 = arith.constant 3 : index
    %c0_219 = arith.constant 0 : index
    %c0_220 = arith.constant 0 : index
    %260 = vector.load %arg7[%c1_217, %c3_218, %c0_219, %c0_220] : memref<4x8x2x128xf32, #tpu.memory_space<vmem>>, vector<1x1x2x128xf32>
    %261 = vector.shape_cast %260 : vector<1x1x2x128xf32> to vector<2x128xf32>
    %262 = arith.mulf %234, %234 : vector<2x2x128xf32>
    %cst_221 = arith.constant dense<0.000000e+00> : vector<2x128xf32>
    %263 = vector.multi_reduction <add>, %262, %cst_221 [0] : vector<2x2x128xf32> to vector<2x128xf32>
    %264 = arith.addf %261, %263 : vector<2x128xf32>
    %c1_222 = arith.constant 1 : index
    %c3_223 = arith.constant 3 : index
    %c0_224 = arith.constant 0 : index
    %c0_225 = arith.constant 0 : index
    %265 = vector.load %arg7[%c1_222, %c3_223, %c0_224, %c0_225] : memref<4x8x2x128xf32, #tpu.memory_space<vmem>>, vector<1x1x2x128xf32>
    %266 = vector.shape_cast %265 : vector<1x1x2x128xf32> to vector<2x128xf32>
    %267 = vector.shape_cast %264 : vector<2x128xf32> to vector<1x1x2x128xf32>
    tpu.vector_store %arg7[%c1_222, %c3_223, %c0_224, %c0_225], %267 {strides = array<i32>} : memref<4x8x2x128xf32, #tpu.memory_space<vmem>>, vector<1x1x2x128xf32>,
    %c2_226 = arith.constant 2 : index
    %c3_227 = arith.constant 3 : index
    %c0_228 = arith.constant 0 : index
    %c0_229 = arith.constant 0 : index
    %268 = vector.load %arg7[%c2_226, %c3_227, %c0_228, %c0_229] : memref<4x8x2x128xf32, #tpu.memory_space<vmem>>, vector<1x1x2x128xf32>
    %269 = vector.shape_cast %268 : vector<1x1x2x128xf32> to vector<2x128xf32>
    %cst_230 = arith.constant dense<0.000000e+00> : vector<2x128xf32>
    %270 = vector.multi_reduction <add>, %252, %cst_230 [0] : vector<2x2x128xf32> to vector<2x128xf32>
    %271 = arith.addf %269, %270 : vector<2x128xf32>
    %c2_231 = arith.constant 2 : index
    %c3_232 = arith.constant 3 : index
    %c0_233 = arith.constant 0 : index
    %c0_234 = arith.constant 0 : index
    %272 = vector.load %arg7[%c2_231, %c3_232, %c0_233, %c0_234] : memref<4x8x2x128xf32, #tpu.memory_space<vmem>>, vector<1x1x2x128xf32>
    %273 = vector.shape_cast %272 : vector<1x1x2x128xf32> to vector<2x128xf32>
    %274 = vector.shape_cast %271 : vector<2x128xf32> to vector<1x1x2x128xf32>
    tpu.vector_store %arg7[%c2_231, %c3_232, %c0_233, %c0_234], %274 {strides = array<i32>} : memref<4x8x2x128xf32, #tpu.memory_space<vmem>>, vector<1x1x2x128xf32>,
    %c3_235 = arith.constant 3 : index
    %c3_236 = arith.constant 3 : index
    %c0_237 = arith.constant 0 : index
    %c0_238 = arith.constant 0 : index
    %275 = vector.load %arg7[%c3_235, %c3_236, %c0_237, %c0_238] : memref<4x8x2x128xf32, #tpu.memory_space<vmem>>, vector<1x1x2x128xf32>
    %276 = vector.shape_cast %275 : vector<1x1x2x128xf32> to vector<2x128xf32>
    %277 = arith.mulf %252, %252 : vector<2x2x128xf32>
    %cst_239 = arith.constant dense<0.000000e+00> : vector<2x128xf32>
    %278 = vector.multi_reduction <add>, %277, %cst_239 [0] : vector<2x2x128xf32> to vector<2x128xf32>
    %279 = arith.addf %276, %278 : vector<2x128xf32>
    %c3_240 = arith.constant 3 : index
    %c3_241 = arith.constant 3 : index
    %c0_242 = arith.constant 0 : index
    %c0_243 = arith.constant 0 : index
    %280 = vector.load %arg7[%c3_240, %c3_241, %c0_242, %c0_243] : memref<4x8x2x128xf32, #tpu.memory_space<vmem>>, vector<1x1x2x128xf32>
    %281 = vector.shape_cast %280 : vector<1x1x2x128xf32> to vector<2x128xf32>
    %282 = vector.shape_cast %279 : vector<2x128xf32> to vector<1x1x2x128xf32>
    tpu.vector_store %arg7[%c3_240, %c3_241, %c0_242, %c0_243], %282 {strides = array<i32>} : memref<4x8x2x128xf32, #tpu.memory_space<vmem>>, vector<1x1x2x128xf32>,
    %c0_244 = arith.constant 0 : index
    %c4 = arith.constant 4 : index
    %283 = memref.load %arg3[%c0_244, %c4] : memref<4x8xf32, #tpu.memory_space<smem>>
    %284 = vector.broadcast %283 : f32 to vector<2x2x128xf32>
    %285 = arith.mulf %284, %4 : vector<2x2x128xf32>
    %c4_245 = arith.constant 4 : index
    %286 = memref.load %arg4[%c4_245] : memref<8xf32, #tpu.memory_space<smem>>
    %287 = vector.broadcast %286 : f32 to vector<2x2x128xf32>
    %288 = arith.addf %285, %287 : vector<2x2x128xf32>
    %c1_246 = arith.constant 1 : index
    %c4_247 = arith.constant 4 : index
    %289 = memref.load %arg3[%c1_246, %c4_247] : memref<4x8xf32, #tpu.memory_space<smem>>
    %290 = vector.broadcast %289 : f32 to vector<2x2x128xf32>
    %291 = arith.mulf %290, %6 : vector<2x2x128xf32>
    %292 = arith.addf %288, %291 : vector<2x2x128xf32>
    %c2_248 = arith.constant 2 : index
    %c4_249 = arith.constant 4 : index
    %293 = memref.load %arg3[%c2_248, %c4_249] : memref<4x8xf32, #tpu.memory_space<smem>>
    %294 = vector.broadcast %293 : f32 to vector<2x2x128xf32>
    %295 = arith.mulf %294, %8 : vector<2x2x128xf32>
    %296 = arith.addf %292, %295 : vector<2x2x128xf32>
    %c3_250 = arith.constant 3 : index
    %c4_251 = arith.constant 4 : index
    %297 = memref.load %arg3[%c3_250, %c4_251] : memref<4x8xf32, #tpu.memory_space<smem>>
    %298 = vector.broadcast %297 : f32 to vector<2x2x128xf32>
    %299 = arith.mulf %298, %10 : vector<2x2x128xf32>
    %300 = arith.addf %296, %299 : vector<2x2x128xf32>
    %c0_252 = arith.constant 0 : index
    %c4_253 = arith.constant 4 : index
    %301 = memref.load %arg5[%c0_252, %c4_253] : memref<4x8xf32, #tpu.memory_space<smem>>
    %302 = vector.broadcast %301 : f32 to vector<2x2x128xf32>
    %303 = arith.mulf %302, %12 : vector<2x2x128xf32>
    %c4_254 = arith.constant 4 : index
    %304 = memref.load %arg6[%c4_254] : memref<8xf32, #tpu.memory_space<smem>>
    %305 = vector.broadcast %304 : f32 to vector<2x2x128xf32>
    %306 = arith.addf %303, %305 : vector<2x2x128xf32>
    %c1_255 = arith.constant 1 : index
    %c4_256 = arith.constant 4 : index
    %307 = memref.load %arg5[%c1_255, %c4_256] : memref<4x8xf32, #tpu.memory_space<smem>>
    %308 = vector.broadcast %307 : f32 to vector<2x2x128xf32>
    %309 = arith.mulf %308, %14 : vector<2x2x128xf32>
    %310 = arith.addf %306, %309 : vector<2x2x128xf32>
    %c2_257 = arith.constant 2 : index
    %c4_258 = arith.constant 4 : index
    %311 = memref.load %arg5[%c2_257, %c4_258] : memref<4x8xf32, #tpu.memory_space<smem>>
    %312 = vector.broadcast %311 : f32 to vector<2x2x128xf32>
    %313 = arith.mulf %312, %16 : vector<2x2x128xf32>
    %314 = arith.addf %310, %313 : vector<2x2x128xf32>
    %c3_259 = arith.constant 3 : index
    %c4_260 = arith.constant 4 : index
    %315 = memref.load %arg5[%c3_259, %c4_260] : memref<4x8xf32, #tpu.memory_space<smem>>
    %316 = vector.broadcast %315 : f32 to vector<2x2x128xf32>
    %317 = arith.mulf %316, %18 : vector<2x2x128xf32>
    %318 = arith.addf %314, %317 : vector<2x2x128xf32>
    %c0_261 = arith.constant 0 : index
    %c4_262 = arith.constant 4 : index
    %c0_263 = arith.constant 0 : index
    %c0_264 = arith.constant 0 : index
    %319 = vector.load %arg7[%c0_261, %c4_262, %c0_263, %c0_264] : memref<4x8x2x128xf32, #tpu.memory_space<vmem>>, vector<1x1x2x128xf32>
    %320 = vector.shape_cast %319 : vector<1x1x2x128xf32> to vector<2x128xf32>
    %cst_265 = arith.constant dense<0.000000e+00> : vector<2x128xf32>
    %321 = vector.multi_reduction <add>, %300, %cst_265 [0] : vector<2x2x128xf32> to vector<2x128xf32>
    %322 = arith.addf %320, %321 : vector<2x128xf32>
    %c0_266 = arith.constant 0 : index
    %c4_267 = arith.constant 4 : index
    %c0_268 = arith.constant 0 : index
    %c0_269 = arith.constant 0 : index
    %323 = vector.load %arg7[%c0_266, %c4_267, %c0_268, %c0_269] : memref<4x8x2x128xf32, #tpu.memory_space<vmem>>, vector<1x1x2x128xf32>
    %324 = vector.shape_cast %323 : vector<1x1x2x128xf32> to vector<2x128xf32>
    %325 = vector.shape_cast %322 : vector<2x128xf32> to vector<1x1x2x128xf32>
    tpu.vector_store %arg7[%c0_266, %c4_267, %c0_268, %c0_269], %325 {strides = array<i32>} : memref<4x8x2x128xf32, #tpu.memory_space<vmem>>, vector<1x1x2x128xf32>,
    %c1_270 = arith.constant 1 : index
    %c4_271 = arith.constant 4 : index
    %c0_272 = arith.constant 0 : index
    %c0_273 = arith.constant 0 : index
    %326 = vector.load %arg7[%c1_270, %c4_271, %c0_272, %c0_273] : memref<4x8x2x128xf32, #tpu.memory_space<vmem>>, vector<1x1x2x128xf32>
    %327 = vector.shape_cast %326 : vector<1x1x2x128xf32> to vector<2x128xf32>
    %328 = arith.mulf %300, %300 : vector<2x2x128xf32>
    %cst_274 = arith.constant dense<0.000000e+00> : vector<2x128xf32>
    %329 = vector.multi_reduction <add>, %328, %cst_274 [0] : vector<2x2x128xf32> to vector<2x128xf32>
    %330 = arith.addf %327, %329 : vector<2x128xf32>
    %c1_275 = arith.constant 1 : index
    %c4_276 = arith.constant 4 : index
    %c0_277 = arith.constant 0 : index
    %c0_278 = arith.constant 0 : index
    %331 = vector.load %arg7[%c1_275, %c4_276, %c0_277, %c0_278] : memref<4x8x2x128xf32, #tpu.memory_space<vmem>>, vector<1x1x2x128xf32>
    %332 = vector.shape_cast %331 : vector<1x1x2x128xf32> to vector<2x128xf32>
    %333 = vector.shape_cast %330 : vector<2x128xf32> to vector<1x1x2x128xf32>
    tpu.vector_store %arg7[%c1_275, %c4_276, %c0_277, %c0_278], %333 {strides = array<i32>} : memref<4x8x2x128xf32, #tpu.memory_space<vmem>>, vector<1x1x2x128xf32>,
    %c2_279 = arith.constant 2 : index
    %c4_280 = arith.constant 4 : index
    %c0_281 = arith.constant 0 : index
    %c0_282 = arith.constant 0 : index
    %334 = vector.load %arg7[%c2_279, %c4_280, %c0_281, %c0_282] : memref<4x8x2x128xf32, #tpu.memory_space<vmem>>, vector<1x1x2x128xf32>
    %335 = vector.shape_cast %334 : vector<1x1x2x128xf32> to vector<2x128xf32>
    %cst_283 = arith.constant dense<0.000000e+00> : vector<2x128xf32>
    %336 = vector.multi_reduction <add>, %318, %cst_283 [0] : vector<2x2x128xf32> to vector<2x128xf32>
    %337 = arith.addf %335, %336 : vector<2x128xf32>
    %c2_284 = arith.constant 2 : index
    %c4_285 = arith.constant 4 : index
    %c0_286 = arith.constant 0 : index
    %c0_287 = arith.constant 0 : index
    %338 = vector.load %arg7[%c2_284, %c4_285, %c0_286, %c0_287] : memref<4x8x2x128xf32, #tpu.memory_space<vmem>>, vector<1x1x2x128xf32>
    %339 = vector.shape_cast %338 : vector<1x1x2x128xf32> to vector<2x128xf32>
    %340 = vector.shape_cast %337 : vector<2x128xf32> to vector<1x1x2x128xf32>
    tpu.vector_store %arg7[%c2_284, %c4_285, %c0_286, %c0_287], %340 {strides = array<i32>} : memref<4x8x2x128xf32, #tpu.memory_space<vmem>>, vector<1x1x2x128xf32>,
    %c3_288 = arith.constant 3 : index
    %c4_289 = arith.constant 4 : index
    %c0_290 = arith.constant 0 : index
    %c0_291 = arith.constant 0 : index
    %341 = vector.load %arg7[%c3_288, %c4_289, %c0_290, %c0_291] : memref<4x8x2x128xf32, #tpu.memory_space<vmem>>, vector<1x1x2x128xf32>
    %342 = vector.shape_cast %341 : vector<1x1x2x128xf32> to vector<2x128xf32>
    %343 = arith.mulf %318, %318 : vector<2x2x128xf32>
    %cst_292 = arith.constant dense<0.000000e+00> : vector<2x128xf32>
    %344 = vector.multi_reduction <add>, %343, %cst_292 [0] : vector<2x2x128xf32> to vector<2x128xf32>
    %345 = arith.addf %342, %344 : vector<2x128xf32>
    %c3_293 = arith.constant 3 : index
    %c4_294 = arith.constant 4 : index
    %c0_295 = arith.constant 0 : index
    %c0_296 = arith.constant 0 : index
    %346 = vector.load %arg7[%c3_293, %c4_294, %c0_295, %c0_296] : memref<4x8x2x128xf32, #tpu.memory_space<vmem>>, vector<1x1x2x128xf32>
    %347 = vector.shape_cast %346 : vector<1x1x2x128xf32> to vector<2x128xf32>
    %348 = vector.shape_cast %345 : vector<2x128xf32> to vector<1x1x2x128xf32>
    tpu.vector_store %arg7[%c3_293, %c4_294, %c0_295, %c0_296], %348 {strides = array<i32>} : memref<4x8x2x128xf32, #tpu.memory_space<vmem>>, vector<1x1x2x128xf32>,
    %c0_297 = arith.constant 0 : index
    %c5 = arith.constant 5 : index
    %349 = memref.load %arg3[%c0_297, %c5] : memref<4x8xf32, #tpu.memory_space<smem>>
    %350 = vector.broadcast %349 : f32 to vector<2x2x128xf32>
    %351 = arith.mulf %350, %4 : vector<2x2x128xf32>
    %c5_298 = arith.constant 5 : index
    %352 = memref.load %arg4[%c5_298] : memref<8xf32, #tpu.memory_space<smem>>
    %353 = vector.broadcast %352 : f32 to vector<2x2x128xf32>
    %354 = arith.addf %351, %353 : vector<2x2x128xf32>
    %c1_299 = arith.constant 1 : index
    %c5_300 = arith.constant 5 : index
    %355 = memref.load %arg3[%c1_299, %c5_300] : memref<4x8xf32, #tpu.memory_space<smem>>
    %356 = vector.broadcast %355 : f32 to vector<2x2x128xf32>
    %357 = arith.mulf %356, %6 : vector<2x2x128xf32>
    %358 = arith.addf %354, %357 : vector<2x2x128xf32>
    %c2_301 = arith.constant 2 : index
    %c5_302 = arith.constant 5 : index
    %359 = memref.load %arg3[%c2_301, %c5_302] : memref<4x8xf32, #tpu.memory_space<smem>>
    %360 = vector.broadcast %359 : f32 to vector<2x2x128xf32>
    %361 = arith.mulf %360, %8 : vector<2x2x128xf32>
    %362 = arith.addf %358, %361 : vector<2x2x128xf32>
    %c3_303 = arith.constant 3 : index
    %c5_304 = arith.constant 5 : index
    %363 = memref.load %arg3[%c3_303, %c5_304] : memref<4x8xf32, #tpu.memory_space<smem>>
    %364 = vector.broadcast %363 : f32 to vector<2x2x128xf32>
    %365 = arith.mulf %364, %10 : vector<2x2x128xf32>
    %366 = arith.addf %362, %365 : vector<2x2x128xf32>
    %c0_305 = arith.constant 0 : index
    %c5_306 = arith.constant 5 : index
    %367 = memref.load %arg5[%c0_305, %c5_306] : memref<4x8xf32, #tpu.memory_space<smem>>
    %368 = vector.broadcast %367 : f32 to vector<2x2x128xf32>
    %369 = arith.mulf %368, %12 : vector<2x2x128xf32>
    %c5_307 = arith.constant 5 : index
    %370 = memref.load %arg6[%c5_307] : memref<8xf32, #tpu.memory_space<smem>>
    %371 = vector.broadcast %370 : f32 to vector<2x2x128xf32>
    %372 = arith.addf %369, %371 : vector<2x2x128xf32>
    %c1_308 = arith.constant 1 : index
    %c5_309 = arith.constant 5 : index
    %373 = memref.load %arg5[%c1_308, %c5_309] : memref<4x8xf32, #tpu.memory_space<smem>>
    %374 = vector.broadcast %373 : f32 to vector<2x2x128xf32>
    %375 = arith.mulf %374, %14 : vector<2x2x128xf32>
    %376 = arith.addf %372, %375 : vector<2x2x128xf32>
    %c2_310 = arith.constant 2 : index
    %c5_311 = arith.constant 5 : index
    %377 = memref.load %arg5[%c2_310, %c5_311] : memref<4x8xf32, #tpu.memory_space<smem>>
    %378 = vector.broadcast %377 : f32 to vector<2x2x128xf32>
    %379 = arith.mulf %378, %16 : vector<2x2x128xf32>
    %380 = arith.addf %376, %379 : vector<2x2x128xf32>
    %c3_312 = arith.constant 3 : index
    %c5_313 = arith.constant 5 : index
    %381 = memref.load %arg5[%c3_312, %c5_313] : memref<4x8xf32, #tpu.memory_space<smem>>
    %382 = vector.broadcast %381 : f32 to vector<2x2x128xf32>
    %383 = arith.mulf %382, %18 : vector<2x2x128xf32>
    %384 = arith.addf %380, %383 : vector<2x2x128xf32>
    %c0_314 = arith.constant 0 : index
    %c5_315 = arith.constant 5 : index
    %c0_316 = arith.constant 0 : index
    %c0_317 = arith.constant 0 : index
    %385 = vector.load %arg7[%c0_314, %c5_315, %c0_316, %c0_317] : memref<4x8x2x128xf32, #tpu.memory_space<vmem>>, vector<1x1x2x128xf32>
    %386 = vector.shape_cast %385 : vector<1x1x2x128xf32> to vector<2x128xf32>
    %cst_318 = arith.constant dense<0.000000e+00> : vector<2x128xf32>
    %387 = vector.multi_reduction <add>, %366, %cst_318 [0] : vector<2x2x128xf32> to vector<2x128xf32>
    %388 = arith.addf %386, %387 : vector<2x128xf32>
    %c0_319 = arith.constant 0 : index
    %c5_320 = arith.constant 5 : index
    %c0_321 = arith.constant 0 : index
    %c0_322 = arith.constant 0 : index
    %389 = vector.load %arg7[%c0_319, %c5_320, %c0_321, %c0_322] : memref<4x8x2x128xf32, #tpu.memory_space<vmem>>, vector<1x1x2x128xf32>
    %390 = vector.shape_cast %389 : vector<1x1x2x128xf32> to vector<2x128xf32>
    %391 = vector.shape_cast %388 : vector<2x128xf32> to vector<1x1x2x128xf32>
    tpu.vector_store %arg7[%c0_319, %c5_320, %c0_321, %c0_322], %391 {strides = array<i32>} : memref<4x8x2x128xf32, #tpu.memory_space<vmem>>, vector<1x1x2x128xf32>,
    %c1_323 = arith.constant 1 : index
    %c5_324 = arith.constant 5 : index
    %c0_325 = arith.constant 0 : index
    %c0_326 = arith.constant 0 : index
    %392 = vector.load %arg7[%c1_323, %c5_324, %c0_325, %c0_326] : memref<4x8x2x128xf32, #tpu.memory_space<vmem>>, vector<1x1x2x128xf32>
    %393 = vector.shape_cast %392 : vector<1x1x2x128xf32> to vector<2x128xf32>
    %394 = arith.mulf %366, %366 : vector<2x2x128xf32>
    %cst_327 = arith.constant dense<0.000000e+00> : vector<2x128xf32>
    %395 = vector.multi_reduction <add>, %394, %cst_327 [0] : vector<2x2x128xf32> to vector<2x128xf32>
    %396 = arith.addf %393, %395 : vector<2x128xf32>
    %c1_328 = arith.constant 1 : index
    %c5_329 = arith.constant 5 : index
    %c0_330 = arith.constant 0 : index
    %c0_331 = arith.constant 0 : index
    %397 = vector.load %arg7[%c1_328, %c5_329, %c0_330, %c0_331] : memref<4x8x2x128xf32, #tpu.memory_space<vmem>>, vector<1x1x2x128xf32>
    %398 = vector.shape_cast %397 : vector<1x1x2x128xf32> to vector<2x128xf32>
    %399 = vector.shape_cast %396 : vector<2x128xf32> to vector<1x1x2x128xf32>
    tpu.vector_store %arg7[%c1_328, %c5_329, %c0_330, %c0_331], %399 {strides = array<i32>} : memref<4x8x2x128xf32, #tpu.memory_space<vmem>>, vector<1x1x2x128xf32>,
    %c2_332 = arith.constant 2 : index
    %c5_333 = arith.constant 5 : index
    %c0_334 = arith.constant 0 : index
    %c0_335 = arith.constant 0 : index
    %400 = vector.load %arg7[%c2_332, %c5_333, %c0_334, %c0_335] : memref<4x8x2x128xf32, #tpu.memory_space<vmem>>, vector<1x1x2x128xf32>
    %401 = vector.shape_cast %400 : vector<1x1x2x128xf32> to vector<2x128xf32>
    %cst_336 = arith.constant dense<0.000000e+00> : vector<2x128xf32>
    %402 = vector.multi_reduction <add>, %384, %cst_336 [0] : vector<2x2x128xf32> to vector<2x128xf32>
    %403 = arith.addf %401, %402 : vector<2x128xf32>
    %c2_337 = arith.constant 2 : index
    %c5_338 = arith.constant 5 : index
    %c0_339 = arith.constant 0 : index
    %c0_340 = arith.constant 0 : index
    %404 = vector.load %arg7[%c2_337, %c5_338, %c0_339, %c0_340] : memref<4x8x2x128xf32, #tpu.memory_space<vmem>>, vector<1x1x2x128xf32>
    %405 = vector.shape_cast %404 : vector<1x1x2x128xf32> to vector<2x128xf32>
    %406 = vector.shape_cast %403 : vector<2x128xf32> to vector<1x1x2x128xf32>
    tpu.vector_store %arg7[%c2_337, %c5_338, %c0_339, %c0_340], %406 {strides = array<i32>} : memref<4x8x2x128xf32, #tpu.memory_space<vmem>>, vector<1x1x2x128xf32>,
    %c3_341 = arith.constant 3 : index
    %c5_342 = arith.constant 5 : index
    %c0_343 = arith.constant 0 : index
    %c0_344 = arith.constant 0 : index
    %407 = vector.load %arg7[%c3_341, %c5_342, %c0_343, %c0_344] : memref<4x8x2x128xf32, #tpu.memory_space<vmem>>, vector<1x1x2x128xf32>
    %408 = vector.shape_cast %407 : vector<1x1x2x128xf32> to vector<2x128xf32>
    %409 = arith.mulf %384, %384 : vector<2x2x128xf32>
    %cst_345 = arith.constant dense<0.000000e+00> : vector<2x128xf32>
    %410 = vector.multi_reduction <add>, %409, %cst_345 [0] : vector<2x2x128xf32> to vector<2x128xf32>
    %411 = arith.addf %408, %410 : vector<2x128xf32>
    %c3_346 = arith.constant 3 : index
    %c5_347 = arith.constant 5 : index
    %c0_348 = arith.constant 0 : index
    %c0_349 = arith.constant 0 : index
    %412 = vector.load %arg7[%c3_346, %c5_347, %c0_348, %c0_349] : memref<4x8x2x128xf32, #tpu.memory_space<vmem>>, vector<1x1x2x128xf32>
    %413 = vector.shape_cast %412 : vector<1x1x2x128xf32> to vector<2x128xf32>
    %414 = vector.shape_cast %411 : vector<2x128xf32> to vector<1x1x2x128xf32>
    tpu.vector_store %arg7[%c3_346, %c5_347, %c0_348, %c0_349], %414 {strides = array<i32>} : memref<4x8x2x128xf32, #tpu.memory_space<vmem>>, vector<1x1x2x128xf32>,
    %c0_350 = arith.constant 0 : index
    %c6 = arith.constant 6 : index
    %415 = memref.load %arg3[%c0_350, %c6] : memref<4x8xf32, #tpu.memory_space<smem>>
    %416 = vector.broadcast %415 : f32 to vector<2x2x128xf32>
    %417 = arith.mulf %416, %4 : vector<2x2x128xf32>
    %c6_351 = arith.constant 6 : index
    %418 = memref.load %arg4[%c6_351] : memref<8xf32, #tpu.memory_space<smem>>
    %419 = vector.broadcast %418 : f32 to vector<2x2x128xf32>
    %420 = arith.addf %417, %419 : vector<2x2x128xf32>
    %c1_352 = arith.constant 1 : index
    %c6_353 = arith.constant 6 : index
    %421 = memref.load %arg3[%c1_352, %c6_353] : memref<4x8xf32, #tpu.memory_space<smem>>
    %422 = vector.broadcast %421 : f32 to vector<2x2x128xf32>
    %423 = arith.mulf %422, %6 : vector<2x2x128xf32>
    %424 = arith.addf %420, %423 : vector<2x2x128xf32>
    %c2_354 = arith.constant 2 : index
    %c6_355 = arith.constant 6 : index
    %425 = memref.load %arg3[%c2_354, %c6_355] : memref<4x8xf32, #tpu.memory_space<smem>>
    %426 = vector.broadcast %425 : f32 to vector<2x2x128xf32>
    %427 = arith.mulf %426, %8 : vector<2x2x128xf32>
    %428 = arith.addf %424, %427 : vector<2x2x128xf32>
    %c3_356 = arith.constant 3 : index
    %c6_357 = arith.constant 6 : index
    %429 = memref.load %arg3[%c3_356, %c6_357] : memref<4x8xf32, #tpu.memory_space<smem>>
    %430 = vector.broadcast %429 : f32 to vector<2x2x128xf32>
    %431 = arith.mulf %430, %10 : vector<2x2x128xf32>
    %432 = arith.addf %428, %431 : vector<2x2x128xf32>
    %c0_358 = arith.constant 0 : index
    %c6_359 = arith.constant 6 : index
    %433 = memref.load %arg5[%c0_358, %c6_359] : memref<4x8xf32, #tpu.memory_space<smem>>
    %434 = vector.broadcast %433 : f32 to vector<2x2x128xf32>
    %435 = arith.mulf %434, %12 : vector<2x2x128xf32>
    %c6_360 = arith.constant 6 : index
    %436 = memref.load %arg6[%c6_360] : memref<8xf32, #tpu.memory_space<smem>>
    %437 = vector.broadcast %436 : f32 to vector<2x2x128xf32>
    %438 = arith.addf %435, %437 : vector<2x2x128xf32>
    %c1_361 = arith.constant 1 : index
    %c6_362 = arith.constant 6 : index
    %439 = memref.load %arg5[%c1_361, %c6_362] : memref<4x8xf32, #tpu.memory_space<smem>>
    %440 = vector.broadcast %439 : f32 to vector<2x2x128xf32>
    %441 = arith.mulf %440, %14 : vector<2x2x128xf32>
    %442 = arith.addf %438, %441 : vector<2x2x128xf32>
    %c2_363 = arith.constant 2 : index
    %c6_364 = arith.constant 6 : index
    %443 = memref.load %arg5[%c2_363, %c6_364] : memref<4x8xf32, #tpu.memory_space<smem>>
    %444 = vector.broadcast %443 : f32 to vector<2x2x128xf32>
    %445 = arith.mulf %444, %16 : vector<2x2x128xf32>
    %446 = arith.addf %442, %445 : vector<2x2x128xf32>
    %c3_365 = arith.constant 3 : index
    %c6_366 = arith.constant 6 : index
    %447 = memref.load %arg5[%c3_365, %c6_366] : memref<4x8xf32, #tpu.memory_space<smem>>
    %448 = vector.broadcast %447 : f32 to vector<2x2x128xf32>
    %449 = arith.mulf %448, %18 : vector<2x2x128xf32>
    %450 = arith.addf %446, %449 : vector<2x2x128xf32>
    %c0_367 = arith.constant 0 : index
    %c6_368 = arith.constant 6 : index
    %c0_369 = arith.constant 0 : index
    %c0_370 = arith.constant 0 : index
    %451 = vector.load %arg7[%c0_367, %c6_368, %c0_369, %c0_370] : memref<4x8x2x128xf32, #tpu.memory_space<vmem>>, vector<1x1x2x128xf32>
    %452 = vector.shape_cast %451 : vector<1x1x2x128xf32> to vector<2x128xf32>
    %cst_371 = arith.constant dense<0.000000e+00> : vector<2x128xf32>
    %453 = vector.multi_reduction <add>, %432, %cst_371 [0] : vector<2x2x128xf32> to vector<2x128xf32>
    %454 = arith.addf %452, %453 : vector<2x128xf32>
    %c0_372 = arith.constant 0 : index
    %c6_373 = arith.constant 6 : index
    %c0_374 = arith.constant 0 : index
    %c0_375 = arith.constant 0 : index
    %455 = vector.load %arg7[%c0_372, %c6_373, %c0_374, %c0_375] : memref<4x8x2x128xf32, #tpu.memory_space<vmem>>, vector<1x1x2x128xf32>
    %456 = vector.shape_cast %455 : vector<1x1x2x128xf32> to vector<2x128xf32>
    %457 = vector.shape_cast %454 : vector<2x128xf32> to vector<1x1x2x128xf32>
    tpu.vector_store %arg7[%c0_372, %c6_373, %c0_374, %c0_375], %457 {strides = array<i32>} : memref<4x8x2x128xf32, #tpu.memory_space<vmem>>, vector<1x1x2x128xf32>,
    %c1_376 = arith.constant 1 : index
    %c6_377 = arith.constant 6 : index
    %c0_378 = arith.constant 0 : index
    %c0_379 = arith.constant 0 : index
    %458 = vector.load %arg7[%c1_376, %c6_377, %c0_378, %c0_379] : memref<4x8x2x128xf32, #tpu.memory_space<vmem>>, vector<1x1x2x128xf32>
    %459 = vector.shape_cast %458 : vector<1x1x2x128xf32> to vector<2x128xf32>
    %460 = arith.mulf %432, %432 : vector<2x2x128xf32>
    %cst_380 = arith.constant dense<0.000000e+00> : vector<2x128xf32>
    %461 = vector.multi_reduction <add>, %460, %cst_380 [0] : vector<2x2x128xf32> to vector<2x128xf32>
    %462 = arith.addf %459, %461 : vector<2x128xf32>
    %c1_381 = arith.constant 1 : index
    %c6_382 = arith.constant 6 : index
    %c0_383 = arith.constant 0 : index
    %c0_384 = arith.constant 0 : index
    %463 = vector.load %arg7[%c1_381, %c6_382, %c0_383, %c0_384] : memref<4x8x2x128xf32, #tpu.memory_space<vmem>>, vector<1x1x2x128xf32>
    %464 = vector.shape_cast %463 : vector<1x1x2x128xf32> to vector<2x128xf32>
    %465 = vector.shape_cast %462 : vector<2x128xf32> to vector<1x1x2x128xf32>
    tpu.vector_store %arg7[%c1_381, %c6_382, %c0_383, %c0_384], %465 {strides = array<i32>} : memref<4x8x2x128xf32, #tpu.memory_space<vmem>>, vector<1x1x2x128xf32>,
    %c2_385 = arith.constant 2 : index
    %c6_386 = arith.constant 6 : index
    %c0_387 = arith.constant 0 : index
    %c0_388 = arith.constant 0 : index
    %466 = vector.load %arg7[%c2_385, %c6_386, %c0_387, %c0_388] : memref<4x8x2x128xf32, #tpu.memory_space<vmem>>, vector<1x1x2x128xf32>
    %467 = vector.shape_cast %466 : vector<1x1x2x128xf32> to vector<2x128xf32>
    %cst_389 = arith.constant dense<0.000000e+00> : vector<2x128xf32>
    %468 = vector.multi_reduction <add>, %450, %cst_389 [0] : vector<2x2x128xf32> to vector<2x128xf32>
    %469 = arith.addf %467, %468 : vector<2x128xf32>
    %c2_390 = arith.constant 2 : index
    %c6_391 = arith.constant 6 : index
    %c0_392 = arith.constant 0 : index
    %c0_393 = arith.constant 0 : index
    %470 = vector.load %arg7[%c2_390, %c6_391, %c0_392, %c0_393] : memref<4x8x2x128xf32, #tpu.memory_space<vmem>>, vector<1x1x2x128xf32>
    %471 = vector.shape_cast %470 : vector<1x1x2x128xf32> to vector<2x128xf32>
    %472 = vector.shape_cast %469 : vector<2x128xf32> to vector<1x1x2x128xf32>
    tpu.vector_store %arg7[%c2_390, %c6_391, %c0_392, %c0_393], %472 {strides = array<i32>} : memref<4x8x2x128xf32, #tpu.memory_space<vmem>>, vector<1x1x2x128xf32>,
    %c3_394 = arith.constant 3 : index
    %c6_395 = arith.constant 6 : index
    %c0_396 = arith.constant 0 : index
    %c0_397 = arith.constant 0 : index
    %473 = vector.load %arg7[%c3_394, %c6_395, %c0_396, %c0_397] : memref<4x8x2x128xf32, #tpu.memory_space<vmem>>, vector<1x1x2x128xf32>
    %474 = vector.shape_cast %473 : vector<1x1x2x128xf32> to vector<2x128xf32>
    %475 = arith.mulf %450, %450 : vector<2x2x128xf32>
    %cst_398 = arith.constant dense<0.000000e+00> : vector<2x128xf32>
    %476 = vector.multi_reduction <add>, %475, %cst_398 [0] : vector<2x2x128xf32> to vector<2x128xf32>
    %477 = arith.addf %474, %476 : vector<2x128xf32>
    %c3_399 = arith.constant 3 : index
    %c6_400 = arith.constant 6 : index
    %c0_401 = arith.constant 0 : index
    %c0_402 = arith.constant 0 : index
    %478 = vector.load %arg7[%c3_399, %c6_400, %c0_401, %c0_402] : memref<4x8x2x128xf32, #tpu.memory_space<vmem>>, vector<1x1x2x128xf32>
    %479 = vector.shape_cast %478 : vector<1x1x2x128xf32> to vector<2x128xf32>
    %480 = vector.shape_cast %477 : vector<2x128xf32> to vector<1x1x2x128xf32>
    tpu.vector_store %arg7[%c3_399, %c6_400, %c0_401, %c0_402], %480 {strides = array<i32>} : memref<4x8x2x128xf32, #tpu.memory_space<vmem>>, vector<1x1x2x128xf32>,
    %c0_403 = arith.constant 0 : index
    %c7 = arith.constant 7 : index
    %481 = memref.load %arg3[%c0_403, %c7] : memref<4x8xf32, #tpu.memory_space<smem>>
    %482 = vector.broadcast %481 : f32 to vector<2x2x128xf32>
    %483 = arith.mulf %482, %4 : vector<2x2x128xf32>
    %c7_404 = arith.constant 7 : index
    %484 = memref.load %arg4[%c7_404] : memref<8xf32, #tpu.memory_space<smem>>
    %485 = vector.broadcast %484 : f32 to vector<2x2x128xf32>
    %486 = arith.addf %483, %485 : vector<2x2x128xf32>
    %c1_405 = arith.constant 1 : index
    %c7_406 = arith.constant 7 : index
    %487 = memref.load %arg3[%c1_405, %c7_406] : memref<4x8xf32, #tpu.memory_space<smem>>
    %488 = vector.broadcast %487 : f32 to vector<2x2x128xf32>
    %489 = arith.mulf %488, %6 : vector<2x2x128xf32>
    %490 = arith.addf %486, %489 : vector<2x2x128xf32>
    %c2_407 = arith.constant 2 : index
    %c7_408 = arith.constant 7 : index
    %491 = memref.load %arg3[%c2_407, %c7_408] : memref<4x8xf32, #tpu.memory_space<smem>>
    %492 = vector.broadcast %491 : f32 to vector<2x2x128xf32>
    %493 = arith.mulf %492, %8 : vector<2x2x128xf32>
    %494 = arith.addf %490, %493 : vector<2x2x128xf32>
    %c3_409 = arith.constant 3 : index
    %c7_410 = arith.constant 7 : index
    %495 = memref.load %arg3[%c3_409, %c7_410] : memref<4x8xf32, #tpu.memory_space<smem>>
    %496 = vector.broadcast %495 : f32 to vector<2x2x128xf32>
    %497 = arith.mulf %496, %10 : vector<2x2x128xf32>
    %498 = arith.addf %494, %497 : vector<2x2x128xf32>
    %c0_411 = arith.constant 0 : index
    %c7_412 = arith.constant 7 : index
    %499 = memref.load %arg5[%c0_411, %c7_412] : memref<4x8xf32, #tpu.memory_space<smem>>
    %500 = vector.broadcast %499 : f32 to vector<2x2x128xf32>
    %501 = arith.mulf %500, %12 : vector<2x2x128xf32>
    %c7_413 = arith.constant 7 : index
    %502 = memref.load %arg6[%c7_413] : memref<8xf32, #tpu.memory_space<smem>>
    %503 = vector.broadcast %502 : f32 to vector<2x2x128xf32>
    %504 = arith.addf %501, %503 : vector<2x2x128xf32>
    %c1_414 = arith.constant 1 : index
    %c7_415 = arith.constant 7 : index
    %505 = memref.load %arg5[%c1_414, %c7_415] : memref<4x8xf32, #tpu.memory_space<smem>>
    %506 = vector.broadcast %505 : f32 to vector<2x2x128xf32>
    %507 = arith.mulf %506, %14 : vector<2x2x128xf32>
    %508 = arith.addf %504, %507 : vector<2x2x128xf32>
    %c2_416 = arith.constant 2 : index
    %c7_417 = arith.constant 7 : index
    %509 = memref.load %arg5[%c2_416, %c7_417] : memref<4x8xf32, #tpu.memory_space<smem>>
    %510 = vector.broadcast %509 : f32 to vector<2x2x128xf32>
    %511 = arith.mulf %510, %16 : vector<2x2x128xf32>
    %512 = arith.addf %508, %511 : vector<2x2x128xf32>
    %c3_418 = arith.constant 3 : index
    %c7_419 = arith.constant 7 : index
    %513 = memref.load %arg5[%c3_418, %c7_419] : memref<4x8xf32, #tpu.memory_space<smem>>
    %514 = vector.broadcast %513 : f32 to vector<2x2x128xf32>
    %515 = arith.mulf %514, %18 : vector<2x2x128xf32>
    %516 = arith.addf %512, %515 : vector<2x2x128xf32>
    %c0_420 = arith.constant 0 : index
    %c7_421 = arith.constant 7 : index
    %c0_422 = arith.constant 0 : index
    %c0_423 = arith.constant 0 : index
    %517 = vector.load %arg7[%c0_420, %c7_421, %c0_422, %c0_423] : memref<4x8x2x128xf32, #tpu.memory_space<vmem>>, vector<1x1x2x128xf32>
    %518 = vector.shape_cast %517 : vector<1x1x2x128xf32> to vector<2x128xf32>
    %cst_424 = arith.constant dense<0.000000e+00> : vector<2x128xf32>
    %519 = vector.multi_reduction <add>, %498, %cst_424 [0] : vector<2x2x128xf32> to vector<2x128xf32>
    %520 = arith.addf %518, %519 : vector<2x128xf32>
    %c0_425 = arith.constant 0 : index
    %c7_426 = arith.constant 7 : index
    %c0_427 = arith.constant 0 : index
    %c0_428 = arith.constant 0 : index
    %521 = vector.load %arg7[%c0_425, %c7_426, %c0_427, %c0_428] : memref<4x8x2x128xf32, #tpu.memory_space<vmem>>, vector<1x1x2x128xf32>
    %522 = vector.shape_cast %521 : vector<1x1x2x128xf32> to vector<2x128xf32>
    %523 = vector.shape_cast %520 : vector<2x128xf32> to vector<1x1x2x128xf32>
    tpu.vector_store %arg7[%c0_425, %c7_426, %c0_427, %c0_428], %523 {strides = array<i32>} : memref<4x8x2x128xf32, #tpu.memory_space<vmem>>, vector<1x1x2x128xf32>,
    %c1_429 = arith.constant 1 : index
    %c7_430 = arith.constant 7 : index
    %c0_431 = arith.constant 0 : index
    %c0_432 = arith.constant 0 : index
    %524 = vector.load %arg7[%c1_429, %c7_430, %c0_431, %c0_432] : memref<4x8x2x128xf32, #tpu.memory_space<vmem>>, vector<1x1x2x128xf32>
    %525 = vector.shape_cast %524 : vector<1x1x2x128xf32> to vector<2x128xf32>
    %526 = arith.mulf %498, %498 : vector<2x2x128xf32>
    %cst_433 = arith.constant dense<0.000000e+00> : vector<2x128xf32>
    %527 = vector.multi_reduction <add>, %526, %cst_433 [0] : vector<2x2x128xf32> to vector<2x128xf32>
    %528 = arith.addf %525, %527 : vector<2x128xf32>
    %c1_434 = arith.constant 1 : index
    %c7_435 = arith.constant 7 : index
    %c0_436 = arith.constant 0 : index
    %c0_437 = arith.constant 0 : index
    %529 = vector.load %arg7[%c1_434, %c7_435, %c0_436, %c0_437] : memref<4x8x2x128xf32, #tpu.memory_space<vmem>>, vector<1x1x2x128xf32>
    %530 = vector.shape_cast %529 : vector<1x1x2x128xf32> to vector<2x128xf32>
    %531 = vector.shape_cast %528 : vector<2x128xf32> to vector<1x1x2x128xf32>
    tpu.vector_store %arg7[%c1_434, %c7_435, %c0_436, %c0_437], %531 {strides = array<i32>} : memref<4x8x2x128xf32, #tpu.memory_space<vmem>>, vector<1x1x2x128xf32>,
    %c2_438 = arith.constant 2 : index
    %c7_439 = arith.constant 7 : index
    %c0_440 = arith.constant 0 : index
    %c0_441 = arith.constant 0 : index
    %532 = vector.load %arg7[%c2_438, %c7_439, %c0_440, %c0_441] : memref<4x8x2x128xf32, #tpu.memory_space<vmem>>, vector<1x1x2x128xf32>
    %533 = vector.shape_cast %532 : vector<1x1x2x128xf32> to vector<2x128xf32>
    %cst_442 = arith.constant dense<0.000000e+00> : vector<2x128xf32>
    %534 = vector.multi_reduction <add>, %516, %cst_442 [0] : vector<2x2x128xf32> to vector<2x128xf32>
    %535 = arith.addf %533, %534 : vector<2x128xf32>
    %c2_443 = arith.constant 2 : index
    %c7_444 = arith.constant 7 : index
    %c0_445 = arith.constant 0 : index
    %c0_446 = arith.constant 0 : index
    %536 = vector.load %arg7[%c2_443, %c7_444, %c0_445, %c0_446] : memref<4x8x2x128xf32, #tpu.memory_space<vmem>>, vector<1x1x2x128xf32>
    %537 = vector.shape_cast %536 : vector<1x1x2x128xf32> to vector<2x128xf32>
    %538 = vector.shape_cast %535 : vector<2x128xf32> to vector<1x1x2x128xf32>
    tpu.vector_store %arg7[%c2_443, %c7_444, %c0_445, %c0_446], %538 {strides = array<i32>} : memref<4x8x2x128xf32, #tpu.memory_space<vmem>>, vector<1x1x2x128xf32>,
    %c3_447 = arith.constant 3 : index
    %c7_448 = arith.constant 7 : index
    %c0_449 = arith.constant 0 : index
    %c0_450 = arith.constant 0 : index
    %539 = vector.load %arg7[%c3_447, %c7_448, %c0_449, %c0_450] : memref<4x8x2x128xf32, #tpu.memory_space<vmem>>, vector<1x1x2x128xf32>
    %540 = vector.shape_cast %539 : vector<1x1x2x128xf32> to vector<2x128xf32>
    %541 = arith.mulf %516, %516 : vector<2x2x128xf32>
    %cst_451 = arith.constant dense<0.000000e+00> : vector<2x128xf32>
    %542 = vector.multi_reduction <add>, %541, %cst_451 [0] : vector<2x2x128xf32> to vector<2x128xf32>
    %543 = arith.addf %540, %542 : vector<2x128xf32>
    %c3_452 = arith.constant 3 : index
    %c7_453 = arith.constant 7 : index
    %c0_454 = arith.constant 0 : index
    %c0_455 = arith.constant 0 : index
    %544 = vector.load %arg7[%c3_452, %c7_453, %c0_454, %c0_455] : memref<4x8x2x128xf32, #tpu.memory_space<vmem>>, vector<1x1x2x128xf32>
    %545 = vector.shape_cast %544 : vector<1x1x2x128xf32> to vector<2x128xf32>
    %546 = vector.shape_cast %543 : vector<2x128xf32> to vector<1x1x2x128xf32>
    tpu.vector_store %arg7[%c3_452, %c7_453, %c0_454, %c0_455], %546 {strides = array<i32>} : memref<4x8x2x128xf32, #tpu.memory_space<vmem>>, vector<1x1x2x128xf32>,
    return
  }
  func.func @transform_0(%arg0: i32) -> (i32, i32, i32, i32) {
    %c0_i32 = arith.constant 0 : i32
    %c0_i32_0 = arith.constant 0 : i32
    %c0_i32_1 = arith.constant 0 : i32
    %c0_i32_2 = arith.constant 0 : i32
    return %c0_i32, %c0_i32_0, %arg0, %c0_i32_1 : i32, i32, i32, i32
  }
  func.func @transform_1(%arg0: i32) -> (i32, i32, i32, i32) {
    %c0_i32 = arith.constant 0 : i32
    %c0_i32_0 = arith.constant 0 : i32
    %c0_i32_1 = arith.constant 0 : i32
    %c0_i32_2 = arith.constant 0 : i32
    return %c0_i32, %c0_i32_0, %arg0, %c0_i32_1 : i32, i32, i32, i32
  }
  func.func @transform_2(%arg0: i32) -> (i32, i32) {
    %c0_i32 = arith.constant 0 : i32
    %c0_i32_0 = arith.constant 0 : i32
    %c0_i32_1 = arith.constant 0 : i32
    return %c0_i32, %c0_i32_0 : i32, i32
  }
  func.func @transform_3(%arg0: i32) -> i32 {
    %c0_i32 = arith.constant 0 : i32
    %c0_i32_0 = arith.constant 0 : i32
    return %c0_i32 : i32
  }
  func.func @transform_4(%arg0: i32) -> (i32, i32) {
    %c0_i32 = arith.constant 0 : i32
    %c0_i32_0 = arith.constant 0 : i32
    %c0_i32_1 = arith.constant 0 : i32
    return %c0_i32, %c0_i32_0 : i32, i32
  }
  func.func @transform_5(%arg0: i32) -> i32 {
    %c0_i32 = arith.constant 0 : i32
    %c0_i32_0 = arith.constant 0 : i32
    return %c0_i32 : i32
  }
  func.func @transform_6(%arg0: i32) -> (i32, i32, i32, i32) {
    %c0_i32 = arith.constant 0 : i32
    %c0_i32_0 = arith.constant 0 : i32
    %c0_i32_1 = arith.constant 0 : i32
    %c0_i32_2 = arith.constant 0 : i32
    %c0_i32_3 = arith.constant 0 : i32
    return %c0_i32, %c0_i32_0, %c0_i32_1, %c0_i32_2 : i32, i32, i32, i32
  }
}

module attributes {stable_mosaic.version = 11 : i64} {
  func.func @_out_kernel(%arg0: i32, %arg1: memref<2x4x2x128xf32, #tpu.memory_space<vmem>>, %arg2: memref<2x2x128xf32, #tpu.memory_space<vmem>>, %arg3: memref<1xf32, #tpu.memory_space<smem>>, %arg4: memref<1xf32, #tpu.memory_space<smem>>, %arg5: memref<2x4x2x128xf32, #tpu.memory_space<vmem>>) attributes {dimension_semantics = [#tpu.dimension_semantics<parallel>], iteration_bounds = array<i64: 1>, scalar_prefetch = 0 : i64, scratch_operands = 0 : i64, tpu.core_type = #tpu.core_type<tc>, window_params = [{transform_indices = @transform_0, window_bounds = array<i64: 2, 4, 2, 128>}, {transform_indices = @transform_1, window_bounds = array<i64: 2, 2, 128>}, {transform_indices = @transform_2, window_bounds = array<i64: 1>}, {transform_indices = @transform_3, window_bounds = array<i64: 1>}, {transform_indices = @transform_4, window_bounds = array<i64: 2, 4, 2, 128>}]} {
    %c0 = arith.constant 0 : index
    %0 = memref.load %arg3[%c0] : memref<1xf32, #tpu.memory_space<smem>>
    %c0_0 = arith.constant 0 : index
    %c0_1 = arith.constant 0 : index
    %c0_2 = arith.constant 0 : index
    %1 = vector.load %arg2[%c0_0, %c0_1, %c0_2] : memref<2x2x128xf32, #tpu.memory_space<vmem>>, vector<2x2x128xf32>
    %2 = vector.broadcast %0 : f32 to vector<2x2x128xf32>
    %3 = arith.mulf %2, %1 : vector<2x2x128xf32>
    %c0_3 = arith.constant 0 : index
    %4 = memref.load %arg4[%c0_3] : memref<1xf32, #tpu.memory_space<smem>>
    %5 = vector.broadcast %4 : f32 to vector<2x2x128xf32>
    %6 = arith.addf %3, %5 : vector<2x2x128xf32>
    %cst = arith.constant 0.000000e+00 : f32
    %7 = vector.broadcast %cst : f32 to vector<2x2x128xf32>
    %8 = arith.subf %7, %6 : vector<2x2x128xf32>
    %9 = math.exp %8 : vector<2x2x128xf32>
    %cst_4 = arith.constant 1.000000e+00 : f32
    %10 = vector.broadcast %cst_4 : f32 to vector<2x2x128xf32>
    %11 = arith.addf %10, %9 : vector<2x2x128xf32>
    %cst_5 = arith.constant 1.000000e+00 : f32
    %12 = vector.broadcast %cst_5 : f32 to vector<2x2x128xf32>
    %13 = arith.divf %12, %11 : vector<2x2x128xf32>
    %c0_6 = arith.constant 0 : index
    %c0_7 = arith.constant 0 : index
    %c0_8 = arith.constant 0 : index
    %c0_9 = arith.constant 0 : index
    %14 = vector.load %arg1[%c0_6, %c0_7, %c0_8, %c0_9] : memref<2x4x2x128xf32, #tpu.memory_space<vmem>>, vector<2x4x2x128xf32>
    %15 = vector.shape_cast %13 : vector<2x2x128xf32> to vector<2x1x2x128xf32>
    %16 = vector.broadcast %15 : vector<2x1x2x128xf32> to vector<2x4x2x128xf32>
    %17 = arith.mulf %14, %16 : vector<2x4x2x128xf32>
    %c0_10 = arith.constant 0 : index
    %c0_11 = arith.constant 0 : index
    %c0_12 = arith.constant 0 : index
    %c0_13 = arith.constant 0 : index
    %18 = vector.load %arg5[%c0_10, %c0_11, %c0_12, %c0_13] : memref<2x4x2x128xf32, #tpu.memory_space<vmem>>, vector<2x4x2x128xf32>
    tpu.vector_store %arg5[%c0_10, %c0_11, %c0_12, %c0_13], %17 {strides = array<i32>} : memref<2x4x2x128xf32, #tpu.memory_space<vmem>>, vector<2x4x2x128xf32>,
    return
  }
  func.func @transform_0(%arg0: i32) -> (i32, i32, i32, i32) {
    %c0_i32 = arith.constant 0 : i32
    %c0_i32_0 = arith.constant 0 : i32
    %c0_i32_1 = arith.constant 0 : i32
    %c0_i32_2 = arith.constant 0 : i32
    return %c0_i32, %c0_i32_0, %arg0, %c0_i32_1 : i32, i32, i32, i32
  }
  func.func @transform_1(%arg0: i32) -> (i32, i32, i32) {
    %c0_i32 = arith.constant 0 : i32
    %c0_i32_0 = arith.constant 0 : i32
    %c0_i32_1 = arith.constant 0 : i32
    return %c0_i32, %arg0, %c0_i32_0 : i32, i32, i32
  }
  func.func @transform_2(%arg0: i32) -> i32 {
    %c0_i32 = arith.constant 0 : i32
    %c0_i32_0 = arith.constant 0 : i32
    return %c0_i32 : i32
  }
  func.func @transform_3(%arg0: i32) -> i32 {
    %c0_i32 = arith.constant 0 : i32
    %c0_i32_0 = arith.constant 0 : i32
    return %c0_i32 : i32
  }
  func.func @transform_4(%arg0: i32) -> (i32, i32, i32, i32) {
    %c0_i32 = arith.constant 0 : i32
    %c0_i32_0 = arith.constant 0 : i32
    %c0_i32_1 = arith.constant 0 : i32
    %c0_i32_2 = arith.constant 0 : i32
    return %c0_i32, %c0_i32_0, %arg0, %c0_i32_1 : i32, i32, i32, i32
  }
}

module attributes {stable_mosaic.version = 11 : i64} {
  func.func @kernel(%arg0: i32, %arg1: memref<2x4x2x128xf32, #tpu.memory_space<vmem>>, %arg2: memref<2x4x2x128xf32, #tpu.memory_space<vmem>>, %arg3: memref<4x8xf32, #tpu.memory_space<smem>>, %arg4: memref<8xf32, #tpu.memory_space<smem>>, %arg5: memref<4x8xf32, #tpu.memory_space<smem>>, %arg6: memref<8xf32, #tpu.memory_space<smem>>, %arg7: memref<8xf32, #tpu.memory_space<smem>>, %arg8: memref<1xf32, #tpu.memory_space<smem>>, %arg9: memref<2x2x128xf32, #tpu.memory_space<vmem>>) attributes {dimension_semantics = [#tpu.dimension_semantics<parallel>], iteration_bounds = array<i64: 1>, scalar_prefetch = 0 : i64, scratch_operands = 0 : i64, tpu.core_type = #tpu.core_type<tc>, window_params = [{transform_indices = @transform_0, window_bounds = array<i64: 2, 4, 2, 128>}, {transform_indices = @transform_1, window_bounds = array<i64: 2, 4, 2, 128>}, {transform_indices = @transform_2, window_bounds = array<i64: 4, 8>}, {transform_indices = @transform_3, window_bounds = array<i64: 8>}, {transform_indices = @transform_4, window_bounds = array<i64: 4, 8>}, {transform_indices = @transform_5, window_bounds = array<i64: 8>}, {transform_indices = @transform_6, window_bounds = array<i64: 8>}, {transform_indices = @transform_7, window_bounds = array<i64: 1>}, {transform_indices = @transform_8, window_bounds = array<i64: 2, 2, 128>}]} {
    %c0 = arith.constant 0 : index
    %c0_0 = arith.constant 0 : index
    %c0_1 = arith.constant 0 : index
    %c0_2 = arith.constant 0 : index
    %0 = vector.load %arg1[%c0, %c0_0, %c0_1, %c0_2] : memref<2x4x2x128xf32, #tpu.memory_space<vmem>>, vector<2x1x2x128xf32>
    %1 = vector.shape_cast %0 : vector<2x1x2x128xf32> to vector<2x2x128xf32>
    %c0_3 = arith.constant 0 : index
    %c1 = arith.constant 1 : index
    %c0_4 = arith.constant 0 : index
    %c0_5 = arith.constant 0 : index
    %2 = vector.load %arg1[%c0_3, %c1, %c0_4, %c0_5] : memref<2x4x2x128xf32, #tpu.memory_space<vmem>>, vector<2x1x2x128xf32>
    %3 = vector.shape_cast %2 : vector<2x1x2x128xf32> to vector<2x2x128xf32>
    %c0_6 = arith.constant 0 : index
    %c2 = arith.constant 2 : index
    %c0_7 = arith.constant 0 : index
    %c0_8 = arith.constant 0 : index
    %4 = vector.load %arg1[%c0_6, %c2, %c0_7, %c0_8] : memref<2x4x2x128xf32, #tpu.memory_space<vmem>>, vector<2x1x2x128xf32>
    %5 = vector.shape_cast %4 : vector<2x1x2x128xf32> to vector<2x2x128xf32>
    %c0_9 = arith.constant 0 : index
    %c3 = arith.constant 3 : index
    %c0_10 = arith.constant 0 : index
    %c0_11 = arith.constant 0 : index
    %6 = vector.load %arg1[%c0_9, %c3, %c0_10, %c0_11] : memref<2x4x2x128xf32, #tpu.memory_space<vmem>>, vector<2x1x2x128xf32>
    %7 = vector.shape_cast %6 : vector<2x1x2x128xf32> to vector<2x2x128xf32>
    %c0_12 = arith.constant 0 : index
    %c0_13 = arith.constant 0 : index
    %c0_14 = arith.constant 0 : index
    %c0_15 = arith.constant 0 : index
    %8 = vector.load %arg2[%c0_12, %c0_13, %c0_14, %c0_15] : memref<2x4x2x128xf32, #tpu.memory_space<vmem>>, vector<2x1x2x128xf32>
    %9 = vector.shape_cast %8 : vector<2x1x2x128xf32> to vector<2x2x128xf32>
    %c0_16 = arith.constant 0 : index
    %c1_17 = arith.constant 1 : index
    %c0_18 = arith.constant 0 : index
    %c0_19 = arith.constant 0 : index
    %10 = vector.load %arg2[%c0_16, %c1_17, %c0_18, %c0_19] : memref<2x4x2x128xf32, #tpu.memory_space<vmem>>, vector<2x1x2x128xf32>
    %11 = vector.shape_cast %10 : vector<2x1x2x128xf32> to vector<2x2x128xf32>
    %c0_20 = arith.constant 0 : index
    %c2_21 = arith.constant 2 : index
    %c0_22 = arith.constant 0 : index
    %c0_23 = arith.constant 0 : index
    %12 = vector.load %arg2[%c0_20, %c2_21, %c0_22, %c0_23] : memref<2x4x2x128xf32, #tpu.memory_space<vmem>>, vector<2x1x2x128xf32>
    %13 = vector.shape_cast %12 : vector<2x1x2x128xf32> to vector<2x2x128xf32>
    %c0_24 = arith.constant 0 : index
    %c3_25 = arith.constant 3 : index
    %c0_26 = arith.constant 0 : index
    %c0_27 = arith.constant 0 : index
    %14 = vector.load %arg2[%c0_24, %c3_25, %c0_26, %c0_27] : memref<2x4x2x128xf32, #tpu.memory_space<vmem>>, vector<2x1x2x128xf32>
    %15 = vector.shape_cast %14 : vector<2x1x2x128xf32> to vector<2x2x128xf32>
    %c0_28 = arith.constant 0 : index
    %c0_29 = arith.constant 0 : index
    %16 = memref.load %arg3[%c0_28, %c0_29] : memref<4x8xf32, #tpu.memory_space<smem>>
    %17 = vector.broadcast %16 : f32 to vector<2x2x128xf32>
    %18 = arith.mulf %17, %1 : vector<2x2x128xf32>
    %c0_30 = arith.constant 0 : index
    %19 = memref.load %arg4[%c0_30] : memref<8xf32, #tpu.memory_space<smem>>
    %20 = vector.broadcast %19 : f32 to vector<2x2x128xf32>
    %21 = arith.addf %18, %20 : vector<2x2x128xf32>
    %c1_31 = arith.constant 1 : index
    %c0_32 = arith.constant 0 : index
    %22 = memref.load %arg3[%c1_31, %c0_32] : memref<4x8xf32, #tpu.memory_space<smem>>
    %23 = vector.broadcast %22 : f32 to vector<2x2x128xf32>
    %24 = arith.mulf %23, %3 : vector<2x2x128xf32>
    %25 = arith.addf %21, %24 : vector<2x2x128xf32>
    %c2_33 = arith.constant 2 : index
    %c0_34 = arith.constant 0 : index
    %26 = memref.load %arg3[%c2_33, %c0_34] : memref<4x8xf32, #tpu.memory_space<smem>>
    %27 = vector.broadcast %26 : f32 to vector<2x2x128xf32>
    %28 = arith.mulf %27, %5 : vector<2x2x128xf32>
    %29 = arith.addf %25, %28 : vector<2x2x128xf32>
    %c3_35 = arith.constant 3 : index
    %c0_36 = arith.constant 0 : index
    %30 = memref.load %arg3[%c3_35, %c0_36] : memref<4x8xf32, #tpu.memory_space<smem>>
    %31 = vector.broadcast %30 : f32 to vector<2x2x128xf32>
    %32 = arith.mulf %31, %7 : vector<2x2x128xf32>
    %33 = arith.addf %29, %32 : vector<2x2x128xf32>
    %c0_37 = arith.constant 0 : index
    %c0_38 = arith.constant 0 : index
    %34 = memref.load %arg5[%c0_37, %c0_38] : memref<4x8xf32, #tpu.memory_space<smem>>
    %35 = vector.broadcast %34 : f32 to vector<2x2x128xf32>
    %36 = arith.mulf %35, %9 : vector<2x2x128xf32>
    %c0_39 = arith.constant 0 : index
    %37 = memref.load %arg6[%c0_39] : memref<8xf32, #tpu.memory_space<smem>>
    %38 = vector.broadcast %37 : f32 to vector<2x2x128xf32>
    %39 = arith.addf %36, %38 : vector<2x2x128xf32>
    %c1_40 = arith.constant 1 : index
    %c0_41 = arith.constant 0 : index
    %40 = memref.load %arg5[%c1_40, %c0_41] : memref<4x8xf32, #tpu.memory_space<smem>>
    %41 = vector.broadcast %40 : f32 to vector<2x2x128xf32>
    %42 = arith.mulf %41, %11 : vector<2x2x128xf32>
    %43 = arith.addf %39, %42 : vector<2x2x128xf32>
    %c2_42 = arith.constant 2 : index
    %c0_43 = arith.constant 0 : index
    %44 = memref.load %arg5[%c2_42, %c0_43] : memref<4x8xf32, #tpu.memory_space<smem>>
    %45 = vector.broadcast %44 : f32 to vector<2x2x128xf32>
    %46 = arith.mulf %45, %13 : vector<2x2x128xf32>
    %47 = arith.addf %43, %46 : vector<2x2x128xf32>
    %c3_44 = arith.constant 3 : index
    %c0_45 = arith.constant 0 : index
    %48 = memref.load %arg5[%c3_44, %c0_45] : memref<4x8xf32, #tpu.memory_space<smem>>
    %49 = vector.broadcast %48 : f32 to vector<2x2x128xf32>
    %50 = arith.mulf %49, %15 : vector<2x2x128xf32>
    %51 = arith.addf %47, %50 : vector<2x2x128xf32>
    %52 = arith.addf %33, %51 : vector<2x2x128xf32>
    %cst = arith.constant 0.000000e+00 : f32
    %53 = vector.broadcast %cst : f32 to vector<2x2x128xf32>
    %54 = arith.maximumf %52, %53 : vector<2x2x128xf32>
    %c0_46 = arith.constant 0 : index
    %55 = memref.load %arg7[%c0_46] : memref<8xf32, #tpu.memory_space<smem>>
    %56 = vector.broadcast %55 : f32 to vector<2x2x128xf32>
    %57 = arith.mulf %56, %54 : vector<2x2x128xf32>
    %c0_47 = arith.constant 0 : index
    %58 = memref.load %arg8[%c0_47] : memref<1xf32, #tpu.memory_space<smem>>
    %59 = vector.broadcast %58 : f32 to vector<2x2x128xf32>
    %60 = arith.addf %57, %59 : vector<2x2x128xf32>
    %c0_48 = arith.constant 0 : index
    %c1_49 = arith.constant 1 : index
    %61 = memref.load %arg3[%c0_48, %c1_49] : memref<4x8xf32, #tpu.memory_space<smem>>
    %62 = vector.broadcast %61 : f32 to vector<2x2x128xf32>
    %63 = arith.mulf %62, %1 : vector<2x2x128xf32>
    %c1_50 = arith.constant 1 : index
    %64 = memref.load %arg4[%c1_50] : memref<8xf32, #tpu.memory_space<smem>>
    %65 = vector.broadcast %64 : f32 to vector<2x2x128xf32>
    %66 = arith.addf %63, %65 : vector<2x2x128xf32>
    %c1_51 = arith.constant 1 : index
    %c1_52 = arith.constant 1 : index
    %67 = memref.load %arg3[%c1_51, %c1_52] : memref<4x8xf32, #tpu.memory_space<smem>>
    %68 = vector.broadcast %67 : f32 to vector<2x2x128xf32>
    %69 = arith.mulf %68, %3 : vector<2x2x128xf32>
    %70 = arith.addf %66, %69 : vector<2x2x128xf32>
    %c2_53 = arith.constant 2 : index
    %c1_54 = arith.constant 1 : index
    %71 = memref.load %arg3[%c2_53, %c1_54] : memref<4x8xf32, #tpu.memory_space<smem>>
    %72 = vector.broadcast %71 : f32 to vector<2x2x128xf32>
    %73 = arith.mulf %72, %5 : vector<2x2x128xf32>
    %74 = arith.addf %70, %73 : vector<2x2x128xf32>
    %c3_55 = arith.constant 3 : index
    %c1_56 = arith.constant 1 : index
    %75 = memref.load %arg3[%c3_55, %c1_56] : memref<4x8xf32, #tpu.memory_space<smem>>
    %76 = vector.broadcast %75 : f32 to vector<2x2x128xf32>
    %77 = arith.mulf %76, %7 : vector<2x2x128xf32>
    %78 = arith.addf %74, %77 : vector<2x2x128xf32>
    %c0_57 = arith.constant 0 : index
    %c1_58 = arith.constant 1 : index
    %79 = memref.load %arg5[%c0_57, %c1_58] : memref<4x8xf32, #tpu.memory_space<smem>>
    %80 = vector.broadcast %79 : f32 to vector<2x2x128xf32>
    %81 = arith.mulf %80, %9 : vector<2x2x128xf32>
    %c1_59 = arith.constant 1 : index
    %82 = memref.load %arg6[%c1_59] : memref<8xf32, #tpu.memory_space<smem>>
    %83 = vector.broadcast %82 : f32 to vector<2x2x128xf32>
    %84 = arith.addf %81, %83 : vector<2x2x128xf32>
    %c1_60 = arith.constant 1 : index
    %c1_61 = arith.constant 1 : index
    %85 = memref.load %arg5[%c1_60, %c1_61] : memref<4x8xf32, #tpu.memory_space<smem>>
    %86 = vector.broadcast %85 : f32 to vector<2x2x128xf32>
    %87 = arith.mulf %86, %11 : vector<2x2x128xf32>
    %88 = arith.addf %84, %87 : vector<2x2x128xf32>
    %c2_62 = arith.constant 2 : index
    %c1_63 = arith.constant 1 : index
    %89 = memref.load %arg5[%c2_62, %c1_63] : memref<4x8xf32, #tpu.memory_space<smem>>
    %90 = vector.broadcast %89 : f32 to vector<2x2x128xf32>
    %91 = arith.mulf %90, %13 : vector<2x2x128xf32>
    %92 = arith.addf %88, %91 : vector<2x2x128xf32>
    %c3_64 = arith.constant 3 : index
    %c1_65 = arith.constant 1 : index
    %93 = memref.load %arg5[%c3_64, %c1_65] : memref<4x8xf32, #tpu.memory_space<smem>>
    %94 = vector.broadcast %93 : f32 to vector<2x2x128xf32>
    %95 = arith.mulf %94, %15 : vector<2x2x128xf32>
    %96 = arith.addf %92, %95 : vector<2x2x128xf32>
    %97 = arith.addf %78, %96 : vector<2x2x128xf32>
    %cst_66 = arith.constant 0.000000e+00 : f32
    %98 = vector.broadcast %cst_66 : f32 to vector<2x2x128xf32>
    %99 = arith.maximumf %97, %98 : vector<2x2x128xf32>
    %c1_67 = arith.constant 1 : index
    %100 = memref.load %arg7[%c1_67] : memref<8xf32, #tpu.memory_space<smem>>
    %101 = vector.broadcast %100 : f32 to vector<2x2x128xf32>
    %102 = arith.mulf %101, %99 : vector<2x2x128xf32>
    %103 = arith.addf %60, %102 : vector<2x2x128xf32>
    %c0_68 = arith.constant 0 : index
    %c2_69 = arith.constant 2 : index
    %104 = memref.load %arg3[%c0_68, %c2_69] : memref<4x8xf32, #tpu.memory_space<smem>>
    %105 = vector.broadcast %104 : f32 to vector<2x2x128xf32>
    %106 = arith.mulf %105, %1 : vector<2x2x128xf32>
    %c2_70 = arith.constant 2 : index
    %107 = memref.load %arg4[%c2_70] : memref<8xf32, #tpu.memory_space<smem>>
    %108 = vector.broadcast %107 : f32 to vector<2x2x128xf32>
    %109 = arith.addf %106, %108 : vector<2x2x128xf32>
    %c1_71 = arith.constant 1 : index
    %c2_72 = arith.constant 2 : index
    %110 = memref.load %arg3[%c1_71, %c2_72] : memref<4x8xf32, #tpu.memory_space<smem>>
    %111 = vector.broadcast %110 : f32 to vector<2x2x128xf32>
    %112 = arith.mulf %111, %3 : vector<2x2x128xf32>
    %113 = arith.addf %109, %112 : vector<2x2x128xf32>
    %c2_73 = arith.constant 2 : index
    %c2_74 = arith.constant 2 : index
    %114 = memref.load %arg3[%c2_73, %c2_74] : memref<4x8xf32, #tpu.memory_space<smem>>
    %115 = vector.broadcast %114 : f32 to vector<2x2x128xf32>
    %116 = arith.mulf %115, %5 : vector<2x2x128xf32>
    %117 = arith.addf %113, %116 : vector<2x2x128xf32>
    %c3_75 = arith.constant 3 : index
    %c2_76 = arith.constant 2 : index
    %118 = memref.load %arg3[%c3_75, %c2_76] : memref<4x8xf32, #tpu.memory_space<smem>>
    %119 = vector.broadcast %118 : f32 to vector<2x2x128xf32>
    %120 = arith.mulf %119, %7 : vector<2x2x128xf32>
    %121 = arith.addf %117, %120 : vector<2x2x128xf32>
    %c0_77 = arith.constant 0 : index
    %c2_78 = arith.constant 2 : index
    %122 = memref.load %arg5[%c0_77, %c2_78] : memref<4x8xf32, #tpu.memory_space<smem>>
    %123 = vector.broadcast %122 : f32 to vector<2x2x128xf32>
    %124 = arith.mulf %123, %9 : vector<2x2x128xf32>
    %c2_79 = arith.constant 2 : index
    %125 = memref.load %arg6[%c2_79] : memref<8xf32, #tpu.memory_space<smem>>
    %126 = vector.broadcast %125 : f32 to vector<2x2x128xf32>
    %127 = arith.addf %124, %126 : vector<2x2x128xf32>
    %c1_80 = arith.constant 1 : index
    %c2_81 = arith.constant 2 : index
    %128 = memref.load %arg5[%c1_80, %c2_81] : memref<4x8xf32, #tpu.memory_space<smem>>
    %129 = vector.broadcast %128 : f32 to vector<2x2x128xf32>
    %130 = arith.mulf %129, %11 : vector<2x2x128xf32>
    %131 = arith.addf %127, %130 : vector<2x2x128xf32>
    %c2_82 = arith.constant 2 : index
    %c2_83 = arith.constant 2 : index
    %132 = memref.load %arg5[%c2_82, %c2_83] : memref<4x8xf32, #tpu.memory_space<smem>>
    %133 = vector.broadcast %132 : f32 to vector<2x2x128xf32>
    %134 = arith.mulf %133, %13 : vector<2x2x128xf32>
    %135 = arith.addf %131, %134 : vector<2x2x128xf32>
    %c3_84 = arith.constant 3 : index
    %c2_85 = arith.constant 2 : index
    %136 = memref.load %arg5[%c3_84, %c2_85] : memref<4x8xf32, #tpu.memory_space<smem>>
    %137 = vector.broadcast %136 : f32 to vector<2x2x128xf32>
    %138 = arith.mulf %137, %15 : vector<2x2x128xf32>
    %139 = arith.addf %135, %138 : vector<2x2x128xf32>
    %140 = arith.addf %121, %139 : vector<2x2x128xf32>
    %cst_86 = arith.constant 0.000000e+00 : f32
    %141 = vector.broadcast %cst_86 : f32 to vector<2x2x128xf32>
    %142 = arith.maximumf %140, %141 : vector<2x2x128xf32>
    %c2_87 = arith.constant 2 : index
    %143 = memref.load %arg7[%c2_87] : memref<8xf32, #tpu.memory_space<smem>>
    %144 = vector.broadcast %143 : f32 to vector<2x2x128xf32>
    %145 = arith.mulf %144, %142 : vector<2x2x128xf32>
    %146 = arith.addf %103, %145 : vector<2x2x128xf32>
    %c0_88 = arith.constant 0 : index
    %c3_89 = arith.constant 3 : index
    %147 = memref.load %arg3[%c0_88, %c3_89] : memref<4x8xf32, #tpu.memory_space<smem>>
    %148 = vector.broadcast %147 : f32 to vector<2x2x128xf32>
    %149 = arith.mulf %148, %1 : vector<2x2x128xf32>
    %c3_90 = arith.constant 3 : index
    %150 = memref.load %arg4[%c3_90] : memref<8xf32, #tpu.memory_space<smem>>
    %151 = vector.broadcast %150 : f32 to vector<2x2x128xf32>
    %152 = arith.addf %149, %151 : vector<2x2x128xf32>
    %c1_91 = arith.constant 1 : index
    %c3_92 = arith.constant 3 : index
    %153 = memref.load %arg3[%c1_91, %c3_92] : memref<4x8xf32, #tpu.memory_space<smem>>
    %154 = vector.broadcast %153 : f32 to vector<2x2x128xf32>
    %155 = arith.mulf %154, %3 : vector<2x2x128xf32>
    %156 = arith.addf %152, %155 : vector<2x2x128xf32>
    %c2_93 = arith.constant 2 : index
    %c3_94 = arith.constant 3 : index
    %157 = memref.load %arg3[%c2_93, %c3_94] : memref<4x8xf32, #tpu.memory_space<smem>>
    %158 = vector.broadcast %157 : f32 to vector<2x2x128xf32>
    %159 = arith.mulf %158, %5 : vector<2x2x128xf32>
    %160 = arith.addf %156, %159 : vector<2x2x128xf32>
    %c3_95 = arith.constant 3 : index
    %c3_96 = arith.constant 3 : index
    %161 = memref.load %arg3[%c3_95, %c3_96] : memref<4x8xf32, #tpu.memory_space<smem>>
    %162 = vector.broadcast %161 : f32 to vector<2x2x128xf32>
    %163 = arith.mulf %162, %7 : vector<2x2x128xf32>
    %164 = arith.addf %160, %163 : vector<2x2x128xf32>
    %c0_97 = arith.constant 0 : index
    %c3_98 = arith.constant 3 : index
    %165 = memref.load %arg5[%c0_97, %c3_98] : memref<4x8xf32, #tpu.memory_space<smem>>
    %166 = vector.broadcast %165 : f32 to vector<2x2x128xf32>
    %167 = arith.mulf %166, %9 : vector<2x2x128xf32>
    %c3_99 = arith.constant 3 : index
    %168 = memref.load %arg6[%c3_99] : memref<8xf32, #tpu.memory_space<smem>>
    %169 = vector.broadcast %168 : f32 to vector<2x2x128xf32>
    %170 = arith.addf %167, %169 : vector<2x2x128xf32>
    %c1_100 = arith.constant 1 : index
    %c3_101 = arith.constant 3 : index
    %171 = memref.load %arg5[%c1_100, %c3_101] : memref<4x8xf32, #tpu.memory_space<smem>>
    %172 = vector.broadcast %171 : f32 to vector<2x2x128xf32>
    %173 = arith.mulf %172, %11 : vector<2x2x128xf32>
    %174 = arith.addf %170, %173 : vector<2x2x128xf32>
    %c2_102 = arith.constant 2 : index
    %c3_103 = arith.constant 3 : index
    %175 = memref.load %arg5[%c2_102, %c3_103] : memref<4x8xf32, #tpu.memory_space<smem>>
    %176 = vector.broadcast %175 : f32 to vector<2x2x128xf32>
    %177 = arith.mulf %176, %13 : vector<2x2x128xf32>
    %178 = arith.addf %174, %177 : vector<2x2x128xf32>
    %c3_104 = arith.constant 3 : index
    %c3_105 = arith.constant 3 : index
    %179 = memref.load %arg5[%c3_104, %c3_105] : memref<4x8xf32, #tpu.memory_space<smem>>
    %180 = vector.broadcast %179 : f32 to vector<2x2x128xf32>
    %181 = arith.mulf %180, %15 : vector<2x2x128xf32>
    %182 = arith.addf %178, %181 : vector<2x2x128xf32>
    %183 = arith.addf %164, %182 : vector<2x2x128xf32>
    %cst_106 = arith.constant 0.000000e+00 : f32
    %184 = vector.broadcast %cst_106 : f32 to vector<2x2x128xf32>
    %185 = arith.maximumf %183, %184 : vector<2x2x128xf32>
    %c3_107 = arith.constant 3 : index
    %186 = memref.load %arg7[%c3_107] : memref<8xf32, #tpu.memory_space<smem>>
    %187 = vector.broadcast %186 : f32 to vector<2x2x128xf32>
    %188 = arith.mulf %187, %185 : vector<2x2x128xf32>
    %189 = arith.addf %146, %188 : vector<2x2x128xf32>
    %c0_108 = arith.constant 0 : index
    %c4 = arith.constant 4 : index
    %190 = memref.load %arg3[%c0_108, %c4] : memref<4x8xf32, #tpu.memory_space<smem>>
    %191 = vector.broadcast %190 : f32 to vector<2x2x128xf32>
    %192 = arith.mulf %191, %1 : vector<2x2x128xf32>
    %c4_109 = arith.constant 4 : index
    %193 = memref.load %arg4[%c4_109] : memref<8xf32, #tpu.memory_space<smem>>
    %194 = vector.broadcast %193 : f32 to vector<2x2x128xf32>
    %195 = arith.addf %192, %194 : vector<2x2x128xf32>
    %c1_110 = arith.constant 1 : index
    %c4_111 = arith.constant 4 : index
    %196 = memref.load %arg3[%c1_110, %c4_111] : memref<4x8xf32, #tpu.memory_space<smem>>
    %197 = vector.broadcast %196 : f32 to vector<2x2x128xf32>
    %198 = arith.mulf %197, %3 : vector<2x2x128xf32>
    %199 = arith.addf %195, %198 : vector<2x2x128xf32>
    %c2_112 = arith.constant 2 : index
    %c4_113 = arith.constant 4 : index
    %200 = memref.load %arg3[%c2_112, %c4_113] : memref<4x8xf32, #tpu.memory_space<smem>>
    %201 = vector.broadcast %200 : f32 to vector<2x2x128xf32>
    %202 = arith.mulf %201, %5 : vector<2x2x128xf32>
    %203 = arith.addf %199, %202 : vector<2x2x128xf32>
    %c3_114 = arith.constant 3 : index
    %c4_115 = arith.constant 4 : index
    %204 = memref.load %arg3[%c3_114, %c4_115] : memref<4x8xf32, #tpu.memory_space<smem>>
    %205 = vector.broadcast %204 : f32 to vector<2x2x128xf32>
    %206 = arith.mulf %205, %7 : vector<2x2x128xf32>
    %207 = arith.addf %203, %206 : vector<2x2x128xf32>
    %c0_116 = arith.constant 0 : index
    %c4_117 = arith.constant 4 : index
    %208 = memref.load %arg5[%c0_116, %c4_117] : memref<4x8xf32, #tpu.memory_space<smem>>
    %209 = vector.broadcast %208 : f32 to vector<2x2x128xf32>
    %210 = arith.mulf %209, %9 : vector<2x2x128xf32>
    %c4_118 = arith.constant 4 : index
    %211 = memref.load %arg6[%c4_118] : memref<8xf32, #tpu.memory_space<smem>>
    %212 = vector.broadcast %211 : f32 to vector<2x2x128xf32>
    %213 = arith.addf %210, %212 : vector<2x2x128xf32>
    %c1_119 = arith.constant 1 : index
    %c4_120 = arith.constant 4 : index
    %214 = memref.load %arg5[%c1_119, %c4_120] : memref<4x8xf32, #tpu.memory_space<smem>>
    %215 = vector.broadcast %214 : f32 to vector<2x2x128xf32>
    %216 = arith.mulf %215, %11 : vector<2x2x128xf32>
    %217 = arith.addf %213, %216 : vector<2x2x128xf32>
    %c2_121 = arith.constant 2 : index
    %c4_122 = arith.constant 4 : index
    %218 = memref.load %arg5[%c2_121, %c4_122] : memref<4x8xf32, #tpu.memory_space<smem>>
    %219 = vector.broadcast %218 : f32 to vector<2x2x128xf32>
    %220 = arith.mulf %219, %13 : vector<2x2x128xf32>
    %221 = arith.addf %217, %220 : vector<2x2x128xf32>
    %c3_123 = arith.constant 3 : index
    %c4_124 = arith.constant 4 : index
    %222 = memref.load %arg5[%c3_123, %c4_124] : memref<4x8xf32, #tpu.memory_space<smem>>
    %223 = vector.broadcast %222 : f32 to vector<2x2x128xf32>
    %224 = arith.mulf %223, %15 : vector<2x2x128xf32>
    %225 = arith.addf %221, %224 : vector<2x2x128xf32>
    %226 = arith.addf %207, %225 : vector<2x2x128xf32>
    %cst_125 = arith.constant 0.000000e+00 : f32
    %227 = vector.broadcast %cst_125 : f32 to vector<2x2x128xf32>
    %228 = arith.maximumf %226, %227 : vector<2x2x128xf32>
    %c4_126 = arith.constant 4 : index
    %229 = memref.load %arg7[%c4_126] : memref<8xf32, #tpu.memory_space<smem>>
    %230 = vector.broadcast %229 : f32 to vector<2x2x128xf32>
    %231 = arith.mulf %230, %228 : vector<2x2x128xf32>
    %232 = arith.addf %189, %231 : vector<2x2x128xf32>
    %c0_127 = arith.constant 0 : index
    %c5 = arith.constant 5 : index
    %233 = memref.load %arg3[%c0_127, %c5] : memref<4x8xf32, #tpu.memory_space<smem>>
    %234 = vector.broadcast %233 : f32 to vector<2x2x128xf32>
    %235 = arith.mulf %234, %1 : vector<2x2x128xf32>
    %c5_128 = arith.constant 5 : index
    %236 = memref.load %arg4[%c5_128] : memref<8xf32, #tpu.memory_space<smem>>
    %237 = vector.broadcast %236 : f32 to vector<2x2x128xf32>
    %238 = arith.addf %235, %237 : vector<2x2x128xf32>
    %c1_129 = arith.constant 1 : index
    %c5_130 = arith.constant 5 : index
    %239 = memref.load %arg3[%c1_129, %c5_130] : memref<4x8xf32, #tpu.memory_space<smem>>
    %240 = vector.broadcast %239 : f32 to vector<2x2x128xf32>
    %241 = arith.mulf %240, %3 : vector<2x2x128xf32>
    %242 = arith.addf %238, %241 : vector<2x2x128xf32>
    %c2_131 = arith.constant 2 : index
    %c5_132 = arith.constant 5 : index
    %243 = memref.load %arg3[%c2_131, %c5_132] : memref<4x8xf32, #tpu.memory_space<smem>>
    %244 = vector.broadcast %243 : f32 to vector<2x2x128xf32>
    %245 = arith.mulf %244, %5 : vector<2x2x128xf32>
    %246 = arith.addf %242, %245 : vector<2x2x128xf32>
    %c3_133 = arith.constant 3 : index
    %c5_134 = arith.constant 5 : index
    %247 = memref.load %arg3[%c3_133, %c5_134] : memref<4x8xf32, #tpu.memory_space<smem>>
    %248 = vector.broadcast %247 : f32 to vector<2x2x128xf32>
    %249 = arith.mulf %248, %7 : vector<2x2x128xf32>
    %250 = arith.addf %246, %249 : vector<2x2x128xf32>
    %c0_135 = arith.constant 0 : index
    %c5_136 = arith.constant 5 : index
    %251 = memref.load %arg5[%c0_135, %c5_136] : memref<4x8xf32, #tpu.memory_space<smem>>
    %252 = vector.broadcast %251 : f32 to vector<2x2x128xf32>
    %253 = arith.mulf %252, %9 : vector<2x2x128xf32>
    %c5_137 = arith.constant 5 : index
    %254 = memref.load %arg6[%c5_137] : memref<8xf32, #tpu.memory_space<smem>>
    %255 = vector.broadcast %254 : f32 to vector<2x2x128xf32>
    %256 = arith.addf %253, %255 : vector<2x2x128xf32>
    %c1_138 = arith.constant 1 : index
    %c5_139 = arith.constant 5 : index
    %257 = memref.load %arg5[%c1_138, %c5_139] : memref<4x8xf32, #tpu.memory_space<smem>>
    %258 = vector.broadcast %257 : f32 to vector<2x2x128xf32>
    %259 = arith.mulf %258, %11 : vector<2x2x128xf32>
    %260 = arith.addf %256, %259 : vector<2x2x128xf32>
    %c2_140 = arith.constant 2 : index
    %c5_141 = arith.constant 5 : index
    %261 = memref.load %arg5[%c2_140, %c5_141] : memref<4x8xf32, #tpu.memory_space<smem>>
    %262 = vector.broadcast %261 : f32 to vector<2x2x128xf32>
    %263 = arith.mulf %262, %13 : vector<2x2x128xf32>
    %264 = arith.addf %260, %263 : vector<2x2x128xf32>
    %c3_142 = arith.constant 3 : index
    %c5_143 = arith.constant 5 : index
    %265 = memref.load %arg5[%c3_142, %c5_143] : memref<4x8xf32, #tpu.memory_space<smem>>
    %266 = vector.broadcast %265 : f32 to vector<2x2x128xf32>
    %267 = arith.mulf %266, %15 : vector<2x2x128xf32>
    %268 = arith.addf %264, %267 : vector<2x2x128xf32>
    %269 = arith.addf %250, %268 : vector<2x2x128xf32>
    %cst_144 = arith.constant 0.000000e+00 : f32
    %270 = vector.broadcast %cst_144 : f32 to vector<2x2x128xf32>
    %271 = arith.maximumf %269, %270 : vector<2x2x128xf32>
    %c5_145 = arith.constant 5 : index
    %272 = memref.load %arg7[%c5_145] : memref<8xf32, #tpu.memory_space<smem>>
    %273 = vector.broadcast %272 : f32 to vector<2x2x128xf32>
    %274 = arith.mulf %273, %271 : vector<2x2x128xf32>
    %275 = arith.addf %232, %274 : vector<2x2x128xf32>
    %c0_146 = arith.constant 0 : index
    %c6 = arith.constant 6 : index
    %276 = memref.load %arg3[%c0_146, %c6] : memref<4x8xf32, #tpu.memory_space<smem>>
    %277 = vector.broadcast %276 : f32 to vector<2x2x128xf32>
    %278 = arith.mulf %277, %1 : vector<2x2x128xf32>
    %c6_147 = arith.constant 6 : index
    %279 = memref.load %arg4[%c6_147] : memref<8xf32, #tpu.memory_space<smem>>
    %280 = vector.broadcast %279 : f32 to vector<2x2x128xf32>
    %281 = arith.addf %278, %280 : vector<2x2x128xf32>
    %c1_148 = arith.constant 1 : index
    %c6_149 = arith.constant 6 : index
    %282 = memref.load %arg3[%c1_148, %c6_149] : memref<4x8xf32, #tpu.memory_space<smem>>
    %283 = vector.broadcast %282 : f32 to vector<2x2x128xf32>
    %284 = arith.mulf %283, %3 : vector<2x2x128xf32>
    %285 = arith.addf %281, %284 : vector<2x2x128xf32>
    %c2_150 = arith.constant 2 : index
    %c6_151 = arith.constant 6 : index
    %286 = memref.load %arg3[%c2_150, %c6_151] : memref<4x8xf32, #tpu.memory_space<smem>>
    %287 = vector.broadcast %286 : f32 to vector<2x2x128xf32>
    %288 = arith.mulf %287, %5 : vector<2x2x128xf32>
    %289 = arith.addf %285, %288 : vector<2x2x128xf32>
    %c3_152 = arith.constant 3 : index
    %c6_153 = arith.constant 6 : index
    %290 = memref.load %arg3[%c3_152, %c6_153] : memref<4x8xf32, #tpu.memory_space<smem>>
    %291 = vector.broadcast %290 : f32 to vector<2x2x128xf32>
    %292 = arith.mulf %291, %7 : vector<2x2x128xf32>
    %293 = arith.addf %289, %292 : vector<2x2x128xf32>
    %c0_154 = arith.constant 0 : index
    %c6_155 = arith.constant 6 : index
    %294 = memref.load %arg5[%c0_154, %c6_155] : memref<4x8xf32, #tpu.memory_space<smem>>
    %295 = vector.broadcast %294 : f32 to vector<2x2x128xf32>
    %296 = arith.mulf %295, %9 : vector<2x2x128xf32>
    %c6_156 = arith.constant 6 : index
    %297 = memref.load %arg6[%c6_156] : memref<8xf32, #tpu.memory_space<smem>>
    %298 = vector.broadcast %297 : f32 to vector<2x2x128xf32>
    %299 = arith.addf %296, %298 : vector<2x2x128xf32>
    %c1_157 = arith.constant 1 : index
    %c6_158 = arith.constant 6 : index
    %300 = memref.load %arg5[%c1_157, %c6_158] : memref<4x8xf32, #tpu.memory_space<smem>>
    %301 = vector.broadcast %300 : f32 to vector<2x2x128xf32>
    %302 = arith.mulf %301, %11 : vector<2x2x128xf32>
    %303 = arith.addf %299, %302 : vector<2x2x128xf32>
    %c2_159 = arith.constant 2 : index
    %c6_160 = arith.constant 6 : index
    %304 = memref.load %arg5[%c2_159, %c6_160] : memref<4x8xf32, #tpu.memory_space<smem>>
    %305 = vector.broadcast %304 : f32 to vector<2x2x128xf32>
    %306 = arith.mulf %305, %13 : vector<2x2x128xf32>
    %307 = arith.addf %303, %306 : vector<2x2x128xf32>
    %c3_161 = arith.constant 3 : index
    %c6_162 = arith.constant 6 : index
    %308 = memref.load %arg5[%c3_161, %c6_162] : memref<4x8xf32, #tpu.memory_space<smem>>
    %309 = vector.broadcast %308 : f32 to vector<2x2x128xf32>
    %310 = arith.mulf %309, %15 : vector<2x2x128xf32>
    %311 = arith.addf %307, %310 : vector<2x2x128xf32>
    %312 = arith.addf %293, %311 : vector<2x2x128xf32>
    %cst_163 = arith.constant 0.000000e+00 : f32
    %313 = vector.broadcast %cst_163 : f32 to vector<2x2x128xf32>
    %314 = arith.maximumf %312, %313 : vector<2x2x128xf32>
    %c6_164 = arith.constant 6 : index
    %315 = memref.load %arg7[%c6_164] : memref<8xf32, #tpu.memory_space<smem>>
    %316 = vector.broadcast %315 : f32 to vector<2x2x128xf32>
    %317 = arith.mulf %316, %314 : vector<2x2x128xf32>
    %318 = arith.addf %275, %317 : vector<2x2x128xf32>
    %c0_165 = arith.constant 0 : index
    %c7 = arith.constant 7 : index
    %319 = memref.load %arg3[%c0_165, %c7] : memref<4x8xf32, #tpu.memory_space<smem>>
    %320 = vector.broadcast %319 : f32 to vector<2x2x128xf32>
    %321 = arith.mulf %320, %1 : vector<2x2x128xf32>
    %c7_166 = arith.constant 7 : index
    %322 = memref.load %arg4[%c7_166] : memref<8xf32, #tpu.memory_space<smem>>
    %323 = vector.broadcast %322 : f32 to vector<2x2x128xf32>
    %324 = arith.addf %321, %323 : vector<2x2x128xf32>
    %c1_167 = arith.constant 1 : index
    %c7_168 = arith.constant 7 : index
    %325 = memref.load %arg3[%c1_167, %c7_168] : memref<4x8xf32, #tpu.memory_space<smem>>
    %326 = vector.broadcast %325 : f32 to vector<2x2x128xf32>
    %327 = arith.mulf %326, %3 : vector<2x2x128xf32>
    %328 = arith.addf %324, %327 : vector<2x2x128xf32>
    %c2_169 = arith.constant 2 : index
    %c7_170 = arith.constant 7 : index
    %329 = memref.load %arg3[%c2_169, %c7_170] : memref<4x8xf32, #tpu.memory_space<smem>>
    %330 = vector.broadcast %329 : f32 to vector<2x2x128xf32>
    %331 = arith.mulf %330, %5 : vector<2x2x128xf32>
    %332 = arith.addf %328, %331 : vector<2x2x128xf32>
    %c3_171 = arith.constant 3 : index
    %c7_172 = arith.constant 7 : index
    %333 = memref.load %arg3[%c3_171, %c7_172] : memref<4x8xf32, #tpu.memory_space<smem>>
    %334 = vector.broadcast %333 : f32 to vector<2x2x128xf32>
    %335 = arith.mulf %334, %7 : vector<2x2x128xf32>
    %336 = arith.addf %332, %335 : vector<2x2x128xf32>
    %c0_173 = arith.constant 0 : index
    %c7_174 = arith.constant 7 : index
    %337 = memref.load %arg5[%c0_173, %c7_174] : memref<4x8xf32, #tpu.memory_space<smem>>
    %338 = vector.broadcast %337 : f32 to vector<2x2x128xf32>
    %339 = arith.mulf %338, %9 : vector<2x2x128xf32>
    %c7_175 = arith.constant 7 : index
    %340 = memref.load %arg6[%c7_175] : memref<8xf32, #tpu.memory_space<smem>>
    %341 = vector.broadcast %340 : f32 to vector<2x2x128xf32>
    %342 = arith.addf %339, %341 : vector<2x2x128xf32>
    %c1_176 = arith.constant 1 : index
    %c7_177 = arith.constant 7 : index
    %343 = memref.load %arg5[%c1_176, %c7_177] : memref<4x8xf32, #tpu.memory_space<smem>>
    %344 = vector.broadcast %343 : f32 to vector<2x2x128xf32>
    %345 = arith.mulf %344, %11 : vector<2x2x128xf32>
    %346 = arith.addf %342, %345 : vector<2x2x128xf32>
    %c2_178 = arith.constant 2 : index
    %c7_179 = arith.constant 7 : index
    %347 = memref.load %arg5[%c2_178, %c7_179] : memref<4x8xf32, #tpu.memory_space<smem>>
    %348 = vector.broadcast %347 : f32 to vector<2x2x128xf32>
    %349 = arith.mulf %348, %13 : vector<2x2x128xf32>
    %350 = arith.addf %346, %349 : vector<2x2x128xf32>
    %c3_180 = arith.constant 3 : index
    %c7_181 = arith.constant 7 : index
    %351 = memref.load %arg5[%c3_180, %c7_181] : memref<4x8xf32, #tpu.memory_space<smem>>
    %352 = vector.broadcast %351 : f32 to vector<2x2x128xf32>
    %353 = arith.mulf %352, %15 : vector<2x2x128xf32>
    %354 = arith.addf %350, %353 : vector<2x2x128xf32>
    %355 = arith.addf %336, %354 : vector<2x2x128xf32>
    %cst_182 = arith.constant 0.000000e+00 : f32
    %356 = vector.broadcast %cst_182 : f32 to vector<2x2x128xf32>
    %357 = arith.maximumf %355, %356 : vector<2x2x128xf32>
    %c7_183 = arith.constant 7 : index
    %358 = memref.load %arg7[%c7_183] : memref<8xf32, #tpu.memory_space<smem>>
    %359 = vector.broadcast %358 : f32 to vector<2x2x128xf32>
    %360 = arith.mulf %359, %357 : vector<2x2x128xf32>
    %361 = arith.addf %318, %360 : vector<2x2x128xf32>
    %c0_184 = arith.constant 0 : index
    %c0_185 = arith.constant 0 : index
    %c0_186 = arith.constant 0 : index
    %362 = vector.load %arg9[%c0_184, %c0_185, %c0_186] : memref<2x2x128xf32, #tpu.memory_space<vmem>>, vector<2x2x128xf32>
    tpu.vector_store %arg9[%c0_184, %c0_185, %c0_186], %361 {strides = array<i32>} : memref<2x2x128xf32, #tpu.memory_space<vmem>>, vector<2x2x128xf32>,
    return
  }
  func.func @transform_0(%arg0: i32) -> (i32, i32, i32, i32) {
    %c0_i32 = arith.constant 0 : i32
    %c0_i32_0 = arith.constant 0 : i32
    %c0_i32_1 = arith.constant 0 : i32
    %c0_i32_2 = arith.constant 0 : i32
    return %c0_i32, %c0_i32_0, %arg0, %c0_i32_1 : i32, i32, i32, i32
  }
  func.func @transform_1(%arg0: i32) -> (i32, i32, i32, i32) {
    %c0_i32 = arith.constant 0 : i32
    %c0_i32_0 = arith.constant 0 : i32
    %c0_i32_1 = arith.constant 0 : i32
    %c0_i32_2 = arith.constant 0 : i32
    return %c0_i32, %c0_i32_0, %arg0, %c0_i32_1 : i32, i32, i32, i32
  }
  func.func @transform_2(%arg0: i32) -> (i32, i32) {
    %c0_i32 = arith.constant 0 : i32
    %c0_i32_0 = arith.constant 0 : i32
    %c0_i32_1 = arith.constant 0 : i32
    return %c0_i32, %c0_i32_0 : i32, i32
  }
  func.func @transform_3(%arg0: i32) -> i32 {
    %c0_i32 = arith.constant 0 : i32
    %c0_i32_0 = arith.constant 0 : i32
    return %c0_i32 : i32
  }
  func.func @transform_4(%arg0: i32) -> (i32, i32) {
    %c0_i32 = arith.constant 0 : i32
    %c0_i32_0 = arith.constant 0 : i32
    %c0_i32_1 = arith.constant 0 : i32
    return %c0_i32, %c0_i32_0 : i32, i32
  }
  func.func @transform_5(%arg0: i32) -> i32 {
    %c0_i32 = arith.constant 0 : i32
    %c0_i32_0 = arith.constant 0 : i32
    return %c0_i32 : i32
  }
  func.func @transform_6(%arg0: i32) -> i32 {
    %c0_i32 = arith.constant 0 : i32
    %c0_i32_0 = arith.constant 0 : i32
    return %c0_i32 : i32
  }
  func.func @transform_7(%arg0: i32) -> i32 {
    %c0_i32 = arith.constant 0 : i32
    %c0_i32_0 = arith.constant 0 : i32
    return %c0_i32 : i32
  }
  func.func @transform_8(%arg0: i32) -> (i32, i32, i32) {
    %c0_i32 = arith.constant 0 : i32
    %c0_i32_0 = arith.constant 0 : i32
    %c0_i32_1 = arith.constant 0 : i32
    return %c0_i32, %arg0, %c0_i32_0 : i32, i32, i32
  }
}

</mosaic_0001>

<bundles_post_ra>
// kernel: attention_block.5
= control target key start
LH: loop header
LB: loop body
LE: loop exit
PB: predicated region body
PF: predicated region fallthrough
CT: control target
= control target key end

     0   :  { %s200_s1 = inlined_call_operand.vmem [shape: f32[2,2,128], index: 1, kind: input, shape index: {}]   ;;  %s201_s2 = inlined_call_operand.<no memory space> [shape: f32[1], index: 2, kind: input, shape index: {}]   ;;  %s202_s3 = inlined_call_operand.<no memory space> [shape: f32[1], index: 3, kind: input, shape index: {}]   ;;  %s203_s0 = inlined_call_operand.vmem [shape: f32[2,4,2,128], index: 0, kind: input, shape index: {}]   ;;  %s204_s4 = inlined_call_operand.vmem [shape: f32[2,4,2,128], index: 4, kind: output, shape index: {}]  }
   0x1   :  { %v20_v0 = vld [vmem:[%s200_s1] sm:$0x3]  ;;  %v22_v1 = vstv %s201_s2  ;;  %v26_v2 = vstv %s202_s3  ;;  %v21_v3 = vld [vmem:[%s200_s1 + $0x2] sm:$0x3] }
   0x2   :  { %v23_v4 = vmul.f32 %v22_v1, %v20_v0  ;;  %v24_v5 = vmul.f32 %v22_v1, %v21_v3  ;;  %v67_v31 = vld [vmem:[%s203_s0] sm:$0x3]  ;;  %v68_v33 = vld [vmem:[%s203_s0 + $0x2] sm:$0x3]  ;;  %v69_v34 = vld [vmem:[%s203_s0 + $0x4] sm:$0x3] }
   0x3   :  { %v70_v38 = vld [vmem:[%s203_s0 + $0x6] sm:$0x3]  ;;  %v71_v41 = vld [vmem:[%s203_s0 + $0x8] sm:$0x3]  ;;  %v72_v45 = vld [vmem:[%s203_s0 + $0xa] sm:$0x3] }
   0x4   :  { %v27_v6 = vadd.f32 %v26_v2, %v23_v4  ;;  %v28_v7 = vadd.f32 %v26_v2, %v24_v5  ;;  %v73_v48 = vld [vmem:[%s203_s0 + $0xc] sm:$0x3]  ;;  %v74_v50 = vld [vmem:[%s203_s0 + $0xe] sm:$0x3] }
   0x6   :  { %v29_v8 = vsub.f32 0.0, %v27_v6  ;;  %v30_v9 = vsub.f32 0.0, %v28_v7 }
   0x8   :  { %v31_v10 = vmul.f32 1.442695, %v29_v8  ;;  %v33_v11 = vmul.f32 1.442695, %v30_v9 }
   0xa   :  { %95 = vpow2.f32 %v31_v10 }
   0xb   :  { %97 = vpow2.f32 %v33_v11 }
  0x10   :  { %v96_v12 = vpop.eup %95 }
  0x11   :  { %v98_v13 = vpop.eup %97  ;;  %v35_v14 = vadd.f32 1.0, %v96_v12 }
  0x12   :  { %v36_v15 = vadd.f32 1.0, %v98_v13 }
  0x13   :  { %99 = vrcp.f32 %v35_v14  ;;  %v48_v19 = vand.u32 2147483648, %v35_v14  ;;  %vm42_vm0 = vweird.f32 %v35_v14  ;;  %v46_v22 = vand.u32 2147483647, %v35_v14 }
  0x14   :  { %101 = vrcp.f32 %v36_v15  ;;  %vm57_vm2 = vweird.f32 %v36_v15  ;;  %v63_v24 = vand.u32 2147483648, %v36_v15  ;;  %v61_v26 = vand.u32 2147483647, %v36_v15 }
  0x15   :  { %v49_v28 = vor.u32 1.1754944e-38, %v48_v19  ;;  %vm47_vm5 = vcmp.eq.f32.partialorder %v46_v22, 8.507059e+37 }
  0x16   :  { %v64_v36 = vor.u32 1.1754944e-38, %v63_v24  ;;  %vm62_vm7 = vcmp.eq.f32.partialorder %v61_v26, 8.507059e+37 }
  0x19   :  { %v100_v16 = vpop.eup %99 }
  0x1a   :  { %v102_v17 = vpop.eup %101  ;;  %v38_v18 = vmul.f32 %v100_v16, %v35_v14  ;;  %vm43_vm1 = vweird.f32 %v100_v16 }
  0x1b   :  { %v53_v20 = vmul.f32 %v102_v17, %v36_v15  ;;  %vm58_vm3 = vweird.f32 %v102_v17  ;;  %vm140_vm4 = vmor %vm42_vm0, %vm43_vm1 }
  0x1c   :  { %v39_v21 = vsub.f32 1.0, %v38_v18  ;;  %vm147_vm6 = vmor %vm57_vm2, %vm58_vm3 }
  0x1d   :  { %v54_v23 = vsub.f32 1.0, %v53_v20 }
  0x1e   :  { %v40_v25 = vmul.f32 %v100_v16, %v39_v21 }
  0x1f   :  { %v55_v29 = vmul.f32 %v102_v17, %v54_v23 }
  0x20   :  { %v41_v30 = vadd.f32 %v100_v16, %v40_v25 }
  0x21   :  { %v56_v35 = vadd.f32 %v102_v17, %v55_v29 }
  0x22   :  { %v45_v37 = vsel %vm140_vm4, %v100_v16, %v41_v30 }
  0x23   :  { %v50_v39 = vsel %vm47_vm5, %v49_v28, %v45_v37  ;;  %v60_v40 = vsel %vm147_vm6, %v102_v17, %v56_v35 }
  0x24   :  { %v75_v42 = vmul.f32 %v67_v31, %v50_v39  ;;  %v76_v43 = vmul.f32 %v68_v33, %v50_v39  ;;  %v77_v44 = vmul.f32 %v69_v34, %v50_v39  ;;  %v78_v46 = vmul.f32 %v70_v38, %v50_v39 }
  0x25   :  { %v65_v47 = vsel %vm62_vm7, %v64_v36, %v60_v40 }
  0x26   :  { %83 = vst [vmem:[%s204_s4] sm:$0x3] %v75_v42  ;;  %v79_v49 = vmul.f32 %v71_v41, %v65_v47  ;;  %v80_v51 = vmul.f32 %v72_v45, %v65_v47  ;;  %v81_v52 = vmul.f32 %v73_v48, %v65_v47  ;;  %v82_v53 = vmul.f32 %v74_v50, %v65_v47 }
  0x27   :  { %84 = vst [vmem:[%s204_s4 + $0x2] sm:$0x3] %v76_v43 }
  0x28   :  { %85 = vst [vmem:[%s204_s4 + $0x4] sm:$0x3] %v77_v44 }
  0x29   :  { %86 = vst [vmem:[%s204_s4 + $0x6] sm:$0x3] %v78_v46 }
  0x2a   :  { %87 = vst [vmem:[%s204_s4 + $0x8] sm:$0x3] %v79_v49 }
  0x2b   :  { %88 = vst [vmem:[%s204_s4 + $0xa] sm:$0x3] %v80_v51 }
  0x2c   :  { %89 = vst [vmem:[%s204_s4 + $0xc] sm:$0x3] %v81_v52 }
  0x2d   :  { %90 = vst [vmem:[%s204_s4 + $0xe] sm:$0x3] %v82_v53 }

// kernel: attention_block.4
= control target key start
LH: loop header
LB: loop body
LE: loop exit
PB: predicated region body
PF: predicated region fallthrough
CT: control target
= control target key end

     0   :  { %14 = vsyncpa [#allocation4], 0  ;;  %s1346_s0 = inlined_call_operand.vmem [shape: f32[2,4,2,128], index: 0, kind: input, shape index: {}]   ;;  %s1347_s1 = inlined_call_operand.vmem [shape: f32[2,4,2,128], index: 1, kind: input, shape index: {}]   ;;  %s1348_s2 = inlined_call_operand.vmem [shape: f32[4,8], index: 2, kind: input, shape index: {}]   ;;  %s1349_s3 = inlined_call_operand.vmem [shape: f32[8], index: 3, kind: input, shape index: {}]   ;;  %s1350_s4 = inlined_call_operand.vmem [shape: f32[4,8], index: 4, kind: input, shape index: {}]   ;;  %s1351_s5 = inlined_call_operand.vmem [shape: f32[8], index: 5, kind: input, shape index: {}]   ;;  %s1352_s6 = inlined_call_operand.vmem [shape: f32[8], index: 6, kind: input, shape index: {}]   ;;  %s1353_s7 = inlined_call_operand.<no memory space> [shape: f32[1], index: 7, kind: input, shape index: {}]   ;;  %s1354_s8 = inlined_call_operand.vmem [shape: f32[2,2,128], index: 8, kind: output, shape index: {}]  }
   0x1   :  { %15 = vsyncpa [#allocation6], 0  ;;  %s35_s29 = sshll.u32 %s1349_s3, 4  ;;  %s36_s29 = int_to_ptr.vmem [resolvable:$true] %s35_s29 }
   0x2   :  { %16 = vsyncpa [#allocation9], 0  ;;  %s53_s10 = sshll.u32 %s1351_s5, 4  ;;  %s784_s11 = smov [#allocation5]   ;;  %s54_s10 = int_to_ptr.vmem [resolvable:$true] %s53_s10 }
   0x3   :  { %38 = dma.vmem_to_smem %s36_s29, 16, %s784_s11, [#allocation6]  }
   0x4   :  { %s785_s12 = smov [#allocation8]   ;;  %s26_s15 = sshll.u32 %s1348_s2, 4  ;;  %s27_s15 = int_to_ptr.vmem [resolvable:$true] %s26_s15 }
   0x5   :  { %56 = dma.vmem_to_smem %s54_s10, 16, %s785_s12, [#allocation9]  }
   0x6   :  { %s44_s3 = sshll.u32 %s1350_s4, 4  ;;  %s786_s18 = smov [#allocation3]   ;;  %s45_s3 = int_to_ptr.vmem [resolvable:$true] %s44_s3 }
   0x7   :  { %29 = dma.vmem_to_smem %s27_s15, 64, %s786_s18, [#allocation4]  }
   0x8   :  { %s787_s19 = smov [#allocation7]   ;;  %s62_s21 = sshll.u32 %s1352_s6, 4  ;;  %s63_s21 = int_to_ptr.vmem [resolvable:$true] %s62_s21 }
   0x9   :  { %47 = dma.vmem_to_smem %s45_s3, 64, %s787_s19, [#allocation6]  }
   0xa   :  { %s788_s22 = smov [#allocation10]  }
   0xb   :  { %65 = dma.vmem_to_smem %s63_s21, 16, %s788_s22, [#allocation9]  }
   0xc   :  { %778 = dma.done.wait [#allocation4], 64  }
   0xd   :  { %779 = vsyncadd [#allocation4], 4294967232 }
   0xe   :  { %780 = dma.done.wait [#allocation6], 80  }
   0xf   :  { %781 = vsyncadd [#allocation6], 4294967216 }
  0x10   :  { %782 = dma.done.wait [#allocation9], 32  }
  0x11   :  { %783 = vsyncadd [#allocation9], 4294967264 }
  0x12   :  { %88 = sfence }
  0x13   :  { %s111_s2 = sld [smem:[#allocation3]]  ;;  %v854_v0 = vld [vmem:[%s1346_s0] sm:$0x3]  ;;  %v859_v1 = vld [vmem:[%s1346_s0 + $0x8] sm:$0x3] }
  0x14   :  { %s115_s4 = sld [smem:[#allocation5]]  ;;  %v868_v2 = vld [vmem:[%s1346_s0 + $0x2] sm:$0x3]  ;;  %v873_v3 = vld [vmem:[%s1346_s0 + $0xa] sm:$0x3] }
  0x15   :  { %s630_s23 = sld [smem:[#allocation3 + $0x80]]  ;;  %v884_v8 = vld [vmem:[%s1346_s0 + $0x4] sm:$0x3]  ;;  %v891_v10 = vld [vmem:[%s1346_s0 + $0xc] sm:$0x3] }
  0x16   :  { %s849_s24 = sld [smem:[#allocation3 + $0x100]]  ;;  %v896_v11 = vld [vmem:[%s1346_s0 + $0x6] sm:$0x3]  ;;  %v905_v16 = vld [vmem:[%s1347_s1] sm:$0x3] }
  0x17   :  { %s861_s28 = sld [smem:[#allocation3 + $0x180]]  ;;  %v910_v17 = vld [vmem:[%s1347_s1 + $0x8] sm:$0x3]  ;;  %v919_v20 = vld [vmem:[%s1346_s0 + $0xe] sm:$0x3] }
  0x18   :  { %s863_s29 = sld [smem:[#allocation7]]  ;;  %v927_v23 = vld [vmem:[%s1347_s1 + $0x2] sm:$0x3]  ;;  %v932_v24 = vld [vmem:[%s1347_s1 + $0xa] sm:$0x3] }
  0x19   :  { %v112_v4 = vstv %s111_s2  ;;  %s875_s12 = sld [smem:[#allocation8]]  ;;  %v942_v29 = vld [vmem:[%s1347_s1 + $0x4] sm:$0x3]  ;;  %v947_v30 = vld [vmem:[%s1347_s1 + $0xc] sm:$0x3] }
  0x1a   :  { %v113_v5 = vmul.f32 %v112_v4, %v854_v0  ;;  %v114_v6 = vmul.f32 %v112_v4, %v859_v1  ;;  %v116_v7 = vstv %s115_s4  ;;  %s879_s13 = sld [smem:[#allocation7 + $0x80]]  ;;  %v961_v37 = vld [vmem:[%s1347_s1 + $0x6] sm:$0x3]  ;;  %v966_v38 = vld [vmem:[%s1347_s1 + $0xe] sm:$0x3] }
  0x1b   :  { %v120_v9 = vstv %s630_s23  ;;  %s886_s16 = sld [smem:[#allocation7 + $0x100]] }
  0x1c   :  { %v117_v12 = vadd.f32 %v116_v7, %v113_v5  ;;  %v118_v13 = vadd.f32 %v116_v7, %v114_v6  ;;  %v121_v14 = vmul.f32 %v868_v2, %v120_v9  ;;  %v122_v15 = vmul.f32 %v873_v3, %v120_v9  ;;  %s900_s5 = sld [smem:[#allocation7 + $0x180]] }
  0x1d   :  { %v126_v18 = vstv %s849_s24  ;;  %v132_v19 = vstv %s861_s28  ;;  %s914_s4 = sld [smem:[#allocation10]] }
  0x1e   :  { %v123_v21 = vadd.f32 %v121_v14, %v117_v12  ;;  %v127_v22 = vmul.f32 %v884_v8, %v126_v18  ;;  %s922_s26 = sld [smem:[#allocation3 + $0x1]]  ;;  %v124_v25 = vadd.f32 %v122_v15, %v118_v13  ;;  %v128_v26 = vmul.f32 %v891_v10, %v126_v18 }
  0x1f   :  { %v138_v27 = vstv %s863_s29  ;;  %v142_v28 = vstv %s875_s12  ;;  %s937_s0 = sld [smem:[#allocation5 + $0x1]]  ;;  %v133_v32 = vmul.f32 %v896_v11, %v132_v19  ;;  %v134_v39 = vmul.f32 %v919_v20, %v132_v19 }
  0x20   :  { %v129_v31 = vadd.f32 %v127_v22, %v123_v21  ;;  %v139_v33 = vmul.f32 %v138_v27, %v905_v16  ;;  %v140_v34 = vmul.f32 %v138_v27, %v910_v17  ;;  %s952_s29 = sld [smem:[#allocation3 + $0x81]]  ;;  %v146_v35 = vstv %s879_s13 }
  0x21   :  { %v152_v36 = vstv %s886_s16  ;;  %s956_s12 = sld [smem:[#allocation3 + $0x101]]  ;;  %v147_v42 = vmul.f32 %v927_v23, %v146_v35  ;;  %v148_v43 = vmul.f32 %v932_v24, %v146_v35  ;;  %v130_v46 = vadd.f32 %v128_v26, %v124_v25 }
  0x22   :  { %v143_v40 = vadd.f32 %v142_v28, %v139_v33  ;;  %v144_v41 = vadd.f32 %v142_v28, %v140_v34  ;;  %s969_s13 = sld [smem:[#allocation3 + $0x181]]  ;;  %v153_v44 = vmul.f32 %v942_v29, %v152_v36  ;;  %v154_v45 = vmul.f32 %v947_v30, %v152_v36 }
  0x23   :  { %s975_s16 = sld [smem:[#allocation7 + $0x1]]  ;;  %v135_v47 = vadd.f32 %v133_v32, %v129_v31  ;;  %v158_v48 = vstv %s900_s5  ;;  %v136_v62 = vadd.f32 %v134_v39, %v130_v46  ;;  %v168_v33 = vstv %s914_s4 }
  0x24   :  { %v176_v49 = vstv %s922_s26  ;;  %s979_s1 = sld [smem:[#allocation8 + $0x1]]  ;;  %v149_v50 = vadd.f32 %v147_v42, %v143_v40  ;;  %v150_v51 = vadd.f32 %v148_v43, %v144_v41  ;;  %v159_v52 = vmul.f32 %v961_v37, %v158_v48 }
  0x25   :  { %v160_v53 = vmul.f32 %v966_v38, %v158_v48  ;;  %s983_s18 = sld [smem:[#allocation7 + $0x81]]  ;;  %v177_v54 = vmul.f32 %v176_v49, %v854_v0  ;;  %v178_v55 = vmul.f32 %v176_v49, %v859_v1  ;;  %v180_v56 = vstv %s937_s0 }
  0x26   :  { %v184_v57 = vstv %s952_s29  ;;  %s989_s19 = sld [smem:[#allocation7 + $0x101]]  ;;  %v155_v58 = vadd.f32 %v153_v44, %v149_v50  ;;  %v156_v59 = vadd.f32 %v154_v45, %v150_v51  ;;  %v172_v34 = vstv %s1353_s7 }
  0x27   :  { %v185_v60 = vmul.f32 %v868_v2, %v184_v57  ;;  %v186_v61 = vmul.f32 %v873_v3, %v184_v57  ;;  %v181_v63 = vadd.f32 %v180_v56, %v177_v54  ;;  %v182_v4 = vadd.f32 %v180_v56, %v178_v55  ;;  %s994_s5 = sld [smem:[#allocation7 + $0x181]] }
  0x28   :  { %v190_v5 = vstv %s956_s12  ;;  %v161_v6 = vadd.f32 %v159_v52, %v155_v58  ;;  %v162_v7 = vadd.f32 %v160_v53, %v156_v59  ;;  %v196_v12 = vstv %s969_s13  ;;  %s998_s20 = sld [smem:[#allocation3 + $0x2]] }
  0x29   :  { %v191_v9 = vmul.f32 %v884_v8, %v190_v5  ;;  %v187_v13 = vadd.f32 %v185_v60, %v181_v63  ;;  %s1000_s21 = sld [smem:[#allocation5 + $0x2]]  ;;  %v188_v14 = vadd.f32 %v186_v61, %v182_v4  ;;  %v192_v15 = vmul.f32 %v891_v10, %v190_v5 }
  0x2a   :  { %v202_v18 = vstv %s975_s16  ;;  %v206_v19 = vstv %s979_s1  ;;  %s1005_s22 = sld [smem:[#allocation3 + $0x82]]  ;;  %v163_v21 = vadd.f32 %v161_v6, %v135_v47  ;;  %v197_v22 = vmul.f32 %v896_v11, %v196_v12 }
  0x2b   :  { %v203_v25 = vmul.f32 %v202_v18, %v905_v16  ;;  %v204_v26 = vmul.f32 %v202_v18, %v910_v17  ;;  %s1010_s2 = sld [smem:[#allocation3 + $0x102]]  ;;  %v164_v27 = vadd.f32 %v162_v7, %v136_v62  ;;  %v193_v28 = vadd.f32 %v191_v9, %v187_v13 }
  0x2c   :  { %v210_v31 = vstv %s983_s18  ;;  %v216_v32 = vstv %s989_s19  ;;  %s1014_s23 = sld [smem:[#allocation3 + $0x182]]  ;;  %v194_v39 = vadd.f32 %v192_v15, %v188_v14  ;;  %v198_v40 = vmul.f32 %v919_v20, %v196_v12 }
  0x2d   :  { %v207_v35 = vadd.f32 %v206_v19, %v203_v25  ;;  %v208_v36 = vadd.f32 %v206_v19, %v204_v26  ;;  %s1020_s6 = sld [smem:[#allocation7 + $0x2]]  ;;  %v211_v41 = vmul.f32 %v927_v23, %v210_v31  ;;  %v212_v42 = vmul.f32 %v932_v24, %v210_v31 }
  0x2e   :  { %s1025_s27 = sld [smem:[#allocation10 + $0x1]]  ;;  %v165_v43 = vmax.f32 %v163_v21, 0.0  ;;  %v217_v44 = vmul.f32 %v942_v29, %v216_v32  ;;  %v218_v45 = vmul.f32 %v947_v30, %v216_v32  ;;  %v222_v46 = vstv %s994_s5 }
  0x2f   :  { %s1030_s4 = sld [smem:[#allocation8 + $0x2]]  ;;  %v166_v47 = vmax.f32 %v164_v27, 0.0  ;;  %v199_v48 = vadd.f32 %v197_v22, %v193_v28  ;;  %v213_v49 = vadd.f32 %v211_v41, %v207_v35  ;;  %v214_v50 = vadd.f32 %v212_v42, %v208_v36 }
  0x30   :  { %s1032_s24 = sld [smem:[#allocation7 + $0x82]]  ;;  %v223_v51 = vmul.f32 %v961_v37, %v222_v46  ;;  %v224_v52 = vmul.f32 %v966_v38, %v222_v46  ;;  %v238_v53 = vstv %s998_s20  ;;  %v242_v54 = vstv %s1000_s21 }
  0x31   :  { %v219_v55 = vadd.f32 %v217_v44, %v213_v49  ;;  %v220_v56 = vadd.f32 %v218_v45, %v214_v50  ;;  %v239_v57 = vmul.f32 %v238_v53, %v854_v0  ;;  %v240_v58 = vmul.f32 %v238_v53, %v859_v1  ;;  %s1040_s28 = sld [smem:[#allocation7 + $0x102]] }
  0x32   :  { %v169_v59 = vmul.f32 %v168_v33, %v165_v43  ;;  %v200_v60 = vadd.f32 %v198_v40, %v194_v39  ;;  %v246_v61 = vstv %s1005_s22  ;;  %v252_v62 = vstv %s1010_s2  ;;  %s1044_s0 = sld [smem:[#allocation7 + $0x182]] }
  0x33   :  { %v225_v63 = vadd.f32 %v223_v51, %v219_v55  ;;  %v243_v4 = vadd.f32 %v242_v54, %v239_v57  ;;  %v244_v5 = vadd.f32 %v242_v54, %v240_v58  ;;  %v264_v6 = vstv %s1020_s6  ;;  %s1047_s30 = sld [smem:[#allocation3 + $0x3]] }
  0x34   :  { %v247_v7 = vmul.f32 %v868_v2, %v246_v61  ;;  %v248_v9 = vmul.f32 %v873_v3, %v246_v61  ;;  %v253_v12 = vmul.f32 %v884_v8, %v252_v62  ;;  %v258_v13 = vstv %s1014_s23  ;;  %s1053_s9 = sld [smem:[#allocation5 + $0x3]] }
  0x35   :  { %v170_v14 = vmul.f32 %v168_v33, %v166_v47  ;;  %v226_v15 = vadd.f32 %v224_v52, %v220_v56  ;;  %v232_v18 = vstv %s1025_s27  ;;  %v254_v19 = vmul.f32 %v891_v10, %v252_v62  ;;  %s1057_s10 = sld [smem:[#allocation3 + $0x83]] }
  0x36   :  { %v249_v21 = vadd.f32 %v247_v7, %v243_v4  ;;  %v250_v22 = vadd.f32 %v248_v9, %v244_v5  ;;  %v265_v25 = vmul.f32 %v264_v6, %v905_v16  ;;  %v266_v26 = vmul.f32 %v264_v6, %v910_v17  ;;  %s1061_s11 = sld [smem:[#allocation3 + $0x103]] }
  0x37   :  { %v227_v27 = vadd.f32 %v225_v63, %v199_v48  ;;  %v259_v28 = vmul.f32 %v896_v11, %v258_v13  ;;  %v268_v31 = vstv %s1030_s4  ;;  %v272_v32 = vstv %s1032_s24  ;;  %s1066_s29 = sld [smem:[#allocation3 + $0x183]] }
  0x38   :  { %v1072_v33 = vadd.f32 %v172_v34, %v169_v59  ;;  %v255_v35 = vadd.f32 %v253_v12, %v249_v21  ;;  %v269_v36 = vadd.f32 %v268_v31, %v265_v25  ;;  %v270_v39 = vadd.f32 %v268_v31, %v266_v26  ;;  %s1074_s15 = sld [smem:[#allocation10 + $0x2]] }
  0x39   :  { %v256_v40 = vadd.f32 %v254_v19, %v250_v22  ;;  %v260_v41 = vmul.f32 %v919_v20, %v258_v13  ;;  %v273_v42 = vmul.f32 %v927_v23, %v272_v32  ;;  %v274_v43 = vmul.f32 %v932_v24, %v272_v32  ;;  %s1079_s17 = sld [smem:[#allocation7 + $0x3]] }
  0x3a   :  { %v1085_v44 = vadd.f32 %v172_v34, %v170_v14  ;;  %v228_v45 = vadd.f32 %v226_v15, %v200_v60  ;;  %v278_v46 = vstv %s1040_s28  ;;  %v284_v47 = vstv %s1044_s0  ;;  %s1089_s16 = sld [smem:[#allocation8 + $0x3]] }
  0x3b   :  { %v229_v48 = vmax.f32 %v227_v27, 0.0  ;;  %v261_v49 = vadd.f32 %v259_v28, %v255_v35  ;;  %v275_v50 = vadd.f32 %v273_v42, %v269_v36  ;;  %v276_v51 = vadd.f32 %v274_v43, %v270_v39  ;;  %s1091_s1 = sld [smem:[#allocation7 + $0x83]] }
  0x3c   :  { %v279_v52 = vmul.f32 %v942_v29, %v278_v46  ;;  %v280_v34 = vmul.f32 %v947_v30, %v278_v46  ;;  %v285_v53 = vmul.f32 %v961_v37, %v284_v47  ;;  %v286_v54 = vmul.f32 %v966_v38, %v284_v47  ;;  %s1097_s7 = sld [smem:[#allocation7 + $0x103]] }
  0x3d   :  { %v262_v55 = vadd.f32 %v260_v41, %v256_v40  ;;  %v300_v56 = vstv %s1047_s30  ;;  %v304_v57 = vstv %s1053_s9  ;;  %v308_v58 = vstv %s1057_s10  ;;  %s1108_s18 = sld [smem:[#allocation7 + $0x183]] }
  0x3e   :  { %v281_v59 = vadd.f32 %v279_v52, %v275_v50  ;;  %v282_v60 = vadd.f32 %v280_v34, %v276_v51  ;;  %v301_v61 = vmul.f32 %v300_v56, %v854_v0  ;;  %v302_v62 = vmul.f32 %v300_v56, %v859_v1  ;;  %s1110_s19 = sld [smem:[#allocation3 + $0x4]] }
  0x3f   :  { %v309_v63 = vmul.f32 %v868_v2, %v308_v58  ;;  %v310_v4 = vmul.f32 %v873_v3, %v308_v58  ;;  %v314_v5 = vstv %s1061_s11  ;;  %v320_v6 = vstv %s1066_s29  ;;  %s1116_s5 = sld [smem:[#allocation5 + $0x4]] }
  0x40   :  { %v287_v7 = vadd.f32 %v285_v53, %v281_v59  ;;  %v288_v9 = vadd.f32 %v286_v54, %v282_v60  ;;  %v305_v12 = vadd.f32 %v304_v57, %v301_v61  ;;  %v306_v13 = vadd.f32 %v304_v57, %v302_v62  ;;  %s1119_s20 = sld [smem:[#allocation3 + $0x84]] }
  0x41   :  { %v230_v14 = vmax.f32 %v228_v45, 0.0  ;;  %v233_v15 = vmul.f32 %v232_v18, %v229_v48  ;;  %v294_v19 = vstv %s1074_s15  ;;  %v315_v21 = vmul.f32 %v884_v8, %v314_v5  ;;  %s1126_s21 = sld [smem:[#allocation3 + $0x104]] }
  0x42   :  { %v289_v22 = vadd.f32 %v287_v7, %v261_v49  ;;  %v311_v25 = vadd.f32 %v309_v63, %v305_v12  ;;  %v312_v26 = vadd.f32 %v310_v4, %v306_v13  ;;  %v316_v27 = vmul.f32 %v891_v10, %v314_v5  ;;  %s1132_s22 = sld [smem:[#allocation7 + $0x4]] }
  0x43   :  { %v290_v28 = vadd.f32 %v288_v9, %v262_v55  ;;  %v321_v31 = vmul.f32 %v896_v11, %v320_v6  ;;  %v326_v32 = vstv %s1079_s17  ;;  %v334_v35 = vstv %s1091_s1  ;;  %s1138_s2 = sld [smem:[#allocation8 + $0x4]] }
  0x44   :  { %v291_v36 = vmax.f32 %v289_v22, 0.0  ;;  %v317_v39 = vadd.f32 %v315_v21, %v311_v25  ;;  %v330_v40 = vstv %s1089_s16  ;;  %v340_v41 = vstv %s1097_s7  ;;  %s1142_s23 = sld [smem:[#allocation7 + $0x84]] }
  0x45   :  { %v327_v42 = vmul.f32 %v326_v32, %v905_v16  ;;  %v328_v43 = vmul.f32 %v326_v32, %v910_v17  ;;  %v335_v45 = vmul.f32 %v927_v23, %v334_v35  ;;  %v336_v46 = vmul.f32 %v932_v24, %v334_v35  ;;  %s1145_s25 = sld [smem:[#allocation3 + $0x184]] }
  0x46   :  { %v234_v47 = vmul.f32 %v232_v18, %v230_v14  ;;  %v235_v48 = vadd.f32 %v233_v15, %v1072_v33  ;;  %v318_v49 = vadd.f32 %v316_v27, %v312_v26  ;;  %v322_v50 = vmul.f32 %v919_v20, %v320_v6  ;;  %s1149_s26 = sld [smem:[#allocation10 + $0x3]] }
  0x47   :  { %v331_v51 = vadd.f32 %v330_v40, %v327_v42  ;;  %v332_v52 = vadd.f32 %v330_v40, %v328_v43  ;;  %v341_v34 = vmul.f32 %v942_v29, %v340_v41  ;;  %v342_v53 = vmul.f32 %v947_v30, %v340_v41  ;;  %s1156_s6 = sld [smem:[#allocation7 + $0x104]] }
  0x48   :  { %v292_v54 = vmax.f32 %v290_v28, 0.0  ;;  %v295_v18 = vmul.f32 %v294_v19, %v291_v36  ;;  %v323_v55 = vadd.f32 %v321_v31, %v317_v39  ;;  %v346_v33 = vstv %s1108_s18  ;;  %s1161_s27 = sld [smem:[#allocation7 + $0x184]] }
  0x49   :  { %v337_v56 = vadd.f32 %v335_v45, %v331_v51  ;;  %v338_v57 = vadd.f32 %v336_v46, %v332_v52  ;;  %v347_v58 = vmul.f32 %v961_v37, %v346_v33  ;;  %v348_v59 = vmul.f32 %v966_v38, %v346_v33  ;;  %s1165_s4 = sld [smem:[#allocation3 + $0x5]] }
  0x4a   :  { %v324_v60 = vadd.f32 %v322_v50, %v318_v49  ;;  %v362_v61 = vstv %s1110_s19  ;;  %v366_v62 = vstv %s1116_s5  ;;  %v370_v63 = vstv %s1119_s20  ;;  %s1169_s24 = sld [smem:[#allocation5 + $0x5]] }
  0x4b   :  { %v343_v4 = vadd.f32 %v341_v34, %v337_v56  ;;  %v344_v5 = vadd.f32 %v342_v53, %v338_v57  ;;  %v363_v6 = vmul.f32 %v362_v61, %v854_v0  ;;  %v364_v7 = vmul.f32 %v362_v61, %v859_v1  ;;  %s1175_s28 = sld [smem:[#allocation3 + $0x85]] }
  0x4c   :  { %v371_v9 = vmul.f32 %v868_v2, %v370_v63  ;;  %v372_v12 = vmul.f32 %v873_v3, %v370_v63  ;;  %v376_v13 = vstv %s1126_s21  ;;  %v236_v25 = vadd.f32 %v234_v47, %v1085_v44  ;;  %s1178_s0 = sld [smem:[#allocation3 + $0x105]] }
  0x4d   :  { %v349_v14 = vadd.f32 %v347_v58, %v343_v4  ;;  %v350_v15 = vadd.f32 %v348_v59, %v344_v5  ;;  %v367_v21 = vadd.f32 %v366_v62, %v363_v6  ;;  %v368_v22 = vadd.f32 %v366_v62, %v364_v7  ;;  %s1182_s30 = sld [smem:[#allocation3 + $0x185]] }
  0x4e   :  { %v296_v26 = vmul.f32 %v294_v19, %v292_v54  ;;  %v297_v27 = vadd.f32 %v295_v18, %v235_v48  ;;  %v388_v28 = vstv %s1132_s22  ;;  %v392_v35 = vstv %s1138_s2  ;;  %s1187_s9 = sld [smem:[#allocation7 + $0x5]] }
  0x4f   :  { %v351_v31 = vadd.f32 %v349_v14, %v323_v55  ;;  %v352_v32 = vadd.f32 %v350_v15, %v324_v60  ;;  %v396_v36 = vstv %s1142_s23  ;;  %v377_v39 = vmul.f32 %v884_v8, %v376_v13  ;;  %s1191_s10 = sld [smem:[#allocation8 + $0x5]] }
  0x50   :  { %v382_v40 = vstv %s1145_s25  ;;  %v389_v41 = vmul.f32 %v388_v28, %v905_v16  ;;  %v390_v42 = vmul.f32 %v388_v28, %v910_v17  ;;  %v373_v19 = vadd.f32 %v371_v9, %v367_v21  ;;  %s1195_s11 = sld [smem:[#allocation7 + $0x85]] }
  0x51   :  { %v353_v44 = vmax.f32 %v351_v31, 0.0  ;;  %v374_v43 = vadd.f32 %v372_v12, %v368_v22  ;;  %v378_v45 = vmul.f32 %v891_v10, %v376_v13  ;;  %v397_v48 = vmul.f32 %v927_v23, %v396_v36  ;;  %s1200_s29 = sld [smem:[#allocation7 + $0x105]] }
  0x52   :  { %v393_v46 = vadd.f32 %v392_v35, %v389_v41  ;;  %v394_v47 = vadd.f32 %v392_v35, %v390_v42  ;;  %v398_v49 = vmul.f32 %v932_v24, %v396_v36  ;;  %v354_v50 = vmax.f32 %v352_v32, 0.0  ;;  %s1202_s12 = sld [smem:[#allocation10 + $0x4]] }
  0x53   :  { %v356_v51 = vstv %s1149_s26  ;;  %v383_v52 = vmul.f32 %v896_v11, %v382_v40  ;;  %v384_v34 = vmul.f32 %v919_v20, %v382_v40  ;;  %v402_v18 = vstv %s1156_s6  ;;  %s1209_s14 = sld [smem:[#allocation7 + $0x185]] }
  0x54   :  { %v399_v53 = vadd.f32 %v397_v48, %v393_v46  ;;  %v400_v54 = vadd.f32 %v398_v49, %v394_v47  ;;  %v408_v55 = vstv %s1161_s27  ;;  %v379_v33 = vadd.f32 %v377_v39, %v373_v19  ;;  %s1213_s15 = sld [smem:[#allocation3 + $0x6]] }
  0x55   :  { %v380_v56 = vadd.f32 %v378_v45, %v374_v43  ;;  %v403_v57 = vmul.f32 %v942_v29, %v402_v18  ;;  %v404_v58 = vmul.f32 %v947_v30, %v402_v18  ;;  %v357_v59 = vmul.f32 %v356_v51, %v353_v44  ;;  %s1217_s17 = sld [smem:[#allocation5 + $0x6]] }
  0x56   :  { %v409_v60 = vmul.f32 %v961_v37, %v408_v55  ;;  %v410_v61 = vmul.f32 %v966_v38, %v408_v55  ;;  %v424_v62 = vstv %s1165_s4  ;;  %v428_v7 = vstv %s1169_s24  ;;  %s1223_s3 = sld [smem:[#allocation3 + $0x86]] }
  0x57   :  { %v405_v63 = vadd.f32 %v403_v57, %v399_v53  ;;  %v406_v4 = vadd.f32 %v404_v58, %v400_v54  ;;  %v425_v5 = vmul.f32 %v424_v62, %v854_v0  ;;  %v426_v6 = vmul.f32 %v424_v62, %v859_v1  ;;  %s1227_s13 = sld [smem:[#allocation3 + $0x106]] }
  0x58   :  { %v432_v9 = vstv %s1175_s28  ;;  %v385_v12 = vadd.f32 %v383_v52, %v379_v33  ;;  %v438_v15 = vstv %s1178_s0  ;;  %v298_v21 = vadd.f32 %v296_v26, %v236_v25  ;;  %s1232_s16 = sld [smem:[#allocation7 + $0x6]] }
  0x59   :  { %v411_v13 = vadd.f32 %v409_v60, %v405_v63  ;;  %v429_v14 = vadd.f32 %v428_v7, %v425_v5  ;;  %v430_v22 = vadd.f32 %v428_v7, %v426_v6  ;;  %v433_v28 = vmul.f32 %v868_v2, %v432_v9  ;;  %s1239_s1 = sld [smem:[#allocation3 + $0x186]] }
  0x5a   :  { %v434_v31 = vmul.f32 %v873_v3, %v432_v9  ;;  %v358_v32 = vmul.f32 %v356_v51, %v354_v50  ;;  %v1215_v35 = vadd.f32 %v357_v59, %v297_v27  ;;  %v386_v36 = vadd.f32 %v384_v34, %v380_v56  ;;  %s1243_s7 = sld [smem:[#allocation8 + $0x6]] }
  0x5b   :  { %v412_v39 = vadd.f32 %v410_v61, %v406_v4  ;;  %v439_v40 = vmul.f32 %v884_v8, %v438_v15  ;;  %v444_v25 = vstv %s1182_s30  ;;  %v450_v26 = vstv %s1187_s9  ;;  %s1246_s18 = sld [smem:[#allocation7 + $0x86]] }
  0x5c   :  { %v454_v41 = vstv %s1191_s10  ;;  %v413_v42 = vadd.f32 %v411_v13, %v385_v12  ;;  %v435_v44 = vadd.f32 %v433_v28, %v429_v14  ;;  %v451_v19 = vmul.f32 %v450_v26, %v905_v16  ;;  %s1250_s19 = sld [smem:[#allocation10 + $0x5]] }
  0x5d   :  { %v452_v27 = vmul.f32 %v450_v26, %v910_v17  ;;  %v436_v43 = vadd.f32 %v434_v31, %v430_v22  ;;  %v440_v45 = vmul.f32 %v891_v10, %v438_v15  ;;  %v458_v46 = vstv %s1195_s11  ;;  %s1256_s5 = sld [smem:[#allocation7 + $0x106]] }
  0x5e   :  { %v464_v47 = vstv %s1200_s29  ;;  %v414_v48 = vadd.f32 %v412_v39, %v386_v36  ;;  %v418_v49 = vstv %s1202_s12  ;;  %v455_v50 = vadd.f32 %v454_v41, %v451_v19  ;;  %s1262_s20 = sld [smem:[#allocation7 + $0x186]] }
  0x5f   :  { %v456_v51 = vadd.f32 %v454_v41, %v452_v27  ;;  %v445_v52 = vmul.f32 %v896_v11, %v444_v25  ;;  %v446_v34 = vmul.f32 %v919_v20, %v444_v25  ;;  %v459_v53 = vmul.f32 %v927_v23, %v458_v46  ;;  %s1265_s21 = sld [smem:[#allocation3 + $0x7]] }
  0x60   :  { %v460_v54 = vmul.f32 %v932_v24, %v458_v46  ;;  %v415_v18 = vmax.f32 %v413_v42, 0.0  ;;  %v441_v55 = vadd.f32 %v439_v40, %v435_v44  ;;  %v465_v33 = vmul.f32 %v942_v29, %v464_v47  ;;  %s1269_s22 = sld [smem:[#allocation5 + $0x7]] }
  0x61   :  { %v466_v56 = vmul.f32 %v947_v30, %v464_v47  ;;  %v442_v57 = vadd.f32 %v440_v45, %v436_v43  ;;  %v461_v58 = vadd.f32 %v459_v53, %v455_v50  ;;  %v470_v60 = vstv %s1209_s14  ;;  %s1273_s2 = sld [smem:[#allocation3 + $0x87]] }
  0x62   :  { %v462_v59 = vadd.f32 %v460_v54, %v456_v51  ;;  %v471_v61 = vmul.f32 %v961_v37, %v470_v60  ;;  %v472_v62 = vmul.f32 %v966_v38, %v470_v60  ;;  %v486_v63 = vstv %s1213_s15  ;;  %s1280_s23 = sld [smem:[#allocation3 + $0x107]] }
  0x63   :  { %v490_v4 = vstv %s1217_s17  ;;  %v467_v5 = vadd.f32 %v465_v33, %v461_v58  ;;  %v487_v7 = vmul.f32 %v486_v63, %v854_v0  ;;  %v488_v9 = vmul.f32 %v486_v63, %v859_v1  ;;  %s1283_s25 = sld [smem:[#allocation3 + $0x187]] }
  0x64   :  { %v468_v6 = vadd.f32 %v466_v56, %v462_v59  ;;  %v1258_v12 = vadd.f32 %v358_v32, %v298_v21  ;;  %v447_v13 = vadd.f32 %v445_v52, %v441_v55  ;;  %v494_v14 = vstv %s1223_s3  ;;  %s1288_s26 = sld [smem:[#allocation7 + $0x7]] }
  0x65   :  { %v500_v15 = vstv %s1227_s13  ;;  %v473_v22 = vadd.f32 %v471_v61, %v467_v5  ;;  %v491_v28 = vadd.f32 %v490_v4, %v487_v7  ;;  %v492_v31 = vadd.f32 %v490_v4, %v488_v9  ;;  %s1293_s6 = sld [smem:[#allocation8 + $0x7]] }
  0x66   :  { %v512_v36 = vstv %s1232_s16  ;;  %v416_v39 = vmax.f32 %v414_v48, 0.0  ;;  %v419_v40 = vmul.f32 %v418_v49, %v415_v18  ;;  %v495_v25 = vmul.f32 %v868_v2, %v494_v14  ;;  %s1295_s27 = sld [smem:[#allocation7 + $0x87]] }
  0x67   :  { %v496_v21 = vmul.f32 %v873_v3, %v494_v14  ;;  %v448_v32 = vadd.f32 %v446_v34, %v442_v57  ;;  %v474_v26 = vadd.f32 %v472_v62, %v468_v6  ;;  %v501_v41 = vmul.f32 %v884_v8, %v500_v15  ;;  %s1301_s4 = sld [smem:[#allocation7 + $0x107]] }
  0x68   :  { %v506_v42 = vstv %s1239_s1  ;;  %v497_v44 = vadd.f32 %v495_v25, %v491_v28  ;;  %v502_v19 = vmul.f32 %v891_v10, %v500_v15  ;;  %v513_v27 = vmul.f32 %v512_v36, %v905_v16  ;;  %s1311_s24 = sld [smem:[#allocation7 + $0x187]] }
  0x69   :  { %v514_v43 = vmul.f32 %v512_v36, %v910_v17  ;;  %v475_v45 = vadd.f32 %v473_v22, %v447_v13  ;;  %v498_v46 = vadd.f32 %v496_v21, %v492_v31  ;;  %v516_v47 = vstv %s1243_s7  ;;  %s1315_s28 = sld [smem:[#allocation10 + $0x6]] }
  0x6a   :  { %v520_v48 = vstv %s1246_s18  ;;  %v420_v50 = vmul.f32 %v418_v49, %v416_v39  ;;  %v480_v51 = vstv %s1250_s19  ;;  %v517_v52 = vadd.f32 %v516_v47, %v513_v27  ;;  %s712_s0 = sld [smem:[#allocation10 + $0x7]] }
  0x6b   :  { %v518_v34 = vadd.f32 %v516_v47, %v514_v43  ;;  %v503_v53 = vadd.f32 %v501_v41, %v497_v44  ;;  %v507_v54 = vmul.f32 %v896_v11, %v506_v42  ;;  %v521_v18 = vmul.f32 %v927_v23, %v520_v48 }
  0x6c   :  { %v522_v55 = vmul.f32 %v932_v24, %v520_v48  ;;  %v476_v33 = vadd.f32 %v474_v26, %v448_v32  ;;  %v508_v56 = vmul.f32 %v919_v20, %v506_v42  ;;  %v526_v49 = vstv %s1256_s5 }
  0x6d   :  { %v532_v57 = vstv %s1262_s20  ;;  %v477_v58 = vmax.f32 %v475_v45, 0.0  ;;  %v504_v59 = vadd.f32 %v502_v19, %v498_v46  ;;  %v523_v60 = vadd.f32 %v521_v18, %v517_v52 }
  0x6e   :  { %v524_v61 = vadd.f32 %v522_v55, %v518_v34  ;;  %v527_v62 = vmul.f32 %v942_v29, %v526_v49  ;;  %v528_v63 = vmul.f32 %v947_v30, %v526_v49  ;;  %v533_v4 = vmul.f32 %v961_v37, %v532_v57 }
  0x6f   :  { %v534_v5 = vmul.f32 %v966_v38, %v532_v57  ;;  %v509_v6 = vadd.f32 %v507_v54, %v503_v53  ;;  %v548_v7 = vstv %s1265_s21  ;;  %v552_v9 = vstv %s1269_s22 }
  0x70   :  { %v556_v13 = vstv %s1273_s2  ;;  %v529_v14 = vadd.f32 %v527_v62, %v523_v60  ;;  %v530_v15 = vadd.f32 %v528_v63, %v524_v61  ;;  %v549_v22 = vmul.f32 %v548_v7, %v854_v0 }
  0x71   :  { %v550_v28 = vmul.f32 %v548_v7, %v859_v1  ;;  %v510_v31 = vadd.f32 %v508_v56, %v504_v59  ;;  %v557_v36 = vmul.f32 %v868_v2, %v556_v13  ;;  %v558_v39 = vmul.f32 %v873_v3, %v556_v13 }
  0x72   :  { %v562_v25 = vstv %s1280_s23  ;;  %v535_v21 = vadd.f32 %v533_v4, %v529_v14  ;;  %v536_v32 = vadd.f32 %v534_v5, %v530_v15  ;;  %v553_v26 = vadd.f32 %v552_v9, %v549_v22 }
  0x73   :  { %v554_v41 = vadd.f32 %v552_v9, %v550_v28  ;;  %v421_v0 = vadd.f32 %v419_v40, %v1215_v35  ;;  %v422_v1 = vadd.f32 %v420_v50, %v1258_v12  ;;  %v478_v2 = vmax.f32 %v476_v33, 0.0 }
  0x74   :  { %v559_v3 = vadd.f32 %v557_v36, %v553_v26  ;;  %v563_v44 = vmul.f32 %v884_v8, %v562_v25  ;;  %v564_v19 = vmul.f32 %v891_v10, %v562_v25  ;;  %v481_v27 = vmul.f32 %v480_v51, %v477_v58 }
  0x75   :  { %v560_v42 = vadd.f32 %v558_v39, %v554_v41  ;;  %v568_v43 = vstv %s1283_s25  ;;  %v574_v45 = vstv %s1288_s26  ;;  %v582_v46 = vstv %s1295_s27 }
  0x76   :  { %v537_v47 = vadd.f32 %v535_v21, %v509_v6  ;;  %v538_v48 = vadd.f32 %v536_v32, %v510_v31  ;;  %v578_v35 = vstv %s1293_s6  ;;  %v588_v40 = vstv %s1301_s4 }
  0x77   :  { %v575_v12 = vmul.f32 %v574_v45, %v905_v16  ;;  %v576_v50 = vmul.f32 %v574_v45, %v910_v17  ;;  %v583_v52 = vmul.f32 %v927_v23, %v582_v46  ;;  %v584_v8 = vmul.f32 %v932_v24, %v582_v46 }
  0x78   :  { %v565_v10 = vadd.f32 %v563_v44, %v559_v3  ;;  %v566_v34 = vadd.f32 %v564_v19, %v560_v42  ;;  %v569_v53 = vmul.f32 %v896_v11, %v568_v43  ;;  %v570_v54 = vmul.f32 %v919_v20, %v568_v43 }
  0x79   :  { %v579_v18 = vadd.f32 %v578_v35, %v575_v12  ;;  %v580_v55 = vadd.f32 %v578_v35, %v576_v50  ;;  %v589_v33 = vmul.f32 %v942_v29, %v588_v40  ;;  %v590_v56 = vmul.f32 %v947_v30, %v588_v40 }
  0x7a   :  { %v482_v16 = vmul.f32 %v480_v51, %v478_v2  ;;  %v539_v17 = vmax.f32 %v537_v47, 0.0  ;;  %v540_v49 = vmax.f32 %v538_v48, 0.0  ;;  %v594_v23 = vstv %s1311_s24 }
  0x7b   :  { %v585_v24 = vadd.f32 %v583_v52, %v579_v18  ;;  %v586_v57 = vadd.f32 %v584_v8, %v580_v55  ;;  %v595_v58 = vmul.f32 %v961_v37, %v594_v23  ;;  %v596_v11 = vmul.f32 %v966_v38, %v594_v23 }
  0x7c   :  { %v542_v59 = vstv %s1315_s28  ;;  %v571_v20 = vadd.f32 %v569_v53, %v565_v10  ;;  %v572_v60 = vadd.f32 %v570_v54, %v566_v34  ;;  %v483_v29 = vadd.f32 %v481_v27, %v421_v0 }
  0x7d   :  { %v591_v61 = vadd.f32 %v589_v33, %v585_v24  ;;  %v592_v62 = vadd.f32 %v590_v56, %v586_v57  ;;  %v484_v63 = vadd.f32 %v482_v16, %v422_v1  ;;  %v543_v30 = vmul.f32 %v542_v59, %v539_v17 }
  0x7e   :  { %v544_v4 = vmul.f32 %v542_v59, %v540_v49  ;;  %v604_v9 = vstv %s712_s0 }
  0x7f   :  { %v597_v51 = vadd.f32 %v595_v58, %v591_v61  ;;  %v598_v5 = vadd.f32 %v596_v11, %v592_v62  ;;  %v545_v13 = vadd.f32 %v543_v30, %v483_v29 }
  0x80   :  { %v546_v14 = vadd.f32 %v544_v4, %v484_v63 }
  0x81   :  { %v599_v6 = vadd.f32 %v597_v51, %v571_v20  ;;  %v600_v7 = vadd.f32 %v598_v5, %v572_v60 }
  0x83   :  { %v601_v15 = vmax.f32 %v599_v6, 0.0  ;;  %v602_v37 = vmax.f32 %v600_v7, 0.0 }
  0x85   :  { %v605_v22 = vmul.f32 %v604_v9, %v601_v15  ;;  %v606_v38 = vmul.f32 %v604_v9, %v602_v37 }
  0x87   :  { %v607_v28 = vadd.f32 %v605_v22, %v545_v13  ;;  %v608_v31 = vadd.f32 %v606_v38, %v546_v14 }
  0x89   :  { %609 = vst [vmem:[%s1354_s8] sm:$0x3] %v607_v28 }
  0x8a   :  { %610 = vst [vmem:[%s1354_s8 + $0x2] sm:$0x3] %v608_v31 }
  0x8b   :  { %615 = vsyncpa [#allocation4], 1 }
  0x8c   :  { %616 = vsyncpa [#allocation6], 1 }
  0x8d   :  { %617 = vsyncpa [#allocation9], 1 }

// kernel: attention_block.3
= control target key start
LH: loop header
LB: loop body
LE: loop exit
PB: predicated region body
PF: predicated region fallthrough
CT: control target
= control target key end

     0   :  { %11 = vsyncpa [#allocation3], 0  ;;  %s1973_s0 = inlined_call_operand.vmem [shape: f32[2,4,2,128], index: 0, kind: input, shape index: {}]   ;;  %s1974_s1 = inlined_call_operand.vmem [shape: f32[2,4,2,128], index: 1, kind: input, shape index: {}]   ;;  %s1975_s2 = inlined_call_operand.vmem [shape: f32[4,8], index: 2, kind: input, shape index: {}]   ;;  %s1976_s3 = inlined_call_operand.vmem [shape: f32[8], index: 3, kind: input, shape index: {}]   ;;  %s1977_s4 = inlined_call_operand.vmem [shape: f32[4,8], index: 4, kind: input, shape index: {}]   ;;  %s1978_s5 = inlined_call_operand.vmem [shape: f32[8], index: 5, kind: input, shape index: {}]   ;;  %s1979_s6 = inlined_call_operand.vmem [shape: f32[4,8,2,128], index: 6, kind: output, shape index: {}]  }
   0x1   :  { %12 = vsyncpa [#allocation5], 0  ;;  %s32_s23 = sshll.u32 %s1976_s3, 4  ;;  %s33_s23 = int_to_ptr.vmem [resolvable:$true] %s32_s23 }
   0x2   :  { %13 = vsyncpa [#allocation8], 0  ;;  %s23_s26 = sshll.u32 %s1975_s2, 4  ;;  %s1033_s27 = smov [#allocation4]   ;;  %s24_s26 = int_to_ptr.vmem [resolvable:$true] %s23_s26 }
   0x3   :  { %35 = dma.vmem_to_smem %s33_s23, 16, %s1033_s27, [#allocation5]  }
   0x4   :  { %s1034_s28 = smov [#allocation2]   ;;  %s41_s7 = sshll.u32 %s1977_s4, 4  ;;  %s42_s7 = int_to_ptr.vmem [resolvable:$true] %s41_s7 }
   0x5   :  { %26 = dma.vmem_to_smem %s24_s26, 64, %s1034_s28, [#allocation3]  }
   0x6   :  { %s50_s3 = sshll.u32 %s1978_s5, 4  ;;  %s1035_s10 = smov [#allocation6]   ;;  %s51_s3 = int_to_ptr.vmem [resolvable:$true] %s50_s3 }
   0x7   :  { %44 = dma.vmem_to_smem %s42_s7, 64, %s1035_s10, [#allocation5]  }
   0x8   :  { %s1036_s11 = smov [#allocation7]  }
   0x9   :  { %53 = dma.vmem_to_smem %s51_s3, 16, %s1036_s11, [#allocation8]  }
   0xa   :  { %1027 = dma.done.wait [#allocation3], 64  }
   0xb   :  { %1028 = vsyncadd [#allocation3], 4294967232 }
   0xc   :  { %1029 = dma.done.wait [#allocation5], 80  }
   0xd   :  { %1030 = vsyncadd [#allocation5], 4294967216 }
   0xe   :  { %1031 = dma.done.wait [#allocation8], 16  }
   0xf   :  { %1032 = vsyncadd [#allocation8], 4294967280 }
  0x10   :  { %70 = sfence }
  0x11   :  { %v1037_v0 = vmov 0.0   ;;  %s129_s17 = sld [smem:[#allocation2]]  ;;  %v1116_v1 = vld [vmem:[%s1973_s0] sm:$0x3]  ;;  %v1127_v2 = vld [vmem:[%s1973_s0 + $0x8] sm:$0x3] }
  0x12   :  { %75 = vst [vmem:[%s1979_s6] sm:$0x3] %v1037_v0  ;;  %s133_s20 = sld [smem:[#allocation4]]  ;;  %v1138_v3 = vld [vmem:[%s1973_s0 + $0x2] sm:$0x3]  ;;  %v1147_v4 = vld [vmem:[%s1973_s0 + $0xa] sm:$0x3] }
  0x13   :  { %76 = vst [vmem:[%s1979_s6 + $0x2] sm:$0x3] %v1037_v0  ;;  %s820_s23 = sld [smem:[#allocation2 + $0x80]]  ;;  %v1152_v5 = vld [vmem:[%s1973_s0 + $0x4] sm:$0x3]  ;;  %vm182_vm0 = vcmask 1041408  }
  0x14   :  { %77 = vst [vmem:[%s1979_s6 + $0x4] sm:$0x3] %v1037_v0  ;;  %s1118_s28 = sld [smem:[#allocation2 + $0x100]]  ;;  %v1161_v7 = vld [vmem:[%s1973_s0 + $0xc] sm:$0x3] }
  0x15   :  { %78 = vst [vmem:[%s1979_s6 + $0x6] sm:$0x3] %v1037_v0  ;;  %s1129_s9 = sld [smem:[#allocation2 + $0x180]]  ;;  %v1174_v11 = vld [vmem:[%s1973_s0 + $0x6] sm:$0x3] }
  0x16   :  { %79 = vst [vmem:[%s1979_s6 + $0x8] sm:$0x3] %v1037_v0  ;;  %s1165_s22 = sld [smem:[#allocation6]]  ;;  %v1185_v13 = vld [vmem:[%s1973_s0 + $0xe] sm:$0x3] }
  0x17   :  { %80 = vst [vmem:[%s1979_s6 + $0xa] sm:$0x3] %v1037_v0  ;;  %v130_v6 = vstv %s129_s17  ;;  %s1176_s27 = sld [smem:[#allocation7]]  ;;  %v1200_v20 = vld [vmem:[%s1974_s1] sm:$0x3] }
  0x18   :  { %81 = vst [vmem:[%s1979_s6 + $0xc] sm:$0x3] %v1037_v0  ;;  %v131_v8 = vmul.f32 %v130_v6, %v1116_v1  ;;  %v132_v9 = vmul.f32 %v130_v6, %v1127_v2  ;;  %v134_v10 = vstv %s133_s20  ;;  %s1189_s8 = sld [smem:[#allocation6 + $0x80]]  ;;  %v1213_v25 = vld [vmem:[%s1974_s1 + $0x8] sm:$0x3] }
  0x19   :  { %82 = vst [vmem:[%s1979_s6 + $0xe] sm:$0x3] %v1037_v0  ;;  %v138_v12 = vstv %s820_s23  ;;  %s1202_s2 = sld [smem:[#allocation6 + $0x100]]  ;;  %v1226_v28 = vld [vmem:[%s1974_s1 + $0x2] sm:$0x3] }
  0x1a   :  { %83 = vst [vmem:[%s1979_s6 + $0x10] sm:$0x3] %v1037_v0  ;;  %v135_v14 = vadd.f32 %v134_v10, %v131_v8  ;;  %v136_v15 = vadd.f32 %v134_v10, %v132_v9  ;;  %v139_v16 = vmul.f32 %v1138_v3, %v138_v12  ;;  %v140_v17 = vmul.f32 %v1147_v4, %v138_v12  ;;  %s1215_s12 = sld [smem:[#allocation6 + $0x180]]  ;;  %v1237_v31 = vld [vmem:[%s1974_s1 + $0xa] sm:$0x3] }
  0x1b   :  { %84 = vst [vmem:[%s1979_s6 + $0x12] sm:$0x3] %v1037_v0  ;;  %v144_v18 = vstv %s1118_s28  ;;  %v150_v19 = vstv %s1129_s9  ;;  %s1228_s18 = sld [smem:[#allocation2 + $0x1]]  ;;  %v181_v38 = vld [vmem:[%s1979_s6] sm:$0x3] }
  0x1c   :  { %85 = vst [vmem:[%s1979_s6 + $0x14] sm:$0x3] %v1037_v0  ;;  %v141_v21 = vadd.f32 %v139_v16, %v135_v14  ;;  %v142_v22 = vadd.f32 %v140_v17, %v136_v15  ;;  %v145_v23 = vmul.f32 %v1152_v5, %v144_v18  ;;  %v146_v24 = vmul.f32 %v1161_v7, %v144_v18  ;;  %s1240_s25 = sld [smem:[#allocation4 + $0x1]]  ;;  %v1261_v39 = vld [vmem:[%s1974_s1 + $0x4] sm:$0x3] }
  0x1d   :  { %86 = vst [vmem:[%s1979_s6 + $0x16] sm:$0x3] %v1037_v0  ;;  %v151_v26 = vmul.f32 %v1174_v11, %v150_v19  ;;  %v152_v27 = vmul.f32 %v1185_v13, %v150_v19  ;;  %v156_v32 = vstv %s1165_s22  ;;  %v160_v35 = vstv %s1176_s27  ;;  %s1249_s30 = sld [smem:[#allocation2 + $0x81]]  ;;  %v1273_v41 = vld [vmem:[%s1974_s1 + $0xc] sm:$0x3] }
  0x1e   :  { %87 = vst [vmem:[%s1979_s6 + $0x18] sm:$0x3] %v1037_v0  ;;  %v147_v29 = vadd.f32 %v145_v23, %v141_v21  ;;  %v148_v30 = vadd.f32 %v146_v24, %v142_v22  ;;  %v157_v33 = vmul.f32 %v156_v32, %v1200_v20  ;;  %v158_v34 = vmul.f32 %v156_v32, %v1213_v25  ;;  %s1264_s27 = sld [smem:[#allocation2 + $0x101]]  ;;  %v1278_v42 = vld [vmem:[%s1974_s1 + $0x6] sm:$0x3] }
  0x1f   :  { %88 = vst [vmem:[%s1979_s6 + $0x1a] sm:$0x3] %v1037_v0  ;;  %v164_v40 = vstv %s1189_s8  ;;  %v1291_v51 = vld [vmem:[%s1974_s1 + $0xe] sm:$0x3]  ;;  %v170_v56 = vstv %s1202_s2  ;;  %s1301_s26 = sld [smem:[#allocation2 + $0x181]] }
  0x20   :  { %89 = vst [vmem:[%s1979_s6 + $0x1c] sm:$0x3] %v1037_v0  ;;  %v153_v36 = vadd.f32 %v151_v26, %v147_v29  ;;  %v154_v37 = vadd.f32 %v152_v27, %v148_v30  ;;  %v161_v43 = vadd.f32 %v160_v35, %v157_v33  ;;  %v162_v44 = vadd.f32 %v160_v35, %v158_v34  ;;  %s1311_s7 = sld [smem:[#allocation6 + $0x1]] }
  0x21   :  { %90 = vst [vmem:[%s1979_s6 + $0x1e] sm:$0x3] %v1037_v0  ;;  %v165_v45 = vmul.f32 %v1226_v28, %v164_v40  ;;  %v166_v46 = vmul.f32 %v1237_v31, %v164_v40  ;;  %v826_v53 = vld [vmem:[%s1979_s6 + $0x10] sm:$0x3]  ;;  %v171_v59 = vmul.f32 %v1261_v39, %v170_v56  ;;  %v172_v60 = vmul.f32 %v1273_v41, %v170_v56  ;;  %s1319_s23 = sld [smem:[#allocation7 + $0x1]] }
  0x22   :  { %91 = vst [vmem:[%s1979_s6 + $0x20] sm:$0x3] %v1037_v0  ;;  %v183_v47 = vsel %vm182_vm0, %v153_v36, 0.0  ;;  %v184_v48 = vsel %vm182_vm0, %v154_v37, 0.0  ;;  %v190_v49 = vmul.f32 %v153_v36, %v153_v36  ;;  %v191_v50 = vmul.f32 %v154_v37, %v154_v37  ;;  %s1327_s11 = sld [smem:[#allocation6 + $0x81]] }
  0x23   :  { %92 = vst [vmem:[%s1979_s6 + $0x22] sm:$0x3] %v1037_v0  ;;  %v185_v52 = vadd.f32 %v184_v48, %v183_v47  ;;  %v167_v54 = vadd.f32 %v165_v45, %v161_v43  ;;  %v168_v55 = vadd.f32 %v166_v46, %v162_v44  ;;  %v176_v63 = vstv %s1215_s12  ;;  %s1336_s4 = sld [smem:[#allocation6 + $0x101]] }
  0x24   :  { %93 = vst [vmem:[%s1979_s6 + $0x24] sm:$0x3] %v1037_v0  ;;  %v192_v57 = vsel %vm182_vm0, %v190_v49, 0.0  ;;  %v193_v58 = vsel %vm182_vm0, %v191_v50, 0.0  ;;  %v214_v6 = vstv %s1228_s18  ;;  %v177_v10 = vmul.f32 %v1278_v42, %v176_v63  ;;  %s1344_s9 = sld [smem:[#allocation6 + $0x181]] }
  0x25   :  { %94 = vst [vmem:[%s1979_s6 + $0x26] sm:$0x3] %v1037_v0  ;;  %v186_v61 = vadd.f32 %v185_v52, %v181_v38  ;;  %v194_v62 = vadd.f32 %v193_v58, %v192_v57  ;;  %v173_v8 = vadd.f32 %v171_v59, %v167_v54  ;;  %v174_v9 = vadd.f32 %v172_v60, %v168_v55  ;;  %s1374_s17 = sld [smem:[#allocation2 + $0x2]] }
  0x26   :  { %95 = vst [vmem:[%s1979_s6 + $0x28] sm:$0x3] %v1037_v0  ;;  %v178_v12 = vmul.f32 %v1291_v51, %v176_v63  ;;  %v215_v15 = vmul.f32 %v214_v6, %v1116_v1  ;;  %v216_v16 = vmul.f32 %v214_v6, %v1127_v2  ;;  %v218_v17 = vstv %s1240_s25  ;;  %s1384_s2 = sld [smem:[#allocation4 + $0x2]] }
  0x27   :  { %96 = vst [vmem:[%s1979_s6 + $0x2a] sm:$0x3] %v1037_v0  ;;  %v195_v14 = vadd.f32 %v826_v53, %v194_v62  ;;  %v179_v18 = vadd.f32 %v177_v10, %v173_v8  ;;  %v222_v21 = vstv %s1249_s30  ;;  %v228_v22 = vstv %s1264_s27  ;;  %s1392_s10 = sld [smem:[#allocation2 + $0x82]]  ;;  %v842_v10 = vld [vmem:[%s1979_s6 + $0x2] sm:$0x3] }
  0x28   :  { %97 = vst [vmem:[%s1979_s6 + $0x2c] sm:$0x3] %v1037_v0  ;;  %v180_v19 = vadd.f32 %v178_v12, %v174_v9  ;;  %v219_v23 = vadd.f32 %v218_v17, %v215_v15  ;;  %v220_v24 = vadd.f32 %v218_v17, %v216_v16  ;;  %v223_v26 = vmul.f32 %v1138_v3, %v222_v21  ;;  %s1399_s5 = sld [smem:[#allocation2 + $0x102]] }
  0x29   :  { %98 = vst [vmem:[%s1979_s6 + $0x2e] sm:$0x3] %v1037_v0  ;;  %v224_v27 = vmul.f32 %v1147_v4, %v222_v21  ;;  %v828_v29 = vld [vmem:[%s1979_s6 + $0x20] sm:$0x3]  ;;  %v199_v30 = vsel %vm182_vm0, %v179_v18, 0.0  ;;  %v206_v33 = vmul.f32 %v179_v18, %v179_v18  ;;  %v229_v38 = vmul.f32 %v1152_v5, %v228_v22  ;;  %s1429_s30 = sld [smem:[#allocation7 + $0x2]] }
  0x2a   :  { %99 = vst [vmem:[%s1979_s6 + $0x30] sm:$0x3] %v1037_v0  ;;  %v200_v32 = vsel %vm182_vm0, %v180_v19, 0.0  ;;  %v207_v34 = vmul.f32 %v180_v19, %v180_v19  ;;  %v225_v36 = vadd.f32 %v223_v26, %v219_v23  ;;  %v230_v44 = vmul.f32 %v1161_v7, %v228_v22  ;;  %v844_v22 = vld [vmem:[%s1979_s6 + $0x12] sm:$0x3]  ;;  %s1433_s27 = sld [smem:[#allocation6 + $0x82]] }
  0x2b   :  { %100 = vst [vmem:[%s1979_s6 + $0x32] sm:$0x3] %v1037_v0  ;;  %v201_v35 = vadd.f32 %v200_v32, %v199_v30  ;;  %v226_v37 = vadd.f32 %v224_v27, %v220_v24  ;;  %v208_v40 = vsel %vm182_vm0, %v206_v33, 0.0  ;;  %v234_v45 = vstv %s1301_s26  ;;  %s1437_s15 = sld [smem:[#allocation6 + $0x102]] }
  0x2c   :  { %101 = vst [vmem:[%s1979_s6 + $0x34] sm:$0x3] %v1037_v0  ;;  %v209_v43 = vsel %vm182_vm0, %v207_v34, 0.0  ;;  %v231_v49 = vadd.f32 %v229_v38, %v225_v36  ;;  %v235_v50 = vmul.f32 %v1174_v11, %v234_v45  ;;  %v240_v53 = vstv %s1311_s7  ;;  %s1457_s20 = sld [smem:[#allocation6 + $0x182]] }
  0x2d   :  { %102 = vst [vmem:[%s1979_s6 + $0x36] sm:$0x3] %v1037_v0  ;;  %v202_v46 = vadd.f32 %v828_v29, %v201_v35  ;;  %v210_v48 = vadd.f32 %v209_v43, %v208_v40  ;;  %v232_v52 = vadd.f32 %v230_v44, %v226_v37  ;;  %v244_v54 = vstv %s1319_s23  ;;  %s1460_s22 = sld [smem:[#allocation2 + $0x3]] }
  0x2e   :  { %103 = vst [vmem:[%s1979_s6 + $0x38] sm:$0x3] %v1037_v0  ;;  %v237_v56 = vadd.f32 %v235_v50, %v231_v49  ;;  %v241_v57 = vmul.f32 %v240_v53, %v1200_v20  ;;  %v242_v58 = vmul.f32 %v240_v53, %v1213_v25  ;;  %v248_v60 = vstv %s1327_s11  ;;  %s1417_s11 = sld [smem:[#allocation2 + $0x182]]  ;;  %v846_v53 = vld [vmem:[%s1979_s6 + $0x22] sm:$0x3] }
  0x2f   :  { %104 = vst [vmem:[%s1979_s6 + $0x3a] sm:$0x3] %v1037_v0  ;;  %v260_v62 = vstv %s1344_s9  ;;  %v249_v15 = vmul.f32 %v1226_v28, %v248_v60  ;;  %v250_v16 = vmul.f32 %v1237_v31, %v248_v60  ;;  %v298_v33 = vstv %s1374_s17  ;;  %s1469_s3 = sld [smem:[#allocation4 + $0x3]] }
  0x30   :  { %105 = vst [vmem:[%s1979_s6 + $0x3c] sm:$0x3] %v1037_v0  ;;  %v267_v63 = vsel %vm182_vm0, %v237_v56, 0.0  ;;  %v274_v6 = vmul.f32 %v237_v56, %v237_v56  ;;  %v245_v8 = vadd.f32 %v244_v54, %v241_v57  ;;  %v246_v9 = vadd.f32 %v244_v54, %v242_v58  ;;  %s1490_s7 = sld [smem:[#allocation2 + $0x183]] }
  0x31   :  { %106 = vst [vmem:[%s1979_s6 + $0x3e] sm:$0x3] %v1037_v0  ;;  %v830_v47 = vld [vmem:[%s1979_s6 + $0x30] sm:$0x3]  ;;  %v236_v0 = vmul.f32 %v1185_v13, %v234_v45  ;;  %v261_v27 = vmul.f32 %v1278_v42, %v260_v62  ;;  %v262_v32 = vmul.f32 %v1291_v51, %v260_v62  ;;  %v299_v36 = vmul.f32 %v298_v33, %v1116_v1  ;;  %s1497_s25 = sld [smem:[#allocation6 + $0x3]] }
  0x32   :  { %187 = vst [vmem:[%s1979_s6] sm:$0x3] %v186_v61  ;;  %v211_v55 = vadd.f32 %v830_v47, %v210_v48  ;;  %v254_v61 = vstv %s1336_s4  ;;  %v276_v18 = vsel %vm182_vm0, %v274_v6, 0.0  ;;  %s1422_s4 = sld [smem:[#allocation6 + $0x2]]  ;;  %v251_v24 = vadd.f32 %v249_v15, %v245_v8  ;;  %v848_v62 = vld [vmem:[%s1979_s6 + $0x32] sm:$0x3] }
  0x33   :  { %827 = vst [vmem:[%s1979_s6 + $0x10] sm:$0x3] %v195_v14  ;;  %v238_v59 = vadd.f32 %v236_v0, %v232_v52  ;;  %v255_v19 = vmul.f32 %v1261_v39, %v254_v61  ;;  %v256_v21 = vmul.f32 %v1273_v41, %v254_v61  ;;  %v252_v26 = vadd.f32 %v250_v16, %v246_v9  ;;  %s1507_s9 = sld [smem:[#allocation7 + $0x3]] }
  0x34   :  { %829 = vst [vmem:[%s1979_s6 + $0x20] sm:$0x3] %v202_v46  ;;  %v300_v37 = vmul.f32 %v298_v33, %v1127_v2  ;;  %v302_v40 = vstv %s1384_s2  ;;  %v306_v43 = vstv %s1392_s10  ;;  %v312_v44 = vstv %s1399_s5  ;;  %s1475_s10 = sld [smem:[#allocation2 + $0x83]] }
  0x35   :  { %831 = vst [vmem:[%s1979_s6 + $0x30] sm:$0x3] %v211_v55  ;;  %v268_v12 = vsel %vm182_vm0, %v238_v59, 0.0  ;;  %v275_v14 = vmul.f32 %v238_v59, %v238_v59  ;;  %v257_v34 = vadd.f32 %v255_v19, %v251_v24  ;;  %v258_v35 = vadd.f32 %v256_v21, %v252_v26  ;;  %s1481_s5 = sld [smem:[#allocation2 + $0x103]]  ;;  %v860_v26 = vld [vmem:[%s1979_s6 + $0x4] sm:$0x3] }
  0x36   :  { %v269_v17 = vadd.f32 %v268_v12, %v267_v63  ;;  %v303_v47 = vadd.f32 %v302_v40, %v299_v36  ;;  %v304_v48 = vadd.f32 %v302_v40, %v300_v37  ;;  %v307_v49 = vmul.f32 %v1138_v3, %v306_v43  ;;  %s1513_s14 = sld [smem:[#allocation6 + $0x83]] }
  0x37   :  { %v277_v23 = vsel %vm182_vm0, %v275_v14, 0.0  ;;  %v263_v45 = vadd.f32 %v261_v27, %v257_v34  ;;  %v264_v46 = vadd.f32 %v262_v32, %v258_v35  ;;  %v308_v50 = vmul.f32 %v1147_v4, %v306_v43  ;;  %s1537_s24 = sld [smem:[#allocation6 + $0x183]] }
  0x38   :  { %v270_v29 = vadd.f32 %v842_v10, %v269_v17  ;;  %v278_v30 = vadd.f32 %v277_v23, %v276_v18  ;;  %v313_v52 = vmul.f32 %v1152_v5, %v312_v44  ;;  %v314_v0 = vmul.f32 %v1161_v7, %v312_v44  ;;  %v862_v44 = vld [vmem:[%s1979_s6 + $0x14] sm:$0x3]  ;;  %s1540_s29 = sld [smem:[#allocation2 + $0x4]] }
  0x39   :  { %v283_v54 = vsel %vm182_vm0, %v263_v45, 0.0  ;;  %v284_v55 = vsel %vm182_vm0, %v264_v46, 0.0  ;;  %v290_v56 = vmul.f32 %v263_v45, %v263_v45  ;;  %v291_v57 = vmul.f32 %v264_v46, %v264_v46  ;;  %s1549_s2 = sld [smem:[#allocation4 + $0x4]] }
  0x3a   :  { %843 = vst [vmem:[%s1979_s6 + $0x2] sm:$0x3] %v270_v29  ;;  %v279_v38 = vadd.f32 %v844_v22, %v278_v30  ;;  %v285_v58 = vadd.f32 %v284_v55, %v283_v54  ;;  %v309_v59 = vadd.f32 %v307_v49, %v303_v47  ;;  %v310_v60 = vadd.f32 %v308_v50, %v304_v48  ;;  %s1551_s26 = sld [smem:[#allocation2 + $0x84]] }
  0x3b   :  { %v318_v61 = vstv %s1417_s11  ;;  %v292_v63 = vsel %vm182_vm0, %v290_v56, 0.0  ;;  %v293_v6 = vsel %vm182_vm0, %v291_v57, 0.0  ;;  %v324_v16 = vstv %s1422_s4  ;;  %s1576_s23 = sld [smem:[#allocation6 + $0x4]] }
  0x3c   :  { %845 = vst [vmem:[%s1979_s6 + $0x12] sm:$0x3] %v279_v38  ;;  %v319_v8 = vmul.f32 %v1174_v11, %v318_v61  ;;  %v320_v9 = vmul.f32 %v1185_v13, %v318_v61  ;;  %v286_v10 = vadd.f32 %v846_v53, %v285_v58  ;;  %v294_v12 = vadd.f32 %v293_v6, %v292_v63  ;;  %s1585_s11 = sld [smem:[#allocation7 + $0x4]] }
  0x3d   :  { %v315_v14 = vadd.f32 %v313_v52, %v309_v59  ;;  %v316_v15 = vadd.f32 %v314_v0, %v310_v60  ;;  %v328_v17 = vstv %s1429_s30  ;;  %v332_v18 = vstv %s1433_s27  ;;  %s1587_s4 = sld [smem:[#allocation6 + $0x84]] }
  0x3e   :  { %v338_v19 = vstv %s1437_s15  ;;  %847 = vst [vmem:[%s1979_s6 + $0x22] sm:$0x3] %v286_v10  ;;  %v295_v21 = vadd.f32 %v848_v62, %v294_v12  ;;  %v325_v24 = vmul.f32 %v324_v16, %v1200_v20  ;;  %v326_v27 = vmul.f32 %v324_v16, %v1213_v25  ;;  %s1519_s15 = sld [smem:[#allocation6 + $0x103]] }
  0x3f   :  { %v321_v22 = vadd.f32 %v319_v8, %v315_v14  ;;  %v322_v23 = vadd.f32 %v320_v9, %v316_v15  ;;  %v333_v29 = vmul.f32 %v1226_v28, %v332_v18  ;;  %v334_v30 = vmul.f32 %v1237_v31, %v332_v18  ;;  %v864_v18 = vld [vmem:[%s1979_s6 + $0x24] sm:$0x3]  ;;  %s1613_s21 = sld [smem:[#allocation6 + $0x184]] }
  0x40   :  { %v339_v32 = vmul.f32 %v1261_v39, %v338_v19  ;;  %849 = vst [vmem:[%s1979_s6 + $0x32] sm:$0x3] %v295_v21  ;;  %v329_v38 = vadd.f32 %v328_v17, %v325_v24  ;;  %v330_v40 = vadd.f32 %v328_v17, %v326_v27  ;;  %v340_v43 = vmul.f32 %v1273_v41, %v338_v19  ;;  %s1616_s17 = sld [smem:[#allocation2 + $0x5]] }
  0x41   :  { %v351_v33 = vsel %vm182_vm0, %v321_v22, 0.0  ;;  %v352_v34 = vsel %vm182_vm0, %v322_v23, 0.0  ;;  %v358_v35 = vmul.f32 %v321_v22, %v321_v22  ;;  %v359_v36 = vmul.f32 %v322_v23, %v322_v23  ;;  %s1646_s18 = sld [smem:[#allocation2 + $0x185]] }
  0x42   :  { %v353_v37 = vadd.f32 %v352_v34, %v351_v33  ;;  %v344_v47 = vstv %s1457_s20  ;;  %v382_v48 = vstv %s1460_s22  ;;  %v335_v52 = vadd.f32 %v333_v29, %v329_v38  ;;  %s1625_s20 = sld [smem:[#allocation4 + $0x5]] }
  0x43   :  { %v360_v45 = vsel %vm182_vm0, %v358_v35, 0.0  ;;  %v361_v46 = vsel %vm182_vm0, %v359_v36, 0.0  ;;  %v336_v0 = vadd.f32 %v334_v30, %v330_v40  ;;  %v345_v53 = vmul.f32 %v1278_v42, %v344_v47  ;;  %v866_v30 = vld [vmem:[%s1979_s6 + $0x34] sm:$0x3]  ;;  %s1631_s22 = sld [smem:[#allocation2 + $0x85]] }
  0x44   :  { %v354_v49 = vadd.f32 %v860_v26, %v353_v37  ;;  %v362_v50 = vadd.f32 %v361_v46, %v360_v45  ;;  %v346_v54 = vmul.f32 %v1291_v51, %v344_v47  ;;  %v383_v55 = vmul.f32 %v382_v48, %v1116_v1  ;;  %s1653_s13 = sld [smem:[#allocation6 + $0x5]] }
  0x45   :  { %v384_v56 = vmul.f32 %v382_v48, %v1127_v2  ;;  %v341_v58 = vadd.f32 %v339_v32, %v335_v52  ;;  %v342_v59 = vadd.f32 %v340_v43, %v336_v0  ;;  %v386_v60 = vstv %s1469_s3  ;;  %s1557_s3 = sld [smem:[#allocation2 + $0x104]]  ;;  %v878_v52 = vld [vmem:[%s1979_s6 + $0x6] sm:$0x3] }
  0x46   :  { %861 = vst [vmem:[%s1979_s6 + $0x4] sm:$0x3] %v354_v49  ;;  %v363_v57 = vadd.f32 %v862_v44, %v362_v50  ;;  %v387_v61 = vadd.f32 %v386_v60, %v383_v55  ;;  %v390_v63 = vstv %s1475_s10  ;;  %v396_v6 = vstv %s1481_s5  ;;  %s1663_s8 = sld [smem:[#allocation7 + $0x5]] }
  0x47   :  { %v388_v62 = vadd.f32 %v386_v60, %v384_v56  ;;  %v347_v8 = vadd.f32 %v345_v53, %v341_v58  ;;  %v348_v9 = vadd.f32 %v346_v54, %v342_v59  ;;  %v391_v10 = vmul.f32 %v1138_v3, %v390_v63  ;;  %s1693_s16 = sld [smem:[#allocation6 + $0x185]] }
  0x48   :  { %863 = vst [vmem:[%s1979_s6 + $0x14] sm:$0x3] %v363_v57  ;;  %v392_v12 = vmul.f32 %v1147_v4, %v390_v63  ;;  %v397_v14 = vmul.f32 %v1152_v5, %v396_v6  ;;  %v398_v15 = vmul.f32 %v1161_v7, %v396_v6  ;;  %v402_v16 = vstv %s1490_s7  ;;  %s1573_s7 = sld [smem:[#allocation2 + $0x184]]  ;;  %v880_v6 = vld [vmem:[%s1979_s6 + $0x16] sm:$0x3] }
  0x49   :  { %v408_v17 = vstv %s1497_s25  ;;  %v367_v19 = vsel %vm182_vm0, %v347_v8, 0.0  ;;  %v368_v21 = vsel %vm182_vm0, %v348_v9, 0.0  ;;  %v374_v22 = vmul.f32 %v347_v8, %v347_v8  ;;  %s1669_s25 = sld [smem:[#allocation6 + $0x85]] }
  0x4a   :  { %v375_v23 = vmul.f32 %v348_v9, %v348_v9  ;;  %v369_v24 = vadd.f32 %v368_v21, %v367_v19  ;;  %v393_v26 = vadd.f32 %v391_v10, %v387_v61  ;;  %v394_v27 = vadd.f32 %v392_v12, %v388_v62  ;;  %s1696_s19 = sld [smem:[#allocation2 + $0x6]] }
  0x4b   :  { %v403_v29 = vmul.f32 %v1174_v11, %v402_v16  ;;  %v376_v32 = vsel %vm182_vm0, %v374_v22, 0.0  ;;  %v404_v34 = vmul.f32 %v1185_v13, %v402_v16  ;;  %v409_v35 = vmul.f32 %v408_v17, %v1200_v20  ;;  %s1732_s5 = sld [smem:[#allocation6 + $0x6]] }
  0x4c   :  { %v377_v33 = vsel %vm182_vm0, %v375_v23, 0.0  ;;  %v370_v36 = vadd.f32 %v864_v18, %v369_v24  ;;  %v399_v38 = vadd.f32 %v397_v14, %v393_v26  ;;  %v400_v40 = vadd.f32 %v398_v15, %v394_v27  ;;  %s1811_s28 = sld [smem:[#allocation4 + $0x7]] }
  0x4d   :  { %v378_v37 = vadd.f32 %v377_v33, %v376_v32  ;;  %v410_v43 = vmul.f32 %v408_v17, %v1213_v25  ;;  %v412_v44 = vstv %s1507_s9  ;;  %v416_v45 = vstv %s1513_s14  ;;  %s1593_s9 = sld [smem:[#allocation6 + $0x104]] }
  0x4e   :  { %v422_v46 = vstv %s1519_s15  ;;  %865 = vst [vmem:[%s1979_s6 + $0x24] sm:$0x3] %v370_v36  ;;  %v405_v48 = vadd.f32 %v403_v29, %v399_v38  ;;  %v406_v49 = vadd.f32 %v404_v34, %v400_v40  ;;  %v413_v50 = vadd.f32 %v412_v44, %v409_v35  ;;  %v882_v38 = vld [vmem:[%s1979_s6 + $0x26] sm:$0x3]  ;;  %s1890_s14 = sld [smem:[#allocation6 + $0x107]] }
  0x4f   :  { %v379_v47 = vadd.f32 %v866_v30, %v378_v37  ;;  %v414_v0 = vadd.f32 %v412_v44, %v410_v43  ;;  %v417_v53 = vmul.f32 %v1226_v28, %v416_v45  ;;  %v418_v54 = vmul.f32 %v1237_v31, %v416_v45 }
  0x50   :  { %v423_v55 = vmul.f32 %v1261_v39, %v422_v46  ;;  %v435_v56 = vsel %vm182_vm0, %v405_v48, 0.0  ;;  %v436_v57 = vsel %vm182_vm0, %v406_v49, 0.0  ;;  %v442_v58 = vmul.f32 %v405_v48, %v405_v48 }
  0x51   :  { %867 = vst [vmem:[%s1979_s6 + $0x34] sm:$0x3] %v379_v47  ;;  %v443_v59 = vmul.f32 %v406_v49, %v406_v49  ;;  %v437_v60 = vadd.f32 %v436_v57, %v435_v56  ;;  %v419_v61 = vadd.f32 %v417_v53, %v413_v50  ;;  %v420_v62 = vadd.f32 %v418_v54, %v414_v0  ;;  %v884_v50 = vld [vmem:[%s1979_s6 + $0x36] sm:$0x3] }
  0x52   :  { %v424_v63 = vmul.f32 %v1273_v41, %v422_v46  ;;  %v444_v8 = vsel %vm182_vm0, %v442_v58, 0.0  ;;  %v428_v10 = vstv %s1537_s24  ;;  %v466_v12 = vstv %s1540_s29  ;;  %s1705_s24 = sld [smem:[#allocation4 + $0x6]] }
  0x53   :  { %v445_v9 = vsel %vm182_vm0, %v443_v59, 0.0  ;;  %v438_v14 = vadd.f32 %v878_v52, %v437_v60  ;;  %v425_v16 = vadd.f32 %v423_v55, %v419_v61  ;;  %v429_v18 = vmul.f32 %v1278_v42, %v428_v10  ;;  %s1707_s29 = sld [smem:[#allocation2 + $0x86]] }
  0x54   :  { %v446_v15 = vadd.f32 %v445_v9, %v444_v8  ;;  %v426_v17 = vadd.f32 %v424_v63, %v420_v62  ;;  %v430_v19 = vmul.f32 %v1291_v51, %v428_v10  ;;  %v467_v21 = vmul.f32 %v466_v12, %v1116_v1  ;;  %v896_v10 = vld [vmem:[%s1979_s6 + $0x8] sm:$0x3] }
  0x55   :  { %v468_v22 = vmul.f32 %v466_v12, %v1127_v2  ;;  %879 = vst [vmem:[%s1979_s6 + $0x6] sm:$0x3] %v438_v14  ;;  %v470_v24 = vstv %s1549_s2  ;;  %v474_v26 = vstv %s1551_s26  ;;  %v480_v27 = vstv %s1557_s3  ;;  %s1637_s3 = sld [smem:[#allocation2 + $0x105]] }
  0x56   :  { %v447_v23 = vadd.f32 %v880_v6, %v446_v15  ;;  %v431_v29 = vadd.f32 %v429_v18, %v425_v16  ;;  %v432_v30 = vadd.f32 %v430_v19, %v426_v17  ;;  %v471_v32 = vadd.f32 %v470_v24, %v467_v21  ;;  %s1869_s26 = sld [smem:[#allocation7 + $0x7]] }
  0x57   :  { %v472_v33 = vadd.f32 %v470_v24, %v468_v22  ;;  %v475_v34 = vmul.f32 %v1138_v3, %v474_v26  ;;  %v476_v35 = vmul.f32 %v1147_v4, %v474_v26  ;;  %v481_v36 = vmul.f32 %v1152_v5, %v480_v27 }
  0x58   :  { %881 = vst [vmem:[%s1979_s6 + $0x16] sm:$0x3] %v447_v23  ;;  %v482_v37 = vmul.f32 %v1161_v7, %v480_v27  ;;  %v451_v40 = vsel %vm182_vm0, %v431_v29, 0.0  ;;  %v452_v43 = vsel %vm182_vm0, %v432_v30, 0.0  ;;  %v458_v44 = vmul.f32 %v431_v29, %v431_v29  ;;  %v898_v27 = vld [vmem:[%s1979_s6 + $0x18] sm:$0x3] }
  0x59   :  { %v459_v45 = vmul.f32 %v432_v30, %v432_v30  ;;  %v453_v46 = vadd.f32 %v452_v43, %v451_v40  ;;  %v477_v47 = vadd.f32 %v475_v34, %v471_v32  ;;  %v478_v48 = vadd.f32 %v476_v35, %v472_v33 }
  0x5a   :  { %v486_v49 = vstv %s1573_s7  ;;  %v460_v52 = vsel %vm182_vm0, %v458_v44, 0.0  ;;  %v492_v59 = vstv %s1576_s23  ;;  %v496_v60 = vstv %s1585_s11  ;;  %s1741_s7 = sld [smem:[#allocation7 + $0x6]] }
  0x5b   :  { %v461_v0 = vsel %vm182_vm0, %v459_v45, 0.0  ;;  %v487_v53 = vmul.f32 %v1174_v11, %v486_v49  ;;  %v488_v54 = vmul.f32 %v1185_v13, %v486_v49  ;;  %v454_v55 = vadd.f32 %v882_v38, %v453_v46  ;;  %s1743_s23 = sld [smem:[#allocation6 + $0x86]] }
  0x5c   :  { %v462_v56 = vadd.f32 %v461_v0, %v460_v52  ;;  %v483_v57 = vadd.f32 %v481_v36, %v477_v47  ;;  %v484_v58 = vadd.f32 %v482_v37, %v478_v48  ;;  %v500_v61 = vstv %s1587_s4  ;;  %s1884_s11 = sld [smem:[#allocation6 + $0x87]] }
  0x5d   :  { %v506_v62 = vstv %s1593_s9  ;;  %883 = vst [vmem:[%s1979_s6 + $0x26] sm:$0x3] %v454_v55  ;;  %v493_v9 = vmul.f32 %v492_v59, %v1200_v20  ;;  %v494_v12 = vmul.f32 %v492_v59, %v1213_v25  ;;  %v501_v14 = vmul.f32 %v1226_v28, %v500_v61  ;;  %s1675_s9 = sld [smem:[#allocation6 + $0x105]] }
  0x5e   :  { %v463_v63 = vadd.f32 %v884_v50, %v462_v56  ;;  %v489_v6 = vadd.f32 %v487_v53, %v483_v57  ;;  %v490_v8 = vadd.f32 %v488_v54, %v484_v58  ;;  %v502_v15 = vmul.f32 %v1237_v31, %v500_v61  ;;  %v900_v61 = vld [vmem:[%s1979_s6 + $0x28] sm:$0x3] }
  0x5f   :  { %v507_v16 = vmul.f32 %v1261_v39, %v506_v62  ;;  %v497_v23 = vadd.f32 %v496_v60, %v493_v9  ;;  %v498_v24 = vadd.f32 %v496_v60, %v494_v12  ;;  %v508_v26 = vmul.f32 %v1273_v41, %v506_v62  ;;  %v902_v9 = vld [vmem:[%s1979_s6 + $0x38] sm:$0x3] }
  0x60   :  { %885 = vst [vmem:[%s1979_s6 + $0x36] sm:$0x3] %v463_v63  ;;  %v519_v17 = vsel %vm182_vm0, %v489_v6, 0.0  ;;  %v520_v18 = vsel %vm182_vm0, %v490_v8, 0.0  ;;  %v526_v19 = vmul.f32 %v489_v6, %v489_v6  ;;  %v527_v21 = vmul.f32 %v490_v8, %v490_v8 }
  0x61   :  { %v521_v22 = vadd.f32 %v520_v18, %v519_v17  ;;  %v512_v32 = vstv %s1613_s21  ;;  %v550_v33 = vstv %s1616_s17  ;;  %v503_v36 = vadd.f32 %v501_v14, %v497_v23 }
  0x62   :  { %v528_v29 = vsel %vm182_vm0, %v526_v19, 0.0  ;;  %v529_v30 = vsel %vm182_vm0, %v527_v21, 0.0  ;;  %v504_v37 = vadd.f32 %v502_v15, %v498_v24  ;;  %v513_v38 = vmul.f32 %v1278_v42, %v512_v32 }
  0x63   :  { %v522_v34 = vadd.f32 %v896_v10, %v521_v22  ;;  %v530_v35 = vadd.f32 %v529_v30, %v528_v29  ;;  %v514_v40 = vmul.f32 %v1291_v51, %v512_v32  ;;  %v551_v43 = vmul.f32 %v550_v33, %v1116_v1 }
  0x64   :  { %v552_v44 = vmul.f32 %v550_v33, %v1127_v2  ;;  %v509_v46 = vadd.f32 %v507_v16, %v503_v36  ;;  %v510_v47 = vadd.f32 %v508_v26, %v504_v37  ;;  %v554_v48 = vstv %s1625_s20  ;;  %s1713_s20 = sld [smem:[#allocation2 + $0x106]] }
  0x65   :  { %897 = vst [vmem:[%s1979_s6 + $0x8] sm:$0x3] %v522_v34  ;;  %v531_v45 = vadd.f32 %v898_v27, %v530_v35  ;;  %v555_v49 = vadd.f32 %v554_v48, %v551_v43  ;;  %v558_v52 = vstv %s1631_s22  ;;  %v564_v0 = vstv %s1637_s3  ;;  %v914_v27 = vld [vmem:[%s1979_s6 + $0xa] sm:$0x3]  ;;  %s1792_s22 = sld [smem:[#allocation2 + $0x7]] }
  0x66   :  { %v556_v50 = vadd.f32 %v554_v48, %v552_v44  ;;  %v515_v53 = vadd.f32 %v513_v38, %v509_v46  ;;  %v516_v54 = vadd.f32 %v514_v40, %v510_v47  ;;  %v559_v55 = vmul.f32 %v1138_v3, %v558_v52  ;;  %v916_v40 = vld [vmem:[%s1979_s6 + $0x1a] sm:$0x3] }
  0x67   :  { %899 = vst [vmem:[%s1979_s6 + $0x18] sm:$0x3] %v531_v45  ;;  %v560_v56 = vmul.f32 %v1147_v4, %v558_v52  ;;  %v565_v57 = vmul.f32 %v1152_v5, %v564_v0  ;;  %v566_v58 = vmul.f32 %v1161_v7, %v564_v0  ;;  %v570_v59 = vstv %s1646_s18  ;;  %s1729_s18 = sld [smem:[#allocation2 + $0x186]] }
  0x68   :  { %v576_v60 = vstv %s1653_s13  ;;  %v535_v62 = vsel %vm182_vm0, %v515_v53, 0.0  ;;  %v536_v63 = vsel %vm182_vm0, %v516_v54, 0.0  ;;  %v542_v6 = vmul.f32 %v515_v53, %v515_v53  ;;  %s1813_s13 = sld [smem:[#allocation2 + $0x87]] }
  0x69   :  { %v543_v8 = vmul.f32 %v516_v54, %v516_v54  ;;  %v537_v3 = vadd.f32 %v536_v63, %v535_v62  ;;  %v561_v4 = vadd.f32 %v559_v55, %v555_v49  ;;  %v562_v5 = vadd.f32 %v560_v56, %v556_v50  ;;  %v1769_v62 = vld [vmem:[%s1973_s0 + $0xa] sm:$0x3] }
  0x6a   :  { %v571_v7 = vmul.f32 %v1174_v11, %v570_v59  ;;  %v544_v10 = vsel %vm182_vm0, %v542_v6, 0.0  ;;  %v572_v14 = vmul.f32 %v1185_v13, %v570_v59  ;;  %v577_v15 = vmul.f32 %v576_v60, %v1200_v20  ;;  %v1775_v6 = vld [vmem:[%s1973_s0 + $0x4] sm:$0x3] }
  0x6b   :  { %v545_v12 = vsel %vm182_vm0, %v543_v8, 0.0  ;;  %v538_v16 = vadd.f32 %v900_v61, %v537_v3  ;;  %v567_v11 = vadd.f32 %v565_v57, %v561_v4  ;;  %v568_v18 = vadd.f32 %v566_v58, %v562_v5  ;;  %v1781_v3 = vld [vmem:[%s1973_s0 + $0xc] sm:$0x3]  ;;  %v918_v5 = vld [vmem:[%s1979_s6 + $0x2a] sm:$0x3] }
  0x6c   :  { %v546_v17 = vadd.f32 %v545_v12, %v544_v10  ;;  %v578_v19 = vmul.f32 %v576_v60, %v1213_v25  ;;  %v580_v21 = vstv %s1663_s8  ;;  %v584_v22 = vstv %s1669_s25  ;;  %s1749_s8 = sld [smem:[#allocation6 + $0x106]] }
  0x6d   :  { %v590_v23 = vstv %s1675_s9  ;;  %901 = vst [vmem:[%s1979_s6 + $0x28] sm:$0x3] %v538_v16  ;;  %v573_v20 = vadd.f32 %v571_v7, %v567_v11  ;;  %v574_v24 = vadd.f32 %v572_v14, %v568_v18  ;;  %v581_v26 = vadd.f32 %v580_v21, %v577_v15  ;;  %v920_v11 = vld [vmem:[%s1979_s6 + $0x3a] sm:$0x3]  ;;  %s1819_s25 = sld [smem:[#allocation2 + $0x107]] }
  0x6e   :  { %v547_v13 = vadd.f32 %v902_v9, %v546_v17  ;;  %v582_v29 = vadd.f32 %v580_v21, %v578_v19  ;;  %v585_v25 = vmul.f32 %v1226_v28, %v584_v22  ;;  %v586_v30 = vmul.f32 %v1237_v31, %v584_v22  ;;  %v1802_v21 = vld [vmem:[%s1973_s0 + $0x6] sm:$0x3] }
  0x6f   :  { %v591_v32 = vmul.f32 %v1261_v39, %v590_v23  ;;  %v603_v33 = vsel %vm182_vm0, %v573_v20, 0.0  ;;  %v604_v34 = vsel %vm182_vm0, %v574_v24, 0.0  ;;  %v610_v35 = vmul.f32 %v573_v20, %v573_v20 }
  0x70   :  { %903 = vst [vmem:[%s1979_s6 + $0x38] sm:$0x3] %v547_v13  ;;  %v611_v36 = vmul.f32 %v574_v24, %v574_v24  ;;  %v605_v37 = vadd.f32 %v604_v34, %v603_v33  ;;  %v587_v28 = vadd.f32 %v585_v25, %v581_v26  ;;  %v588_v38 = vadd.f32 %v586_v30, %v582_v29 }
  0x71   :  { %v592_v31 = vmul.f32 %v1273_v41, %v590_v23  ;;  %v612_v43 = vsel %vm182_vm0, %v610_v35, 0.0  ;;  %v596_v45 = vstv %s1693_s16  ;;  %v634_v46 = vstv %s1696_s19  ;;  %v1808_v23 = vld [vmem:[%s1973_s0 + $0xe] sm:$0x3]  ;;  %s1851_s16 = sld [smem:[#allocation6 + $0x7]] }
  0x72   :  { %v613_v44 = vsel %vm182_vm0, %v611_v36, 0.0  ;;  %v606_v47 = vadd.f32 %v914_v27, %v605_v37  ;;  %v593_v49 = vadd.f32 %v591_v32, %v587_v28  ;;  %v597_v52 = vmul.f32 %v1278_v42, %v596_v45  ;;  %v1827_v36 = vld [vmem:[%s1974_s1] sm:$0x3]  ;;  %v1835_v28 = vld [vmem:[%s1974_s1 + $0x8] sm:$0x3] }
  0x73   :  { %v614_v48 = vadd.f32 %v613_v44, %v612_v43  ;;  %v594_v50 = vadd.f32 %v592_v31, %v588_v38  ;;  %v598_v0 = vmul.f32 %v1291_v51, %v596_v45  ;;  %v635_v53 = vmul.f32 %v634_v46, %v1116_v1  ;;  %v1763_v1 = vld [vmem:[%s1973_s0 + $0x2] sm:$0x3]  ;;  %v1847_v43 = vld [vmem:[%s1974_s1 + $0xa] sm:$0x3] }
  0x74   :  { %v636_v54 = vmul.f32 %v634_v46, %v1127_v2  ;;  %915 = vst [vmem:[%s1979_s6 + $0xa] sm:$0x3] %v606_v47  ;;  %v638_v56 = vstv %s1705_s24  ;;  %v642_v57 = vstv %s1707_s29  ;;  %v648_v58 = vstv %s1713_s20  ;;  %s1789_s20 = sld [smem:[#allocation6 + $0x186]] }
  0x75   :  { %v615_v55 = vadd.f32 %v916_v40, %v614_v48  ;;  %v599_v59 = vadd.f32 %v597_v52, %v593_v49  ;;  %v600_v60 = vadd.f32 %v598_v0, %v594_v50  ;;  %v639_v61 = vadd.f32 %v638_v56, %v635_v53  ;;  %v1841_v31 = vld [vmem:[%s1974_s1 + $0x2] sm:$0x3]  ;;  %v932_v46 = vld [vmem:[%s1979_s6 + $0xc] sm:$0x3] }
  0x76   :  { %v640_v42 = vadd.f32 %v638_v56, %v636_v54  ;;  %v643_v2 = vmul.f32 %v1763_v1, %v642_v57  ;;  %v644_v63 = vmul.f32 %v1769_v62, %v642_v57  ;;  %v649_v8 = vmul.f32 %v1775_v6, %v648_v58  ;;  %v934_v54 = vld [vmem:[%s1979_s6 + $0x1c] sm:$0x3] }
  0x77   :  { %917 = vst [vmem:[%s1979_s6 + $0x1a] sm:$0x3] %v615_v55  ;;  %v650_v4 = vmul.f32 %v1781_v3, %v648_v58  ;;  %v619_v7 = vsel %vm182_vm0, %v599_v59, 0.0  ;;  %v620_v9 = vsel %vm182_vm0, %v600_v60, 0.0  ;;  %v626_v10 = vmul.f32 %v599_v59, %v599_v59 }
  0x78   :  { %v627_v12 = vmul.f32 %v600_v60, %v600_v60  ;;  %v621_v14 = vadd.f32 %v620_v9, %v619_v7  ;;  %v645_v15 = vadd.f32 %v643_v2, %v639_v61  ;;  %v646_v16 = vadd.f32 %v644_v63, %v640_v42 }
  0x79   :  { %v654_v17 = vstv %s1729_s18  ;;  %v628_v18 = vsel %vm182_vm0, %v626_v10, 0.0  ;;  %v660_v29 = vstv %s1732_s5  ;;  %v664_v25 = vstv %s1741_s7  ;;  %s1830_s5 = sld [smem:[#allocation2 + $0x187]] }
  0x7a   :  { %v629_v19 = vsel %vm182_vm0, %v627_v12, 0.0  ;;  %v655_v22 = vmul.f32 %v1802_v21, %v654_v17  ;;  %v656_v13 = vmul.f32 %v1808_v23, %v654_v17  ;;  %v622_v20 = vadd.f32 %v918_v5, %v621_v14  ;;  %v975_v5 = vld [vmem:[%s1973_s0 + $0x8] sm:$0x3] }
  0x7b   :  { %v630_v24 = vadd.f32 %v629_v19, %v628_v18  ;;  %v651_v26 = vadd.f32 %v649_v8, %v645_v15  ;;  %v652_v27 = vadd.f32 %v650_v4, %v646_v16  ;;  %v668_v30 = vstv %s1743_s23  ;;  %v974_v8 = vld [vmem:[%s1973_s0] sm:$0x3] }
  0x7c   :  { %v674_v32 = vstv %s1749_s8  ;;  %919 = vst [vmem:[%s1979_s6 + $0x2a] sm:$0x3] %v622_v20  ;;  %v661_v37 = vmul.f32 %v1827_v36, %v660_v29  ;;  %v662_v38 = vmul.f32 %v1835_v28, %v660_v29  ;;  %v669_v40 = vmul.f32 %v1841_v31, %v668_v30 }
  0x7d   :  { %v631_v33 = vadd.f32 %v920_v11, %v630_v24  ;;  %v657_v34 = vadd.f32 %v655_v22, %v651_v26  ;;  %v658_v35 = vadd.f32 %v656_v13, %v652_v27  ;;  %v670_v44 = vmul.f32 %v1847_v43, %v668_v30  ;;  %v936_v27 = vld [vmem:[%s1979_s6 + $0x2c] sm:$0x3] }
  0x7e   :  { %v675_v45 = vmul.f32 %v1261_v39, %v674_v32  ;;  %v665_v0 = vadd.f32 %v664_v25, %v661_v37  ;;  %v666_v39 = vadd.f32 %v664_v25, %v662_v38  ;;  %v676_v53 = vmul.f32 %v1273_v41, %v674_v32  ;;  %v1874_v41 = vld [vmem:[%s1974_s1 + $0x6] sm:$0x3] }
  0x7f   :  { %921 = vst [vmem:[%s1979_s6 + $0x3a] sm:$0x3] %v631_v33  ;;  %v687_v47 = vsel %vm182_vm0, %v657_v34, 0.0  ;;  %v688_v48 = vsel %vm182_vm0, %v658_v35, 0.0  ;;  %v694_v49 = vmul.f32 %v657_v34, %v657_v34  ;;  %v695_v50 = vmul.f32 %v658_v35, %v658_v35  ;;  %v938_v33 = vld [vmem:[%s1979_s6 + $0x3c] sm:$0x3] }
  0x80   :  { %v689_v52 = vadd.f32 %v688_v48, %v687_v47  ;;  %v680_v57 = vstv %s1789_s20  ;;  %v718_v58 = vstv %s1792_s22  ;;  %v671_v61 = vadd.f32 %v669_v40, %v665_v0 }
  0x81   :  { %v696_v55 = vsel %vm182_vm0, %v694_v49, 0.0  ;;  %v697_v56 = vsel %vm182_vm0, %v695_v50, 0.0  ;;  %v672_v42 = vadd.f32 %v670_v44, %v666_v39  ;;  %v681_v2 = vmul.f32 %v1874_v41, %v680_v57 }
  0x82   :  { %v690_v59 = vadd.f32 %v932_v46, %v689_v52  ;;  %v698_v60 = vadd.f32 %v697_v56, %v696_v55  ;;  %v682_v63 = vmul.f32 %v1291_v51, %v680_v57  ;;  %v719_v4 = vmul.f32 %v974_v8, %v718_v58  ;;  %v950_v55 = vld [vmem:[%s1979_s6 + $0xe] sm:$0x3] }
  0x83   :  { %v720_v7 = vmul.f32 %v975_v5, %v718_v58  ;;  %v677_v10 = vadd.f32 %v675_v45, %v671_v61  ;;  %v678_v51 = vadd.f32 %v676_v53, %v672_v42  ;;  %v722_v12 = vstv %s1811_s28  ;;  %v977_v61 = vld [vmem:[%s1974_s1 + $0xc] sm:$0x3] }
  0x84   :  { %933 = vst [vmem:[%s1979_s6 + $0xc] sm:$0x3] %v690_v59  ;;  %v699_v9 = vadd.f32 %v934_v54, %v698_v60  ;;  %v723_v14 = vadd.f32 %v722_v12, %v719_v4  ;;  %v726_v16 = vstv %s1813_s13  ;;  %v732_v17 = vstv %s1819_s25  ;;  %s1909_s13 = sld [smem:[#allocation6 + $0x187]] }
  0x85   :  { %v724_v15 = vadd.f32 %v722_v12, %v720_v7  ;;  %v683_v11 = vadd.f32 %v681_v2, %v677_v10  ;;  %v684_v18 = vadd.f32 %v682_v63, %v678_v51  ;;  %v727_v19 = vmul.f32 %v1763_v1, %v726_v16  ;;  %v952_v2 = vld [vmem:[%s1979_s6 + $0x1e] sm:$0x3]  ;;  %v978_v12 = vld [vmem:[%s1974_s1 + $0xe] sm:$0x3] }
  0x86   :  { %935 = vst [vmem:[%s1979_s6 + $0x1c] sm:$0x3] %v699_v9  ;;  %v728_v22 = vmul.f32 %v1769_v62, %v726_v16  ;;  %v733_v13 = vmul.f32 %v1775_v6, %v732_v17  ;;  %v734_v20 = vmul.f32 %v1781_v3, %v732_v17  ;;  %v738_v24 = vstv %s1830_s5 }
  0x87   :  { %v744_v26 = vstv %s1851_s16  ;;  %v703_v29 = vsel %vm182_vm0, %v683_v11, 0.0  ;;  %v704_v25 = vsel %vm182_vm0, %v684_v18, 0.0  ;;  %v710_v30 = vmul.f32 %v683_v11, %v683_v11 }
  0x88   :  { %v711_v32 = vmul.f32 %v684_v18, %v684_v18  ;;  %v705_v1 = vadd.f32 %v704_v25, %v703_v29  ;;  %v729_v62 = vadd.f32 %v727_v19, %v723_v14  ;;  %v730_v6 = vadd.f32 %v728_v22, %v724_v15 }
  0x89   :  { %v739_v3 = vmul.f32 %v1802_v21, %v738_v24  ;;  %v712_v34 = vsel %vm182_vm0, %v710_v30, 0.0  ;;  %v740_v37 = vmul.f32 %v1808_v23, %v738_v24  ;;  %v745_v38 = vmul.f32 %v1827_v36, %v744_v26 }
  0x8a   :  { %v713_v35 = vsel %vm182_vm0, %v711_v32, 0.0  ;;  %v706_v40 = vadd.f32 %v936_v27, %v705_v1  ;;  %v735_v45 = vadd.f32 %v733_v13, %v729_v62  ;;  %v736_v46 = vadd.f32 %v734_v20, %v730_v6  ;;  %v956_v20 = vld [vmem:[%s1979_s6 + $0x3e] sm:$0x3] }
  0x8b   :  { %v714_v44 = vadd.f32 %v713_v35, %v712_v34  ;;  %v746_v21 = vmul.f32 %v1835_v28, %v744_v26  ;;  %v748_v47 = vstv %s1869_s26  ;;  %v752_v48 = vstv %s1884_s11  ;;  %v976_v28 = vld [vmem:[%s1974_s1 + $0x4] sm:$0x3] }
  0x8c   :  { %v758_v49 = vstv %s1890_s14  ;;  %937 = vst [vmem:[%s1979_s6 + $0x2c] sm:$0x3] %v706_v40  ;;  %v741_v52 = vadd.f32 %v739_v3, %v735_v45  ;;  %v742_v0 = vadd.f32 %v740_v37, %v736_v46  ;;  %v749_v39 = vadd.f32 %v748_v47, %v745_v38 }
  0x8d   :  { %v715_v50 = vadd.f32 %v938_v33, %v714_v44  ;;  %v750_v23 = vadd.f32 %v748_v47, %v746_v21  ;;  %v753_v36 = vmul.f32 %v1841_v31, %v752_v48  ;;  %v754_v53 = vmul.f32 %v1847_v43, %v752_v48 }
  0x8e   :  { %v759_v54 = vmul.f32 %v976_v28, %v758_v49  ;;  %v771_v56 = vsel %vm182_vm0, %v741_v52, 0.0  ;;  %v772_v31 = vsel %vm182_vm0, %v742_v0, 0.0  ;;  %v778_v57 = vmul.f32 %v741_v52, %v741_v52 }
  0x8f   :  { %939 = vst [vmem:[%s1979_s6 + $0x3c] sm:$0x3] %v715_v50  ;;  %v779_v43 = vmul.f32 %v742_v0, %v742_v0  ;;  %v773_v58 = vadd.f32 %v772_v31, %v771_v56  ;;  %v755_v59 = vadd.f32 %v753_v36, %v749_v39  ;;  %v756_v60 = vadd.f32 %v754_v53, %v750_v23 }
  0x90   :  { %v760_v42 = vmul.f32 %v977_v61, %v758_v49  ;;  %v780_v63 = vsel %vm182_vm0, %v778_v57, 0.0  ;;  %v764_v4 = vstv %s1909_s13 }
  0x91   :  { %v781_v8 = vsel %vm182_vm0, %v779_v43, 0.0  ;;  %v774_v5 = vadd.f32 %v950_v55, %v773_v58  ;;  %v761_v9 = vadd.f32 %v759_v54, %v755_v59  ;;  %v765_v51 = vmul.f32 %v1874_v41, %v764_v4  ;;  %v954_v41 = vld [vmem:[%s1979_s6 + $0x2e] sm:$0x3] }
  0x92   :  { %v782_v7 = vadd.f32 %v781_v8, %v780_v63  ;;  %v762_v10 = vadd.f32 %v760_v42, %v756_v60  ;;  %v766_v14 = vmul.f32 %v978_v12, %v764_v4 }
  0x93   :  { %951 = vst [vmem:[%s1979_s6 + $0xe] sm:$0x3] %v774_v5  ;;  %v767_v16 = vadd.f32 %v765_v51, %v761_v9 }
  0x94   :  { %v783_v15 = vadd.f32 %v952_v2, %v782_v7  ;;  %v768_v17 = vadd.f32 %v766_v14, %v762_v10 }
  0x95   :  { %v787_v11 = vsel %vm182_vm0, %v767_v16, 0.0  ;;  %v794_v19 = vmul.f32 %v767_v16, %v767_v16 }
  0x96   :  { %953 = vst [vmem:[%s1979_s6 + $0x1e] sm:$0x3] %v783_v15  ;;  %v788_v18 = vsel %vm182_vm0, %v768_v17, 0.0  ;;  %v795_v22 = vmul.f32 %v768_v17, %v768_v17 }
  0x97   :  { %v789_v13 = vadd.f32 %v788_v18, %v787_v11  ;;  %v796_v24 = vsel %vm182_vm0, %v794_v19, 0.0 }
  0x98   :  { %v797_v26 = vsel %vm182_vm0, %v795_v22, 0.0 }
  0x99   :  { %v790_v27 = vadd.f32 %v954_v41, %v789_v13  ;;  %v798_v29 = vadd.f32 %v797_v26, %v796_v24 }
  0x9b   :  { %955 = vst [vmem:[%s1979_s6 + $0x2e] sm:$0x3] %v790_v27  ;;  %v799_v25 = vadd.f32 %v956_v20, %v798_v29 }
  0x9d   :  { %957 = vst [vmem:[%s1979_s6 + $0x3e] sm:$0x3] %v799_v25 }
  0x9e   :  { %805 = vsyncpa [#allocation3], 1 }
  0x9f   :  { %806 = vsyncpa [#allocation5], 1 }
  0xa0   :  { %807 = vsyncpa [#allocation8], 1 }

</bundles_post_ra>
